<compile_context>
chip_gen: v7x
topology: tpu7x:2x2x1
jax: 0.10.0
libtpu: 0.0.40
codegen_flags: <defaults>
</compile_context>

<pallas_src>
import math
from functools import partial

import jax
import jax.numpy as jnp
from jax.experimental import pallas as pl
from jax.experimental.pallas import tpu as pltpu


def _generator_kernel(z_ref,
                      w1_ref, b1_ref,
                      w2_ref, g2_ref, be2_ref,
                      w3_ref, g3_ref, be3_ref,
                      w4_ref, g4_ref, be4_ref,
                      w5_ref, b5_ref,
                      out_ref,
                      h_ref,
                      *, b_true):
    """Grid axis 0 tiles the output columns of layer 5.

    Layers 1-4 are computed once (j == 0) into the resident VMEM scratch
    `h_ref`; every grid step then does one bf16 MXU matmul of that hidden
    state against a (1024, TN) tile of w5, bias-add, tanh, store.
    """
    j = pl.program_id(0)

    @pl.when(j == 0)
    def _compute_hidden():
        def leaky_relu(x):
            return jnp.where(x >= 0.0, x, 0.2 * x)

        def matmul(x, w_ref):
            # bf16 operands on the MXU, f32 accumulation; activations stay f32
            # elsewhere (v5e VPU/EUP have no bf16 path).
            return jnp.dot(x.astype(jnp.bfloat16), w_ref[...],
                           preferred_element_type=jnp.float32)

        b_pad = z_ref.shape[0]
        row_ids = jax.lax.broadcasted_iota(jnp.int32, (b_pad, 1), 0)
        row_mask = (row_ids < b_true).astype(jnp.float32)   # exclude padded rows
        inv_b = 1.0 / float(b_true)

        def batch_norm(x, gamma, beta):
            # Training-mode BN1d(eps=0.8) over the real batch rows only,
            # folded into one FMA:  x * scale + shift.
            xm = x * row_mask
            mean = jnp.sum(xm, axis=0, keepdims=True) * inv_b
            mean_sq = jnp.sum(xm * x, axis=0, keepdims=True) * inv_b
            var = mean_sq - mean * mean                      # E[x^2] - mean^2
            scale = jax.lax.rsqrt(var + 0.8) * gamma
            shift = beta - mean * scale
            return x * scale + shift

        z = z_ref[...].astype(jnp.float32)
        h = leaky_relu(matmul(z, w1_ref) + b1_ref[...])                               # (Bp, 128)
        # Linear biases of layers 2-4 are algebraically cancelled by the
        # following training-mode BatchNorm, so they are omitted entirely.
        h = leaky_relu(batch_norm(matmul(h, w2_ref), g2_ref[...], be2_ref[...]))      # (Bp, 256)
        h = leaky_relu(batch_norm(matmul(h, w3_ref), g3_ref[...], be3_ref[...]))      # (Bp, 512)
        h = leaky_relu(batch_norm(matmul(h, w4_ref), g4_ref[...], be4_ref[...]))      # (Bp, 1024)
        h_ref[...] = h

    y = jnp.dot(h_ref[...].astype(jnp.bfloat16), w5_ref[...],
                preferred_element_type=jnp.float32) + b5_ref[...]
    out_ref[...] = jnp.tanh(y).astype(out_ref.dtype)


def _round_up(x, m):
    return ((x + m - 1) // m) * m


def _pick_col_tile(p_pad, max_tile=2048):
    """Largest multiple of 128 that divides p_pad and is <= max_tile."""
    t = max(128, (min(p_pad, max_tile) // 128) * 128)
    while p_pad % t != 0:
        t -= 128
    return t


def generator_forward(params, cond, z, img_dims):
    """JAX wrapper mirroring Generator.forward(cond, z)."""
    if cond is not None and "label" in cond:
        assert cond["label"].shape[0] == z.shape[0], "shape not match"
        z = jnp.concatenate([z, cond["label"]], axis=1)

    B, d_in = z.shape
    P = int(math.prod(img_dims))

    B_pad = max(8, _round_up(B, 8))          # sublane multiple
    P_pad = _round_up(P, 128)                # lane-dense output stores
    TN = _pick_col_tile(P_pad)               # layer-5 output-column tile
    n_col_tiles = P_pad // TN

    def bf16(x):
        return x.astype(jnp.bfloat16)

    # Pad batch rows (zeros; BN stats mask them) and w5/b5 output columns.
    z_p = jnp.zeros((B_pad, d_in), jnp.float32).at[:B, :].set(z.astype(jnp.float32))
    w5 = jnp.zeros((1024, P_pad), jnp.bfloat16).at[:, :P].set(bf16(params["w5"]))
    b5 = jnp.zeros((1, P_pad), jnp.float32).at[:, :P].set(params["b5"].astype(jnp.float32))

    operands = (
        z_p,
        bf16(params["w1"]), params["b1"].astype(jnp.float32),
        bf16(params["w2"]), params["g2"].astype(jnp.float32), params["be2"].astype(jnp.float32),
        bf16(params["w3"]), params["g3"].astype(jnp.float32), params["be3"].astype(jnp.float32),
        bf16(params["w4"]), params["g4"].astype(jnp.float32), params["be4"].astype(jnp.float32),
        w5, b5,
    )

    def full_spec(shape):
        return pl.BlockSpec(shape, lambda j: tuple(0 for _ in shape))

    in_specs = [full_spec(op.shape) for op in operands[:-2]]
    in_specs += [pl.BlockSpec((1024, TN), lambda j: (0, j)),   # w5 column tile
                 pl.BlockSpec((1, TN), lambda j: (0, j))]      # b5 column tile
    out_spec = pl.BlockSpec((B_pad, TN), lambda j: (0, j))

    # VMEM budget: resident operands + double-buffered per-tile windows +
    # hidden-state scratch + headroom; capped well below v7x's 64 MiB.
    resident_bytes = sum(int(math.prod(op.shape)) * op.dtype.itemsize
                         for op in operands[:-2])
    tile_bytes = 1024 * TN * 2 + TN * 4 + B_pad * TN * 4       # w5 / b5 / out tiles
    scratch_bytes = B_pad * 1024 * 4
    need = 2 * (resident_bytes + tile_bytes) + scratch_bytes
    vmem_limit = int(min(need + (8 << 20), 48 << 20))

    flat = pl.pallas_call(
        partial(_generator_kernel, b_true=B),
        out_shape=jax.ShapeDtypeStruct((B_pad, P_pad), jnp.float32),
        grid=(n_col_tiles,),
        in_specs=in_specs,
        out_specs=out_spec,
        scratch_shapes=[pltpu.VMEM((B_pad, 1024), jnp.float32)],
        compiler_params=pltpu.CompilerParams(
            dimension_semantics=("arbitrary",),
            vmem_limit_bytes=vmem_limit),
    )(*operands)

    return flat[:B, :P].reshape(B, *img_dims)


def init_params(key, latent_dim, d_cond_label, img_dims):
    """Deterministic synthetic parameters (shapes match the PyTorch module)."""
    d_in = latent_dim + (d_cond_label if d_cond_label is not None else 0)
    p_out = int(math.prod(img_dims))
    dims = [d_in, 128, 256, 512, 1024, p_out]

    params = {}
    keys = jax.random.split(key, 10)
    for li in range(5):
        fan_in, fan_out = dims[li], dims[li + 1]
        bound = 1.0 / math.sqrt(fan_in)
        w = jax.random.uniform(keys[2 * li], (fan_in, fan_out),
                               minval=-bound, maxval=bound, dtype=jnp.float32)
        b = jax.random.uniform(keys[2 * li + 1], (1, fan_out),
                               minval=-bound, maxval=bound, dtype=jnp.float32)
        params[f"w{li + 1}"] = w
        params[f"b{li + 1}"] = b          # b2/b3/b4 exist but are BN-cancelled
    # BatchNorm affine params (layers 2..4): gamma=1, beta=0 (PyTorch default)
    for li, fan_out in zip((2, 3, 4), (256, 512, 1024)):
        params[f"g{li}"] = jnp.ones((1, fan_out), jnp.float32)
        params[f"be{li}"] = jnp.zeros((1, fan_out), jnp.float32)
    return params


if __name__ == "__main__":
    latent_dim = 16
    d_cond_label = 10
    img_dims = (1, 8, 8)        # (C, H, W)
    batch = 4

    key = jax.random.PRNGKey(0)
    k_param, k_z, k_label = jax.random.split(key, 3)

    params = init_params(k_param, latent_dim, d_cond_label, img_dims)
    z = jax.random.normal(k_z, (batch, latent_dim), dtype=jnp.float32)
    label = jax.random.normal(k_label, (batch, d_cond_label), dtype=jnp.float32)
    cond = {"label": label}

    img = generator_forward(params, cond, z, img_dims)
    img = jax.block_until_ready(img)

    assert img.shape == (batch, *img_dims), img.shape
    assert bool(jnp.all(jnp.isfinite(img)))
    assert bool(jnp.all(jnp.abs(img) <= 1.0))   # tanh output range
    print("KERNEL_OK")
</pallas_src>

<mosaic_0001>
module attributes {stable_mosaic.version = 11 : i64} {
  func.func @_generator_kernel(%arg0: i32, %arg1: memref<8x26xf32, #tpu.memory_space<vmem>>, %arg2: memref<26x128xbf16, #tpu.memory_space<vmem>>, %arg3: memref<1x128xf32, #tpu.memory_space<vmem>>, %arg4: memref<128x256xbf16, #tpu.memory_space<vmem>>, %arg5: memref<1x256xf32, #tpu.memory_space<vmem>>, %arg6: memref<1x256xf32, #tpu.memory_space<vmem>>, %arg7: memref<256x512xbf16, #tpu.memory_space<vmem>>, %arg8: memref<1x512xf32, #tpu.memory_space<vmem>>, %arg9: memref<1x512xf32, #tpu.memory_space<vmem>>, %arg10: memref<512x1024xbf16, #tpu.memory_space<vmem>>, %arg11: memref<1x1024xf32, #tpu.memory_space<vmem>>, %arg12: memref<1x1024xf32, #tpu.memory_space<vmem>>, %arg13: memref<1024x128xbf16, #tpu.memory_space<vmem>>, %arg14: memref<1x128xf32, #tpu.memory_space<vmem>>, %arg15: memref<8x128xf32, #tpu.memory_space<vmem>>, %arg16: memref<8x1024xf32, #tpu.memory_space<vmem>>) attributes {dimension_semantics = [#tpu.dimension_semantics<arbitrary>], iteration_bounds = array<i64: 1>, scalar_prefetch = 0 : i64, scratch_operands = 1 : i64, tpu.core_type = #tpu.core_type<tc>, window_params = [{pipeline_mode = #tpu.pipeline_mode<synchronous>, transform_indices = @transform_0, window_bounds = array<i64: 8, 26>}, {pipeline_mode = #tpu.pipeline_mode<synchronous>, transform_indices = @transform_1, window_bounds = array<i64: 26, 128>}, {pipeline_mode = #tpu.pipeline_mode<synchronous>, transform_indices = @transform_2, window_bounds = array<i64: 1, 128>}, {pipeline_mode = #tpu.pipeline_mode<synchronous>, transform_indices = @transform_3, window_bounds = array<i64: 128, 256>}, {pipeline_mode = #tpu.pipeline_mode<synchronous>, transform_indices = @transform_4, window_bounds = array<i64: 1, 256>}, {pipeline_mode = #tpu.pipeline_mode<synchronous>, transform_indices = @transform_5, window_bounds = array<i64: 1, 256>}, {pipeline_mode = #tpu.pipeline_mode<synchronous>, transform_indices = @transform_6, window_bounds = array<i64: 256, 512>}, {pipeline_mode = #tpu.pipeline_mode<synchronous>, transform_indices = @transform_7, window_bounds = array<i64: 1, 512>}, {pipeline_mode = #tpu.pipeline_mode<synchronous>, transform_indices = @transform_8, window_bounds = array<i64: 1, 512>}, {pipeline_mode = #tpu.pipeline_mode<synchronous>, transform_indices = @transform_9, window_bounds = array<i64: 512, 1024>}, {pipeline_mode = #tpu.pipeline_mode<synchronous>, transform_indices = @transform_10, window_bounds = array<i64: 1, 1024>}, {pipeline_mode = #tpu.pipeline_mode<synchronous>, transform_indices = @transform_11, window_bounds = array<i64: 1, 1024>}, {transform_indices = @transform_12, window_bounds = array<i64: 1024, 128>}, {transform_indices = @transform_13, window_bounds = array<i64: 1, 128>}, {transform_indices = @transform_14, window_bounds = array<i64: 8, 128>}]} {
    %c0_i32 = arith.constant 0 : i32
    %0 = arith.cmpi eq, %arg0, %c0_i32 : i32
    %1 = arith.extui %0 : i1 to i32
    %c0_i32_0 = arith.constant 0 : i32
    %2 = arith.cmpi ne, %1, %c0_i32_0 : i32
    scf.if %2 {
      %12 = tpu.iota {dimensions = array<i32: 0>} : vector<8x1xi32>
      %c4_i32 = arith.constant 4 : i32
      %13 = vector.broadcast %c4_i32 : i32 to vector<8x1xi32>
      %14 = arith.cmpi slt, %12, %13 : vector<8x1xi32>
      %15 = arith.extui %14 : vector<8x1xi1> to vector<8x1xi32>
      %16 = arith.sitofp %15 : vector<8x1xi32> to vector<8x1xf32>
      %c0_8 = arith.constant 0 : index
      %c0_9 = arith.constant 0 : index
      %17 = vector.load %arg1[%c0_8, %c0_9] : memref<8x26xf32, #tpu.memory_space<vmem>>, vector<8x26xf32>
      %18 = arith.truncf %17 : vector<8x26xf32> to vector<8x26xbf16>
      %c0_10 = arith.constant 0 : index
      %c0_11 = arith.constant 0 : index
      %19 = vector.load %arg2[%c0_10, %c0_11] : memref<26x128xbf16, #tpu.memory_space<vmem>>, vector<26x128xbf16>
      %cst_12 = arith.constant dense<0.000000e+00> : vector<8x128xf32>
      %20 = tpu.matmul %18, %19, %cst_12 {dimension_numbers = #tpu.dot_dimension_numbers<[1], [0], [0], [1], [0, 0, 1, 1], [], []>} : vector<8x26xbf16>, vector<26x128xbf16>, vector<8x128xf32> -> vector<8x128xf32>
      %c0_13 = arith.constant 0 : index
      %c0_14 = arith.constant 0 : index
      %21 = vector.load %arg3[%c0_13, %c0_14] : memref<1x128xf32, #tpu.memory_space<vmem>>, vector<1x128xf32>
      %22 = vector.broadcast %21 : vector<1x128xf32> to vector<8x128xf32>
      %23 = arith.addf %20, %22 : vector<8x128xf32>
      %cst_15 = arith.constant 0.000000e+00 : f32
      %24 = vector.broadcast %cst_15 : f32 to vector<8x128xf32>
      %25 = arith.cmpf oge, %23, %24 : vector<8x128xf32>
      %cst_16 = arith.constant 2.000000e-01 : f32
      %26 = vector.broadcast %cst_16 : f32 to vector<8x128xf32>
      %27 = arith.mulf %26, %23 : vector<8x128xf32>
      %28 = arith.select %25, %23, %27 : vector<8x128xi1>, vector<8x128xf32>
      %29 = arith.truncf %28 : vector<8x128xf32> to vector<8x128xbf16>
      %c0_17 = arith.constant 0 : index
      %c0_18 = arith.constant 0 : index
      %30 = vector.load %arg4[%c0_17, %c0_18] : memref<128x256xbf16, #tpu.memory_space<vmem>>, vector<128x256xbf16>
      %cst_19 = arith.constant dense<0.000000e+00> : vector<8x256xf32>
      %31 = tpu.matmul %29, %30, %cst_19 {dimension_numbers = #tpu.dot_dimension_numbers<[1], [0], [0], [1], [0, 0, 1, 1], [], []>} : vector<8x128xbf16>, vector<128x256xbf16>, vector<8x256xf32> -> vector<8x256xf32>
      %c0_20 = arith.constant 0 : index
      %c0_21 = arith.constant 0 : index
      %32 = vector.load %arg5[%c0_20, %c0_21] : memref<1x256xf32, #tpu.memory_space<vmem>>, vector<1x256xf32>
      %c0_22 = arith.constant 0 : index
      %c0_23 = arith.constant 0 : index
      %33 = vector.load %arg6[%c0_22, %c0_23] : memref<1x256xf32, #tpu.memory_space<vmem>>, vector<1x256xf32>
      %34 = vector.broadcast %16 : vector<8x1xf32> to vector<8x256xf32>
      %35 = arith.mulf %31, %34 : vector<8x256xf32>
      %cst_24 = arith.constant dense<0.000000e+00> : vector<256xf32>
      %36 = vector.multi_reduction <add>, %35, %cst_24 [0] : vector<8x256xf32> to vector<256xf32>
      %37 = vector.shape_cast %36 : vector<256xf32> to vector<1x256xf32>
      %cst_25 = arith.constant 2.500000e-01 : f32
      %38 = vector.broadcast %cst_25 : f32 to vector<1x256xf32>
      %39 = arith.mulf %37, %38 : vector<1x256xf32>
      %40 = arith.mulf %35, %31 : vector<8x256xf32>
      %cst_26 = arith.constant dense<0.000000e+00> : vector<256xf32>
      %41 = vector.multi_reduction <add>, %40, %cst_26 [0] : vector<8x256xf32> to vector<256xf32>
      %42 = vector.shape_cast %41 : vector<256xf32> to vector<1x256xf32>
      %cst_27 = arith.constant 2.500000e-01 : f32
      %43 = vector.broadcast %cst_27 : f32 to vector<1x256xf32>
      %44 = arith.mulf %42, %43 : vector<1x256xf32>
      %45 = arith.mulf %39, %39 : vector<1x256xf32>
      %46 = arith.subf %44, %45 : vector<1x256xf32>
      %cst_28 = arith.constant 8.000000e-01 : f32
      %47 = vector.broadcast %cst_28 : f32 to vector<1x256xf32>
      %48 = arith.addf %46, %47 : vector<1x256xf32>
      %49 = math.rsqrt %48 : vector<1x256xf32>
      %50 = arith.mulf %49, %32 : vector<1x256xf32>
      %51 = arith.mulf %39, %50 : vector<1x256xf32>
      %52 = arith.subf %33, %51 : vector<1x256xf32>
      %53 = vector.broadcast %50 : vector<1x256xf32> to vector<8x256xf32>
      %54 = arith.mulf %31, %53 : vector<8x256xf32>
      %55 = vector.broadcast %52 : vector<1x256xf32> to vector<8x256xf32>
      %56 = arith.addf %54, %55 : vector<8x256xf32>
      %cst_29 = arith.constant 0.000000e+00 : f32
      %57 = vector.broadcast %cst_29 : f32 to vector<8x256xf32>
      %58 = arith.cmpf oge, %56, %57 : vector<8x256xf32>
      %cst_30 = arith.constant 2.000000e-01 : f32
      %59 = vector.broadcast %cst_30 : f32 to vector<8x256xf32>
      %60 = arith.mulf %59, %56 : vector<8x256xf32>
      %61 = arith.select %58, %56, %60 : vector<8x256xi1>, vector<8x256xf32>
      %62 = arith.truncf %61 : vector<8x256xf32> to vector<8x256xbf16>
      %c0_31 = arith.constant 0 : index
      %c0_32 = arith.constant 0 : index
      %63 = vector.load %arg7[%c0_31, %c0_32] : memref<256x512xbf16, #tpu.memory_space<vmem>>, vector<256x512xbf16>
      %cst_33 = arith.constant dense<0.000000e+00> : vector<8x512xf32>
      %64 = tpu.matmul %62, %63, %cst_33 {dimension_numbers = #tpu.dot_dimension_numbers<[1], [0], [0], [1], [0, 0, 1, 1], [], []>} : vector<8x256xbf16>, vector<256x512xbf16>, vector<8x512xf32> -> vector<8x512xf32>
      %c0_34 = arith.constant 0 : index
      %c0_35 = arith.constant 0 : index
      %65 = vector.load %arg8[%c0_34, %c0_35] : memref<1x512xf32, #tpu.memory_space<vmem>>, vector<1x512xf32>
      %c0_36 = arith.constant 0 : index
      %c0_37 = arith.constant 0 : index
      %66 = vector.load %arg9[%c0_36, %c0_37] : memref<1x512xf32, #tpu.memory_space<vmem>>, vector<1x512xf32>
      %67 = vector.broadcast %16 : vector<8x1xf32> to vector<8x512xf32>
      %68 = arith.mulf %64, %67 : vector<8x512xf32>
      %cst_38 = arith.constant dense<0.000000e+00> : vector<512xf32>
      %69 = vector.multi_reduction <add>, %68, %cst_38 [0] : vector<8x512xf32> to vector<512xf32>
      %70 = vector.shape_cast %69 : vector<512xf32> to vector<1x512xf32>
      %cst_39 = arith.constant 2.500000e-01 : f32
      %71 = vector.broadcast %cst_39 : f32 to vector<1x512xf32>
      %72 = arith.mulf %70, %71 : vector<1x512xf32>
      %73 = arith.mulf %68, %64 : vector<8x512xf32>
      %cst_40 = arith.constant dense<0.000000e+00> : vector<512xf32>
      %74 = vector.multi_reduction <add>, %73, %cst_40 [0] : vector<8x512xf32> to vector<512xf32>
      %75 = vector.shape_cast %74 : vector<512xf32> to vector<1x512xf32>
      %cst_41 = arith.constant 2.500000e-01 : f32
      %76 = vector.broadcast %cst_41 : f32 to vector<1x512xf32>
      %77 = arith.mulf %75, %76 : vector<1x512xf32>
      %78 = arith.mulf %72, %72 : vector<1x512xf32>
      %79 = arith.subf %77, %78 : vector<1x512xf32>
      %cst_42 = arith.constant 8.000000e-01 : f32
      %80 = vector.broadcast %cst_42 : f32 to vector<1x512xf32>
      %81 = arith.addf %79, %80 : vector<1x512xf32>
      %82 = math.rsqrt %81 : vector<1x512xf32>
      %83 = arith.mulf %82, %65 : vector<1x512xf32>
      %84 = arith.mulf %72, %83 : vector<1x512xf32>
      %85 = arith.subf %66, %84 : vector<1x512xf32>
      %86 = vector.broadcast %83 : vector<1x512xf32> to vector<8x512xf32>
      %87 = arith.mulf %64, %86 : vector<8x512xf32>
      %88 = vector.broadcast %85 : vector<1x512xf32> to vector<8x512xf32>
      %89 = arith.addf %87, %88 : vector<8x512xf32>
      %cst_43 = arith.constant 0.000000e+00 : f32
      %90 = vector.broadcast %cst_43 : f32 to vector<8x512xf32>
      %91 = arith.cmpf oge, %89, %90 : vector<8x512xf32>
      %cst_44 = arith.constant 2.000000e-01 : f32
      %92 = vector.broadcast %cst_44 : f32 to vector<8x512xf32>
      %93 = arith.mulf %92, %89 : vector<8x512xf32>
      %94 = arith.select %91, %89, %93 : vector<8x512xi1>, vector<8x512xf32>
      %95 = arith.truncf %94 : vector<8x512xf32> to vector<8x512xbf16>
      %c0_45 = arith.constant 0 : index
      %c0_46 = arith.constant 0 : index
      %96 = vector.load %arg10[%c0_45, %c0_46] : memref<512x1024xbf16, #tpu.memory_space<vmem>>, vector<512x1024xbf16>
      %cst_47 = arith.constant dense<0.000000e+00> : vector<8x1024xf32>
      %97 = tpu.matmul %95, %96, %cst_47 {dimension_numbers = #tpu.dot_dimension_numbers<[1], [0], [0], [1], [0, 0, 1, 1], [], []>} : vector<8x512xbf16>, vector<512x1024xbf16>, vector<8x1024xf32> -> vector<8x1024xf32>
      %c0_48 = arith.constant 0 : index
      %c0_49 = arith.constant 0 : index
      %98 = vector.load %arg11[%c0_48, %c0_49] : memref<1x1024xf32, #tpu.memory_space<vmem>>, vector<1x1024xf32>
      %c0_50 = arith.constant 0 : index
      %c0_51 = arith.constant 0 : index
      %99 = vector.load %arg12[%c0_50, %c0_51] : memref<1x1024xf32, #tpu.memory_space<vmem>>, vector<1x1024xf32>
      %100 = vector.broadcast %16 : vector<8x1xf32> to vector<8x1024xf32>
      %101 = arith.mulf %97, %100 : vector<8x1024xf32>
      %cst_52 = arith.constant dense<0.000000e+00> : vector<1024xf32>
      %102 = vector.multi_reduction <add>, %101, %cst_52 [0] : vector<8x1024xf32> to vector<1024xf32>
      %103 = vector.shape_cast %102 : vector<1024xf32> to vector<1x1024xf32>
      %cst_53 = arith.constant 2.500000e-01 : f32
      %104 = vector.broadcast %cst_53 : f32 to vector<1x1024xf32>
      %105 = arith.mulf %103, %104 : vector<1x1024xf32>
      %106 = arith.mulf %101, %97 : vector<8x1024xf32>
      %cst_54 = arith.constant dense<0.000000e+00> : vector<1024xf32>
      %107 = vector.multi_reduction <add>, %106, %cst_54 [0] : vector<8x1024xf32> to vector<1024xf32>
      %108 = vector.shape_cast %107 : vector<1024xf32> to vector<1x1024xf32>
      %cst_55 = arith.constant 2.500000e-01 : f32
      %109 = vector.broadcast %cst_55 : f32 to vector<1x1024xf32>
      %110 = arith.mulf %108, %109 : vector<1x1024xf32>
      %111 = arith.mulf %105, %105 : vector<1x1024xf32>
      %112 = arith.subf %110, %111 : vector<1x1024xf32>
      %cst_56 = arith.constant 8.000000e-01 : f32
      %113 = vector.broadcast %cst_56 : f32 to vector<1x1024xf32>
      %114 = arith.addf %112, %113 : vector<1x1024xf32>
      %115 = math.rsqrt %114 : vector<1x1024xf32>
      %116 = arith.mulf %115, %98 : vector<1x1024xf32>
      %117 = arith.mulf %105, %116 : vector<1x1024xf32>
      %118 = arith.subf %99, %117 : vector<1x1024xf32>
      %119 = vector.broadcast %116 : vector<1x1024xf32> to vector<8x1024xf32>
      %120 = arith.mulf %97, %119 : vector<8x1024xf32>
      %121 = vector.broadcast %118 : vector<1x1024xf32> to vector<8x1024xf32>
      %122 = arith.addf %120, %121 : vector<8x1024xf32>
      %cst_57 = arith.constant 0.000000e+00 : f32
      %123 = vector.broadcast %cst_57 : f32 to vector<8x1024xf32>
      %124 = arith.cmpf oge, %122, %123 : vector<8x1024xf32>
      %cst_58 = arith.constant 2.000000e-01 : f32
      %125 = vector.broadcast %cst_58 : f32 to vector<8x1024xf32>
      %126 = arith.mulf %125, %122 : vector<8x1024xf32>
      %127 = arith.select %124, %122, %126 : vector<8x1024xi1>, vector<8x1024xf32>
      %c0_59 = arith.constant 0 : index
      %c0_60 = arith.constant 0 : index
      %128 = vector.load %arg16[%c0_59, %c0_60] : memref<8x1024xf32, #tpu.memory_space<vmem>>, vector<8x1024xf32>
      tpu.vector_store %arg16[%c0_59, %c0_60], %127 {strides = array<i32>} : memref<8x1024xf32, #tpu.memory_space<vmem>>, vector<8x1024xf32>,
    } else {
    }
    %c0 = arith.constant 0 : index
    %c0_1 = arith.constant 0 : index
    %3 = vector.load %arg16[%c0, %c0_1] : memref<8x1024xf32, #tpu.memory_space<vmem>>, vector<8x1024xf32>
    %4 = arith.truncf %3 : vector<8x1024xf32> to vector<8x1024xbf16>
    %c0_2 = arith.constant 0 : index
    %c0_3 = arith.constant 0 : index
    %5 = vector.load %arg13[%c0_2, %c0_3] : memref<1024x128xbf16, #tpu.memory_space<vmem>>, vector<1024x128xbf16>
    %cst = arith.constant dense<0.000000e+00> : vector<8x128xf32>
    %6 = tpu.matmul %4, %5, %cst {dimension_numbers = #tpu.dot_dimension_numbers<[1], [0], [0], [1], [0, 0, 1, 1], [], []>} : vector<8x1024xbf16>, vector<1024x128xbf16>, vector<8x128xf32> -> vector<8x128xf32>
    %c0_4 = arith.constant 0 : index
    %c0_5 = arith.constant 0 : index
    %7 = vector.load %arg14[%c0_4, %c0_5] : memref<1x128xf32, #tpu.memory_space<vmem>>, vector<1x128xf32>
    %8 = vector.broadcast %7 : vector<1x128xf32> to vector<8x128xf32>
    %9 = arith.addf %6, %8 : vector<8x128xf32>
    %10 = math.tanh %9 : vector<8x128xf32>
    %c0_6 = arith.constant 0 : index
    %c0_7 = arith.constant 0 : index
    %11 = vector.load %arg15[%c0_6, %c0_7] : memref<8x128xf32, #tpu.memory_space<vmem>>, vector<8x128xf32>
    tpu.vector_store %arg15[%c0_6, %c0_7], %10 {strides = array<i32>} : memref<8x128xf32, #tpu.memory_space<vmem>>, vector<8x128xf32>,
    return
  }
  func.func @transform_0(%arg0: i32) -> (i32, i32) {
    %c0_i32 = arith.constant 0 : i32
    %c0_i32_0 = arith.constant 0 : i32
    %c0_i32_1 = arith.constant 0 : i32
    return %c0_i32, %c0_i32_0 : i32, i32
  }
  func.func @transform_1(%arg0: i32) -> (i32, i32) {
    %c0_i32 = arith.constant 0 : i32
    %c0_i32_0 = arith.constant 0 : i32
    %c0_i32_1 = arith.constant 0 : i32
    return %c0_i32, %c0_i32_0 : i32, i32
  }
  func.func @transform_2(%arg0: i32) -> (i32, i32) {
    %c0_i32 = arith.constant 0 : i32
    %c0_i32_0 = arith.constant 0 : i32
    %c0_i32_1 = arith.constant 0 : i32
    return %c0_i32, %c0_i32_0 : i32, i32
  }
  func.func @transform_3(%arg0: i32) -> (i32, i32) {
    %c0_i32 = arith.constant 0 : i32
    %c0_i32_0 = arith.constant 0 : i32
    %c0_i32_1 = arith.constant 0 : i32
    return %c0_i32, %c0_i32_0 : i32, i32
  }
  func.func @transform_4(%arg0: i32) -> (i32, i32) {
    %c0_i32 = arith.constant 0 : i32
    %c0_i32_0 = arith.constant 0 : i32
    %c0_i32_1 = arith.constant 0 : i32
    return %c0_i32, %c0_i32_0 : i32, i32
  }
  func.func @transform_5(%arg0: i32) -> (i32, i32) {
    %c0_i32 = arith.constant 0 : i32
    %c0_i32_0 = arith.constant 0 : i32
    %c0_i32_1 = arith.constant 0 : i32
    return %c0_i32, %c0_i32_0 : i32, i32
  }
  func.func @transform_6(%arg0: i32) -> (i32, i32) {
    %c0_i32 = arith.constant 0 : i32
    %c0_i32_0 = arith.constant 0 : i32
    %c0_i32_1 = arith.constant 0 : i32
    return %c0_i32, %c0_i32_0 : i32, i32
  }
  func.func @transform_7(%arg0: i32) -> (i32, i32) {
    %c0_i32 = arith.constant 0 : i32
    %c0_i32_0 = arith.constant 0 : i32
    %c0_i32_1 = arith.constant 0 : i32
    return %c0_i32, %c0_i32_0 : i32, i32
  }
  func.func @transform_8(%arg0: i32) -> (i32, i32) {
    %c0_i32 = arith.constant 0 : i32
    %c0_i32_0 = arith.constant 0 : i32
    %c0_i32_1 = arith.constant 0 : i32
    return %c0_i32, %c0_i32_0 : i32, i32
  }
  func.func @transform_9(%arg0: i32) -> (i32, i32) {
    %c0_i32 = arith.constant 0 : i32
    %c0_i32_0 = arith.constant 0 : i32
    %c0_i32_1 = arith.constant 0 : i32
    return %c0_i32, %c0_i32_0 : i32, i32
  }
  func.func @transform_10(%arg0: i32) -> (i32, i32) {
    %c0_i32 = arith.constant 0 : i32
    %c0_i32_0 = arith.constant 0 : i32
    %c0_i32_1 = arith.constant 0 : i32
    return %c0_i32, %c0_i32_0 : i32, i32
  }
  func.func @transform_11(%arg0: i32) -> (i32, i32) {
    %c0_i32 = arith.constant 0 : i32
    %c0_i32_0 = arith.constant 0 : i32
    %c0_i32_1 = arith.constant 0 : i32
    return %c0_i32, %c0_i32_0 : i32, i32
  }
  func.func @transform_12(%arg0: i32) -> (i32, i32) {
    %c0_i32 = arith.constant 0 : i32
    %c0_i32_0 = arith.constant 0 : i32
    return %c0_i32, %arg0 : i32, i32
  }
  func.func @transform_13(%arg0: i32) -> (i32, i32) {
    %c0_i32 = arith.constant 0 : i32
    %c0_i32_0 = arith.constant 0 : i32
    return %c0_i32, %arg0 : i32, i32
  }
  func.func @transform_14(%arg0: i32) -> (i32, i32) {
    %c0_i32 = arith.constant 0 : i32
    %c0_i32_0 = arith.constant 0 : i32
    return %c0_i32, %arg0 : i32, i32
  }
}

</mosaic_0001>

<bundles_post_ra>
// kernel: tpu_custom_call.1
= control target key start
LH: loop header
LB: loop body
LE: loop exit
PB: predicated region body
PF: predicated region fallthrough
CT: control target
= control target key end

     0   :  { %19 = vsyncpa [#allocation4], 0  ;;  %s5599_s0 = inlined_call_operand.hbm [shape: f32[8,26], index: 0, kind: input, shape index: {}]   ;;  %s5600_s1 = inlined_call_operand.hbm [shape: bf16[26,128], index: 1, kind: input, shape index: {}]   ;;  %s5601_s2 = inlined_call_operand.hbm [shape: f32[1,128], index: 2, kind: input, shape index: {}]   ;;  %s5602_s3 = inlined_call_operand.hbm [shape: bf16[128,256], index: 3, kind: input, shape index: {}]   ;;  %s5603_s4 = inlined_call_operand.vmem [shape: f32[1,256], index: 4, kind: input, shape index: {}]   ;;  %s5604_s5 = inlined_call_operand.hbm [shape: f32[1,256], index: 5, kind: input, shape index: {}]   ;;  %s5605_s6 = inlined_call_operand.hbm [shape: bf16[256,512], index: 6, kind: input, shape index: {}]   ;;  %s5606_s7 = inlined_call_operand.vmem [shape: f32[1,512], index: 7, kind: input, shape index: {}]   ;;  %s5607_s8 = inlined_call_operand.vmem [shape: f32[1,512], index: 8, kind: input, shape index: {}]   ;;  %s5608_s9 = inlined_call_operand.hbm [shape: bf16[512,1024], index: 9, kind: input, shape index: {}]   ;;  %s5609_s10 = inlined_call_operand.vmem [shape: f32[1,1024], index: 10, kind: input, shape index: {}]   ;;  %s5610_s11 = inlined_call_operand.vmem [shape: f32[1,1024], index: 11, kind: input, shape index: {}]   ;;  %s5611_s12 = inlined_call_operand.hbm [shape: bf16[1024,128], index: 12, kind: input, shape index: {}]   ;;  %s5612_s13 = inlined_call_operand.vmem [shape: f32[1,128], index: 13, kind: input, shape index: {}]   ;;  %s5613_s14 = inlined_call_operand.hbm [shape: f32[8,128], index: 14, kind: output, shape index: {}]  }
   0x1   :  { %20 = vsyncpa [#allocation7], 0 }
   0x2   :  { %21 = vsyncpa [#allocation10], 0 }
   0x3   :  { %22 = vsyncpa [#allocation13], 0 }
   0x4   :  { %23 = vsyncpa [#allocation16], 0 }
   0x5   :  { %24 = vsyncpa [#allocation5], 0  ;;  %s5096_s29 = smov [#allocation6]   ;;  %s4886_s17 = scalar_lea.hbm %s5600_s1, 256 }
   0x6   :  { %s40_s30 = sshll.u32 %s5096_s29, 4  ;;  %p4887_p0 = scmp.ne.s32.totalorder %s5600_s1, %s4886_s17  ;;  %s41_s30 = int_to_ptr.vmem [resolvable:$true] %s40_s30 }
   0x7   :  { %p4890_p1 = scmp.lt.u32.totalorder %s4886_s17, %s5600_s1 }
   0x9   :  { %p4892_p2 = pnand %p4890_p1, %p4887_p0 }
   0xb   :  { %4895 = shalt.err (!%p4892_p2)
}
   0xc   :  { %s4896_s22 = scalar_lea.vmem %s41_s30, 256  ;;  %p4901_p4 = scmp.lt.s32.totalorder %s41_s30, %s41_s30 }
   0xd   :  { %p4897_p3 = scmp.ne.s32.totalorder %s41_s30, %s4896_s22  ;;  %p4902_p5 = scmp.lt.s32.totalorder %s4896_s22, %s4896_s22 }
   0xf   :  { %p4903_p6 = por %p4902_p5, %p4901_p4 }
  0x11   :  { %p4904_p7 = pnand %p4903_p6, %p4897_p3 }
  0x13   :  { %4907 = shalt.err (!%p4904_p7)
}
  0x14   :  { %s5097_s23 = smov 64   ;;  %s5098_s24 = smov 4  }
  0x15   :  { %46 = dma.hbm_to_vmem [thread:$0]  %s5600_s1, 256, %s41_s30, [#allocation7], %s5097_s23, %s5097_s23, %s5098_s24  }
  0x16   :  { %s5099_s27 = smov [#allocation9]   ;;  %s4908_s16 = scalar_lea.hbm %s5602_s3, 2048 }
  0x17   :  { %s62_s28 = sshll.u32 %s5099_s27, 4  ;;  %p4909_p8 = scmp.ne.s32.totalorder %s5602_s3, %s4908_s16  ;;  %s63_s28 = int_to_ptr.vmem [resolvable:$true] %s62_s28 }
  0x18   :  { %p4912_p9 = scmp.lt.u32.totalorder %s4908_s16, %s5602_s3 }
  0x1a   :  { %p4914_p10 = pnand %p4912_p9, %p4909_p8 }
  0x1c   :  { %4917 = shalt.err (!%p4914_p10)
}
  0x1d   :  { %s4918_s21 = scalar_lea.vmem %s63_s28, 2048  ;;  %p4923_p12 = scmp.lt.s32.totalorder %s63_s28, %s63_s28 }
  0x1e   :  { %p4919_p11 = scmp.ne.s32.totalorder %s63_s28, %s4918_s21  ;;  %p4924_p13 = scmp.lt.s32.totalorder %s4918_s21, %s4918_s21 }
  0x20   :  { %p4925_p0 = por %p4924_p13, %p4923_p12 }
  0x22   :  { %p4926_p1 = pnand %p4925_p0, %p4919_p11 }
  0x24   :  { %4929 = shalt.err (!%p4926_p1)
}
  0x25   :  { %s5100_s1 = smov 128   ;;  %s5101_s30 = smov 8  }
  0x26   :  { %68 = dma.hbm_to_vmem [thread:$0]  %s5602_s3, 2048, %s63_s28, [#allocation10], %s5100_s1, %s5100_s1, %s5101_s30  }
  0x27   :  { %s5102_s26 = smov [#allocation12]   ;;  %s4930_s16 = scalar_lea.hbm %s5605_s6, 8192 }
  0x28   :  { %s86_s27 = sshll.u32 %s5102_s26, 4  ;;  %p4931_p2 = scmp.ne.s32.totalorder %s5605_s6, %s4930_s16  ;;  %s87_s27 = int_to_ptr.vmem [resolvable:$true] %s86_s27 }
  0x29   :  { %p4934_p3 = scmp.lt.u32.totalorder %s4930_s16, %s5605_s6 }
  0x2b   :  { %p4936_p4 = pnand %p4934_p3, %p4931_p2 }
  0x2d   :  { %4939 = shalt.err (!%p4936_p4)
}
  0x2e   :  { %s4940_s21 = scalar_lea.vmem %s87_s27, 8192  ;;  %p4945_p6 = scmp.lt.s32.totalorder %s87_s27, %s87_s27 }
  0x2f   :  { %p4941_p5 = scmp.ne.s32.totalorder %s87_s27, %s4940_s21  ;;  %p4946_p7 = scmp.lt.s32.totalorder %s4940_s21, %s4940_s21 }
  0x31   :  { %p4947_p8 = por %p4946_p7, %p4945_p6 }
  0x33   :  { %p4948_p9 = pnand %p4947_p8, %p4941_p5 }
  0x35   :  { %4951 = shalt.err (!%p4948_p9)
}
  0x36   :  { %s5103_s3 = smov 256   ;;  %s5104_s28 = smov 16  }
  0x37   :  { %92 = dma.hbm_to_vmem [thread:$0]  %s5605_s6, 8192, %s87_s27, [#allocation13], %s5103_s3, %s5103_s3, %s5104_s28  }
  0x38   :  { %s5105_s22 = smov [#allocation3]   ;;  %s5106_s26 = smov [#allocation8]  }
  0x39   :  { %s31_s25 = sshll.u32 %s5105_s22, 4  ;;  %s53_s29 = sshll.u32 %s5106_s26, 4  ;;  %s32_s25 = int_to_ptr.vmem [resolvable:$true] %s31_s25  ;;  %s54_s29 = int_to_ptr.vmem [resolvable:$true] %s53_s29 }
  0x3a   :  { %s4952_s17 = scalar_lea.hbm %s5599_s0, 128 }
  0x3b   :  { %p4953_p10 = scmp.ne.s32.totalorder %s5599_s0, %s4952_s17  ;;  %p4956_p11 = scmp.lt.u32.totalorder %s4952_s17, %s5599_s0 }
  0x3d   :  { %p4958_p12 = pnand %p4956_p11, %p4953_p10 }
  0x3f   :  { %4961 = shalt.err (!%p4958_p12)
}
  0x40   :  { %s4962_s6 = scalar_lea.vmem %s32_s25, 128  ;;  %p4967_p0 = scmp.lt.s32.totalorder %s32_s25, %s32_s25 }
  0x41   :  { %p4963_p13 = scmp.ne.s32.totalorder %s32_s25, %s4962_s6  ;;  %p4968_p1 = scmp.lt.s32.totalorder %s4962_s6, %s4962_s6 }
  0x43   :  { %p4969_p2 = por %p4968_p1, %p4967_p0 }
  0x45   :  { %p4970_p3 = pnand %p4969_p2, %p4963_p13 }
  0x47   :  { %4973 = shalt.err (!%p4970_p3)
}
  0x48   :  { %34 = dma.hbm_to_vmem [thread:$0]  %s5599_s0, 128, %s32_s25, [#allocation4]  }
  0x49   :  { %s4974_s30 = scalar_lea.hbm %s5601_s2, 16 }
  0x4a   :  { %p4975_p4 = scmp.ne.s32.totalorder %s5601_s2, %s4974_s30  ;;  %p4978_p5 = scmp.lt.u32.totalorder %s4974_s30, %s5601_s2 }
  0x4c   :  { %p4980_p6 = pnand %p4978_p5, %p4975_p4 }
  0x4e   :  { %4983 = shalt.err (!%p4980_p6)
}
  0x4f   :  { %s4984_s17 = scalar_lea.vmem %s54_s29, 16  ;;  %s4988_s18 = scalar_lea.vmem %s54_s29, 32 }
  0x50   :  { %p4985_p7 = scmp.ne.s32.totalorder %s54_s29, %s4984_s17  ;;  %p4989_p8 = scmp.lt.s32.totalorder %s54_s29, %s54_s29 }
  0x51   :  { %p4990_p9 = scmp.lt.s32.totalorder %s4988_s18, %s4984_s17 }
  0x53   :  { %p4991_p10 = por %p4990_p9, %p4989_p8 }
  0x55   :  { %p4992_p11 = pnand %p4991_p10, %p4985_p7 }
  0x57   :  { %4995 = shalt.err (!%p4992_p11)
}
  0x58   :  { %56 = dma.hbm_to_vmem [thread:$0]  %s5601_s2, 16, %s54_s29, [#allocation7]  }
  0x59   :  { %s5107_s19 = smov [#allocation11]   ;;  %s5108_s21 = smov [#allocation14]  }
  0x5a   :  { %s77_s20 = sshll.u32 %s5107_s19, 4  ;;  %s102_s6 = sshll.u32 %s5108_s21, 4  ;;  %s78_s20 = int_to_ptr.vmem [resolvable:$true] %s77_s20  ;;  %s103_s6 = int_to_ptr.vmem [resolvable:$true] %s102_s6 }
  0x5b   :  { %s4996_s28 = scalar_lea.hbm %s5604_s5, 32 }
  0x5c   :  { %p4997_p12 = scmp.ne.s32.totalorder %s5604_s5, %s4996_s28  ;;  %p5000_p13 = scmp.lt.u32.totalorder %s4996_s28, %s5604_s5 }
  0x5e   :  { %p5002_p0 = pnand %p5000_p13, %p4997_p12 }
  0x60   :  { %5005 = shalt.err (!%p5002_p0)
}
  0x61   :  { %s5006_s2 = scalar_lea.vmem %s78_s20, 32  ;;  %p5011_p2 = scmp.lt.s32.totalorder %s78_s20, %s78_s20 }
  0x62   :  { %p5007_p1 = scmp.ne.s32.totalorder %s78_s20, %s5006_s2  ;;  %p5012_p3 = scmp.lt.s32.totalorder %s5006_s2, %s5006_s2 }
  0x64   :  { %p5013_p4 = por %p5012_p3, %p5011_p2 }
  0x66   :  { %p5014_p5 = pnand %p5013_p4, %p5007_p1 }
  0x68   :  { %5017 = shalt.err (!%p5014_p5)
}
  0x69   :  { %80 = dma.hbm_to_vmem [thread:$0]  %s5604_s5, 32, %s78_s20, [#allocation10]  }
  0x6a   :  { %s5018_s18 = scalar_lea.hbm %s5608_s9, 32768 }
  0x6b   :  { %p5019_p6 = scmp.ne.s32.totalorder %s5608_s9, %s5018_s18  ;;  %p5022_p7 = scmp.lt.u32.totalorder %s5018_s18, %s5608_s9 }
  0x6d   :  { %p5024_p8 = pnand %p5022_p7, %p5019_p6 }
  0x6f   :  { %5027 = shalt.err (!%p5024_p8)
}
  0x70   :  { %s5028_s27 = scalar_lea.vmem %s103_s6, 32768  ;;  %p5033_p10 = scmp.lt.s32.totalorder %s103_s6, %s103_s6 }
  0x71   :  { %p5029_p9 = scmp.ne.s32.totalorder %s103_s6, %s5028_s27  ;;  %p5034_p11 = scmp.lt.s32.totalorder %s5028_s27, %s5028_s27 }
  0x73   :  { %p5035_p12 = por %p5034_p11, %p5033_p10 }
  0x75   :  { %p5036_p13 = pnand %p5035_p12, %p5029_p9 }
  0x77   :  { %5039 = shalt.err (!%p5036_p13)
}
  0x78   :  { %s5109_s5 = smov 512   ;;  %s5110_s20 = smov 32  }
  0x79   :  { %108 = dma.hbm_to_vmem [thread:$0]  %s5608_s9, 32768, %s103_s6, [#allocation13], %s5109_s5, %s5109_s5, %s5110_s20  }
  0x7a   :  { %s5111_s1 = smov [#allocation15]   ;;  %s5040_s2 = scalar_lea.hbm %s5611_s12, 8192 }
  0x7b   :  { %s118_s30 = sshll.u32 %s5111_s1, 4  ;;  %p5041_p0 = scmp.ne.s32.totalorder %s5611_s12, %s5040_s2  ;;  %s119_s30 = int_to_ptr.vmem [resolvable:$true] %s118_s30 }
  0x7c   :  { %p5044_p1 = scmp.lt.u32.totalorder %s5040_s2, %s5611_s12 }
  0x7e   :  { %p5046_p2 = pnand %p5044_p1, %p5041_p0 }
  0x80   :  { %5049 = shalt.err (!%p5046_p2)
}
  0x81   :  { %s5050_s18 = scalar_lea.vmem %s119_s30, 8192  ;;  %p5055_p4 = scmp.lt.s32.totalorder %s119_s30, %s119_s30 }
  0x82   :  { %p5051_p3 = scmp.ne.s32.totalorder %s119_s30, %s5050_s18  ;;  %p5056_p5 = scmp.lt.s32.totalorder %s5050_s18, %s5050_s18 }
  0x84   :  { %p5057_p6 = por %p5056_p5, %p5055_p4 }
  0x86   :  { %p5058_p7 = pnand %p5057_p6, %p5051_p3 }
  0x88   :  { %5061 = shalt.err (!%p5058_p7)
}
  0x89   :  { %124 = dma.hbm_to_vmem [thread:$0]  %s5611_s12, 8192, %s119_s30, [#allocation16], %s5097_s23, %s5097_s23, %s5098_s24  }
  0x8a   :  { %5084 = dma.done.wait [#allocation4], 128  }
  0x8b   :  { %5085 = vsyncadd [#allocation4], 4294967168 }
  0x8c   :  { %5086 = dma.done.wait [#allocation7], 272  }
  0x8d   :  { %5087 = vsyncadd [#allocation7], 4294967024 }
  0x8e   :  { %5088 = dma.done.wait [#allocation10], 2080  }
  0x8f   :  { %5089 = vsyncadd [#allocation10], 4294965216 }
  0x90   :  { %5090 = dma.done.wait [#allocation13], 40960  }
  0x91   :  { %5091 = vsyncadd [#allocation13], 4294926336 }
  0x92   :  { %5092 = dma.done.wait [#allocation16], 8192  }
  0x93   :  { %5093 = vsyncadd [#allocation16], 4294959104  ;;  %v5112_v0 = vmov 0.0   ;;  %vm5113_vm0 = vmmov 0   ;;  %v4670_v1 = vld [vmem:[#allocation6] sm:$0xff]   ;;  %vm189_vm1 = vcmask 1044480  }
  0x94   :  { %4625 = vmatprep.subr.bf16.mxu0 %v5112_v0  ;;  %4629 = vmatprep.mubr.msk.bf16.mxu0 %vm5113_vm0, %v5112_v0  ;;  %v4671_v2 = vld [vmem:[#allocation6 + $0x8] sm:$0x1f]   ;;  %v161_v3 = vld [vmem:[#allocation3] sm:$0xff]  ;;  %vm185_vm2 = vcmask 211968   ;;  %v5114_v22 = vmov 0  }
  0x95   :  { %4626 = vmatpush3.bf16.msra.mxu0 %v4670_v1  ;;  %v191_v4 = vsel %vm189_vm1, %v4671_v2, 0  ;;  %v4672_v5 = vld [vmem:[#allocation9 + $0x4] ss:$8 sps:$4 sm:$0xff]   ;;  %v4674_v6 = vld [vmem:[#allocation9] ss:$8 sps:$4 sm:$0xff]   ;;  %v162_v8 = vpack.c.bf16 %v161_v3, %v161_v3  ;;  %365 = vmatprep.mubr.bf16.mxu1 %v5114_v22 }
  0x96   :  { %4627 = vmatprep.subr.bf16.mxu0 %v5112_v0  ;;  %v4675_v7 = vld [vmem:[#allocation9 + $0x14] ss:$8 sps:$4 sm:$0xff]   ;;  %333 = vmatprep.subr.bf16.mxu1 %v4672_v5  ;;  %v4677_v9 = vld [vmem:[#allocation9 + $0x10] ss:$8 sps:$4 sm:$0xff]   ;;  %v4678_v10 = vld [vmem:[#allocation9 + $0x24] ss:$8 sps:$4 sm:$0xff]  }
  0x97   :  { %334 = vmatpush1.bf16.msra.mxu1 %v4674_v6  ;;  %v4680_v11 = vld [vmem:[#allocation9 + $0x20] ss:$8 sps:$4 sm:$0xff]   ;;  %v4681_v12 = vld [vmem:[#allocation9 + $0x34] ss:$8 sps:$4 sm:$0xff]   ;;  %v4683_v13 = vld [vmem:[#allocation9 + $0x30] ss:$8 sps:$4 sm:$0xff]  }
  0x98   :  { %335 = vmatprep.subr.bf16.mxu1 %v4675_v7  ;;  %v4684_v14 = vld [vmem:[#allocation9 + $0x44] ss:$8 sps:$4 sm:$0xff]   ;;  %v4686_v15 = vld [vmem:[#allocation9 + $0x40] ss:$8 sps:$4 sm:$0xff]   ;;  %v4687_v16 = vld [vmem:[#allocation9 + $0x54] ss:$8 sps:$4 sm:$0xff]  }
  0x99   :  { %4628 = vmatpush3.bf16.msra.mxu0 %v191_v4  ;;  %v4689_v17 = vld [vmem:[#allocation9 + $0x50] ss:$8 sps:$4 sm:$0xff]   ;;  %v4690_v18 = vld [vmem:[#allocation9 + $0x64] ss:$8 sps:$4 sm:$0xff]   ;;  %v4692_v19 = vld [vmem:[#allocation9 + $0x60] ss:$8 sps:$4 sm:$0xff]  }
  0x9a   :  { %v4693_v20 = vld [vmem:[#allocation9 + $0x74] ss:$8 sps:$4 sm:$0xff]   ;;  %v4695_v21 = vld [vmem:[#allocation9 + $0x70] ss:$8 sps:$4 sm:$0xff]  }
  0x9b   :  { %336 = vmatpush1.bf16.msra.mxu1 %v4677_v9  ;;  %v4696_v23 = vld [vmem:[#allocation12] ss:$16 sps:$4 sm:$0xff]   ;;  %v4698_v24 = vld [vmem:[#allocation12 + $0x4] ss:$16 sps:$4 sm:$0xff]   ;;  %v4701_v25 = vld [vmem:[#allocation12 + $0xc] ss:$16 sps:$4 sm:$0xff]  }
  0x9c   :  { %4630 = vmatmul.mubr.msk.bf16.vlgmr.msra.gmra.mrb[0].mxu0 %vm185_vm2, %v162_v8  ;;  %337 = vmatprep.subr.bf16.mxu1 %v4678_v10  ;;  %v4704_v26 = vld [vmem:[#allocation12 + $0x24] ss:$16 sps:$4 sm:$0xff]   ;;  %v4702_v27 = vld [vmem:[#allocation12 + $0x20] ss:$16 sps:$4 sm:$0xff]   ;;  %v4129_v28 = vld [vmem:[#allocation8] ss:$0 sm:$0xff] }
  0x9d   :  { %865 = vmatprep.subr.bf16.mxu0 %v4698_v24  ;;  %v4699_v36 = vld [vmem:[#allocation12 + $0x8] ss:$16 sps:$4 sm:$0xff]   ;;  %v4707_v38 = vld [vmem:[#allocation12 + $0x2c] ss:$16 sps:$4 sm:$0xff]   ;;  %v4710_v40 = vld [vmem:[#allocation12 + $0x44] ss:$16 sps:$4 sm:$0xff]  }
  0x9e   :  { %866 = vmatpush1.bf16.msra.mxu0 %v4696_v23  ;;  %v4705_v39 = vld [vmem:[#allocation12 + $0x28] ss:$16 sps:$4 sm:$0xff]   ;;  %v4713_v41 = vld [vmem:[#allocation12 + $0x4c] ss:$16 sps:$4 sm:$0xff]   ;;  %v4708_v42 = vld [vmem:[#allocation12 + $0x40] ss:$16 sps:$4 sm:$0xff]  }
  0x9f   :  { %338 = vmatpush1.bf16.msra.mxu1 %v4680_v11  ;;  %867 = vmatprep.subr.bf16.mxu0 %v4704_v26  ;;  %v4711_v43 = vld [vmem:[#allocation12 + $0x48] ss:$16 sps:$4 sm:$0xff]   ;;  %v4716_v44 = vld [vmem:[#allocation12 + $0x64] ss:$16 sps:$4 sm:$0xff]   ;;  %v4719_v45 = vld [vmem:[#allocation12 + $0x6c] ss:$16 sps:$4 sm:$0xff]  }
  0xa0   :  { %339 = vmatprep.subr.bf16.mxu1 %v4681_v12  ;;  %v4714_v46 = vld [vmem:[#allocation12 + $0x60] ss:$16 sps:$4 sm:$0xff]   ;;  %v4717_v47 = vld [vmem:[#allocation12 + $0x68] ss:$16 sps:$4 sm:$0xff]   ;;  %v4722_v48 = vld [vmem:[#allocation12 + $0x84] ss:$16 sps:$4 sm:$0xff]  }
  0xa1   :  { %v4725_v49 = vld [vmem:[#allocation12 + $0x8c] ss:$16 sps:$4 sm:$0xff]   ;;  %v4720_v50 = vld [vmem:[#allocation12 + $0x80] ss:$16 sps:$4 sm:$0xff]   ;;  %v4723_v51 = vld [vmem:[#allocation12 + $0x88] ss:$16 sps:$4 sm:$0xff]  }
  0xa2   :  { %868 = vmatpush1.bf16.msra.mxu0 %v4702_v27  ;;  %v4728_v52 = vld [vmem:[#allocation12 + $0xa4] ss:$16 sps:$4 sm:$0xff]   ;;  %v4731_v53 = vld [vmem:[#allocation12 + $0xac] ss:$16 sps:$4 sm:$0xff]   ;;  %v4726_v54 = vld [vmem:[#allocation12 + $0xa0] ss:$16 sps:$4 sm:$0xff]  }
  0xa3   :  { %340 = vmatpush1.bf16.msra.mxu1 %v4683_v13  ;;  %869 = vmatprep.subr.bf16.mxu0 %v4710_v40  ;;  %v4729_v55 = vld [vmem:[#allocation12 + $0xa8] ss:$16 sps:$4 sm:$0xff]   ;;  %v4734_v56 = vld [vmem:[#allocation12 + $0xc4] ss:$16 sps:$4 sm:$0xff]   ;;  %v4737_v57 = vld [vmem:[#allocation12 + $0xcc] ss:$16 sps:$4 sm:$0xff]  }
  0xa4   :  { %341 = vmatprep.subr.bf16.mxu1 %v4684_v14  ;;  %v4732_v58 = vld [vmem:[#allocation12 + $0xc0] ss:$16 sps:$4 sm:$0xff]   ;;  %v4735_v59 = vld [vmem:[#allocation12 + $0xc8] ss:$16 sps:$4 sm:$0xff]   ;;  %v4740_v60 = vld [vmem:[#allocation12 + $0xe4] ss:$16 sps:$4 sm:$0xff]  }
  0xa5   :  { %v4743_v61 = vld [vmem:[#allocation12 + $0xec] ss:$16 sps:$4 sm:$0xff]   ;;  %v4738_v62 = vld [vmem:[#allocation12 + $0xe0] ss:$16 sps:$4 sm:$0xff]   ;;  %v4741_v63 = vld [vmem:[#allocation12 + $0xe8] ss:$16 sps:$4 sm:$0xff]  }
  0xa6   :  { %870 = vmatpush1.bf16.msra.mxu0 %v4708_v42  ;;  %v4746_v1 = vld [vmem:[#allocation12 + $0x104] ss:$16 sps:$4 sm:$0xff]   ;;  %v4749_v2 = vld [vmem:[#allocation12 + $0x10c] ss:$16 sps:$4 sm:$0xff]   ;;  %v4744_v3 = vld [vmem:[#allocation12 + $0x100] ss:$16 sps:$4 sm:$0xff]  }
  0xa7   :  { %342 = vmatpush1.bf16.msra.mxu1 %v4686_v15  ;;  %871 = vmatprep.subr.bf16.mxu0 %v4716_v44  ;;  %v4747_v4 = vld [vmem:[#allocation12 + $0x108] ss:$16 sps:$4 sm:$0xff]   ;;  %v4752_v5 = vld [vmem:[#allocation12 + $0x124] ss:$16 sps:$4 sm:$0xff]   ;;  %v4755_v6 = vld [vmem:[#allocation12 + $0x12c] ss:$16 sps:$4 sm:$0xff]  }
  0xa8   :  { %343 = vmatprep.subr.bf16.mxu1 %v4687_v16  ;;  %v4750_v7 = vld [vmem:[#allocation12 + $0x120] ss:$16 sps:$4 sm:$0xff]   ;;  %v4753_v8 = vld [vmem:[#allocation12 + $0x128] ss:$16 sps:$4 sm:$0xff]   ;;  %v4758_v9 = vld [vmem:[#allocation12 + $0x144] ss:$16 sps:$4 sm:$0xff]  }
  0xa9   :  { %v4761_v10 = vld [vmem:[#allocation12 + $0x14c] ss:$16 sps:$4 sm:$0xff]   ;;  %v4756_v11 = vld [vmem:[#allocation12 + $0x140] ss:$16 sps:$4 sm:$0xff]   ;;  %v4759_v12 = vld [vmem:[#allocation12 + $0x148] ss:$16 sps:$4 sm:$0xff]  }
  0xaa   :  { %872 = vmatpush1.bf16.msra.mxu0 %v4714_v46  ;;  %v4764_v13 = vld [vmem:[#allocation12 + $0x164] ss:$16 sps:$4 sm:$0xff]   ;;  %v4767_v14 = vld [vmem:[#allocation12 + $0x16c] ss:$16 sps:$4 sm:$0xff]   ;;  %v4762_v15 = vld [vmem:[#allocation12 + $0x160] ss:$16 sps:$4 sm:$0xff]  }
  0xab   :  { %344 = vmatpush1.bf16.msra.mxu1 %v4689_v17  ;;  %873 = vmatprep.subr.bf16.mxu0 %v4722_v48  ;;  %v4765_v16 = vld [vmem:[#allocation12 + $0x168] ss:$16 sps:$4 sm:$0xff]   ;;  %v4770_v17 = vld [vmem:[#allocation12 + $0x184] ss:$16 sps:$4 sm:$0xff]   ;;  %v4779_v22 = vld [vmem:[#allocation12 + $0x1ac] ss:$16 sps:$4 sm:$0xff]  }
  0xac   :  { %345 = vmatprep.subr.bf16.mxu1 %v4690_v18  ;;  %v4773_v18 = vld [vmem:[#allocation12 + $0x18c] ss:$16 sps:$4 sm:$0xff]   ;;  %v4774_v23 = vld [vmem:[#allocation12 + $0x1a0] ss:$16 sps:$4 sm:$0xff]   ;;  %v4777_v24 = vld [vmem:[#allocation12 + $0x1a8] ss:$16 sps:$4 sm:$0xff]  }
  0xad   :  { %v4785_v26 = vld [vmem:[#allocation12 + $0x1cc] ss:$16 sps:$4 sm:$0xff]   ;;  %v4780_v27 = vld [vmem:[#allocation12 + $0x1c0] ss:$16 sps:$4 sm:$0xff]  }
  0xae   :  { %874 = vmatpush1.bf16.msra.mxu0 %v4720_v50 }
  0xaf   :  { %346 = vmatpush1.bf16.msra.mxu1 %v4692_v19  ;;  %875 = vmatprep.subr.bf16.mxu0 %v4728_v52  ;;  %v4768_v19 = vld [vmem:[#allocation12 + $0x180] ss:$16 sps:$4 sm:$0xff]  }
  0xb0   :  { %347 = vmatprep.subr.bf16.mxu1 %v4693_v20  ;;  %v4771_v20 = vld [vmem:[#allocation12 + $0x188] ss:$16 sps:$4 sm:$0xff]  }
  0xb2   :  { %876 = vmatpush1.bf16.msra.mxu0 %v4726_v54 }
  0xb3   :  { %348 = vmatpush1.bf16.msra.mxu1 %v4695_v21  ;;  %877 = vmatprep.subr.bf16.mxu0 %v4734_v56  ;;  %v4776_v21 = vld [vmem:[#allocation12 + $0x1a4] ss:$16 sps:$4 sm:$0xff]  }
  0xb4   :  { %906 = vmatprep.subr.bf16.mxu1 %v4701_v25  ;;  %v4782_v25 = vld [vmem:[#allocation12 + $0x1c4] ss:$16 sps:$4 sm:$0xff]  }
  0xb6   :  { %878 = vmatpush1.bf16.msra.mxu0 %v4732_v58 }
  0xb7   :  { %879 = vmatprep.subr.bf16.mxu0 %v4740_v60 }
  0xba   :  { %880 = vmatpush1.bf16.msra.mxu0 %v4738_v62 }
  0xbb   :  { %881 = vmatprep.subr.bf16.mxu0 %v4746_v1 }
  0xbe   :  { %882 = vmatpush1.bf16.msra.mxu0 %v4744_v3 }
  0xbf   :  { %883 = vmatprep.subr.bf16.mxu0 %v4752_v5 }
  0xc2   :  { %884 = vmatpush1.bf16.msra.mxu0 %v4750_v7 }
  0xc3   :  { %885 = vmatprep.subr.bf16.mxu0 %v4758_v9 }
  0xc6   :  { %886 = vmatpush1.bf16.msra.mxu0 %v4756_v11 }
  0xc7   :  { %887 = vmatprep.subr.bf16.mxu0 %v4764_v13 }
  0xca   :  { %888 = vmatpush1.bf16.msra.mxu0 %v4762_v15 }
  0xcb   :  { %889 = vmatprep.subr.bf16.mxu0 %v4770_v17 }
  0xce   :  { %890 = vmatpush1.bf16.msra.mxu0 %v4768_v19 }
  0xcf   :  { %891 = vmatprep.subr.bf16.mxu0 %v4776_v21 }
  0xd2   :  { %892 = vmatpush1.bf16.msra.mxu0 %v4774_v23  ;;  %v374_v23 = vld [vmem:[%s5603_s4] sm:$0x3] }
  0xd3   :  { %893 = vmatprep.subr.bf16.mxu0 %v4782_v25  ;;  %v5115_v25 = vmov 1966171168  }
  0xd6   :  { %894 = vmatpush1.bf16.msra.mxu0 %v4780_v27 }
 0x16f   :  { %v227_v29 = vpop.f32.mrb[0].mxu0 }
 0x170   :  { %v228_v30 = vadd.f32 %v4129_v28, %v227_v29  ;;  %v4631_v31 = vpop.f32.mrb[1].mxu0  ;;  %v4783_v28 = vld [vmem:[#allocation12 + $0x1c8] ss:$16 sps:$4 sm:$0xff]   ;;  %v4788_v29 = vld [vmem:[#allocation12 + $0x1e4] ss:$16 sps:$4 sm:$0xff]  }
 0x171   :  { %v230_v32 = vpop.f32.mrb[2].mxu0  ;;  %v4789_v31 = vld [vmem:[#allocation12 + $0x1e8] ss:$16 sps:$4 sm:$0xff]   ;;  %895 = vmatprep.subr.bf16.mxu0 %v4788_v29 }
 0x172   :  { %vm233_vm3 = vcmp.ge.f32.partialorder %v228_v30, 0.0  ;;  %v234_v33 = vmul.f32 0.2, %v228_v30  ;;  %v4632_v34 = vpop.f32.mrb[3].mxu0  ;;  %v4791_v32 = vld [vmem:[#allocation12 + $0x1ec] ss:$16 sps:$4 sm:$0xff]  }
 0x173   :  { %v5299_v34 = vld [vmem:[#allocation14 + $0x20] sm:$0xff] }
 0x174   :  { %v235_v35 = vsel %vm233_vm3, %v228_v30, %v234_v33  ;;  %v4786_v30 = vld [vmem:[#allocation12 + $0x1e0] ss:$16 sps:$4 sm:$0xff]  }
 0x175   :  { %v236_v37 = vpack.c.bf16 %v235_v35, %v235_v35  ;;  %896 = vmatpush1.bf16.msra.mxu0 %v4786_v30  ;;  %v5297_v33 = vld [vmem:[#allocation14] sm:$0xff]  ;;  %v5301_v35 = vld [vmem:[#allocation14 + $0x8] sm:$0xff] }
 0x177   :  { %366 = vmatmul.mubr.bf16.vlgmr.msra.gmra.mrb[0].mxu1 %v236_v37  ;;  %v4214_v37 = vcombine.high %v5297_v33, %v5299_v34 }
 0x178   :  { %907 = vmatpush1.bf16.msra.mxu1 %v4699_v36  ;;  %v4213_v36 = vcombine.low %v5297_v33, %v5299_v34  ;;  %v1173_v33 = vld [vmem:[#allocation14 + $0xc0] sm:$0xff] }
 0x179   :  { %908 = vmatprep.subr.bf16.mxu1 %v4707_v38  ;;  %v5307_v38 = vld [vmem:[#allocation14 + $0x28] sm:$0xff]  ;;  %2685 = vmatprep.subr.bf16.mxu0 %v4214_v37  ;;  %v1177_v34 = vld [vmem:[#allocation14 + $0xe0] sm:$0xff] }
 0x17a   :  { %v4216_v40 = vcombine.high %v5301_v35, %v5307_v38 }
 0x17c   :  { %909 = vmatpush1.bf16.msra.mxu1 %v4705_v39  ;;  %v4215_v39 = vcombine.low %v5301_v35, %v5307_v38  ;;  %v1174_v35 = vld [vmem:[#allocation14 + $0xc8] sm:$0xff] }
 0x17d   :  { %910 = vmatprep.subr.bf16.mxu1 %v4713_v41  ;;  %v156_v41 = vlaneseq  ;;  %v1178_v38 = vld [vmem:[#allocation14 + $0xe8] sm:$0xff] }
 0x17f   :  { %v5313_v42 = vshrl.u32 %v156_v41, 7 }
 0x180   :  { %911 = vmatpush1.bf16.msra.mxu1 %v4711_v43 }
 0x181   :  { %912 = vmatprep.subr.bf16.mxu1 %v4719_v45  ;;  %vm158_vm4 = vcmp.lt.s32.totalorder %v5313_v42, 4 }
 0x182   :  { %v5317_v43 = vsel %vm158_vm4, 1.0, %v5112_v0 }
 0x184   :  { %913 = vmatpush1.bf16.msra.mxu1 %v4717_v47 }
 0x185   :  { %914 = vmatprep.subr.bf16.mxu1 %v4725_v49 }
 0x188   :  { %915 = vmatpush1.bf16.msra.mxu1 %v4723_v51 }
 0x189   :  { %916 = vmatprep.subr.bf16.mxu1 %v4731_v53 }
 0x18c   :  { %917 = vmatpush1.bf16.msra.mxu1 %v4729_v55 }
 0x18d   :  { %918 = vmatprep.subr.bf16.mxu1 %v4737_v57 }
 0x190   :  { %919 = vmatpush1.bf16.msra.mxu1 %v4735_v59 }
 0x191   :  { %920 = vmatprep.subr.bf16.mxu1 %v4743_v61 }
 0x194   :  { %921 = vmatpush1.bf16.msra.mxu1 %v4741_v63 }
 0x195   :  { %922 = vmatprep.subr.bf16.mxu1 %v4749_v2 }
 0x198   :  { %923 = vmatpush1.bf16.msra.mxu1 %v4747_v4 }
 0x199   :  { %924 = vmatprep.subr.bf16.mxu1 %v4755_v6 }
 0x19c   :  { %925 = vmatpush1.bf16.msra.mxu1 %v4753_v8 }
 0x19d   :  { %926 = vmatprep.subr.bf16.mxu1 %v4761_v10 }
 0x1a0   :  { %927 = vmatpush1.bf16.msra.mxu1 %v4759_v12 }
 0x1a1   :  { %928 = vmatprep.subr.bf16.mxu1 %v4767_v14 }
 0x1a4   :  { %929 = vmatpush1.bf16.msra.mxu1 %v4765_v16 }
 0x1a5   :  { %930 = vmatprep.subr.bf16.mxu1 %v4773_v18 }
 0x1a8   :  { %931 = vmatpush1.bf16.msra.mxu1 %v4771_v20 }
 0x1a9   :  { %932 = vmatprep.subr.bf16.mxu1 %v4779_v22  ;;  %v5330_v22 = vsub.s32 0, %v5313_v42 }
 0x1ab   :  { %v420_v27 = vrot.slane %v374_v23, %v5330_v22 }
 0x1ac   :  { %933 = vmatpush1.bf16.msra.mxu1 %v4777_v24  ;;  %v5336_v24 = vsub.s32 1, %v5313_v42 }
 0x1ad   :  { %934 = vmatprep.subr.bf16.mxu1 %v4785_v26  ;;  %v435_v26 = vunpack.c.l.s4 %v5115_v25 }
 0x1af   :  { %v436_v30 = vunpack.c.0.s8 %v435_v26 }
 0x1b0   :  { %935 = vmatpush1.bf16.msra.mxu1 %v4783_v28  ;;  %v424_v28 = vrot.slane %v374_v23, %v5336_v24  ;;  %v1186_v23 = vld [vmem:[#allocation14 + $0x128] sm:$0xff] }
 0x1b1   :  { %936 = vmatprep.subr.bf16.mxu1 %v4791_v32 }
 0x1b4   :  { %937 = vmatpush1.bf16.msra.mxu1 %v4789_v31 }
 0x1b5   :  { %2767 = vmatprep.subr.bf16.mxu1 %v4216_v40 }
 0x24a   :  { %v5319_v44 = vpop.f32.mrb[0].mxu1 }
 0x24b   :  { %v376_v45 = vmul.f32 %v5317_v43, %v5319_v44  ;;  %v5323_v46 = vpop.f32.mrb[1].mxu1 }
 0x24c   :  { %v377_v47 = vmul.f32 %v5317_v43, %v5323_v46  ;;  %v371_v48 = vpop.f32.mrb[2].mxu1 }
 0x24d   :  { %v378_v49 = vrot.slane %v376_v45, 4  ;;  %v392_v50 = vmul.f32 %v376_v45, %v5319_v44  ;;  %v372_v51 = vpop.f32.mrb[3].mxu1 }
 0x24e   :  { %v384_v52 = vrot.slane %v377_v47, 4  ;;  %v393_v53 = vmul.f32 %v377_v47, %v5323_v46 }
 0x24f   :  { %v379_v0 = vadd.f32 %v378_v49, %v376_v45  ;;  %v394_v54 = vrot.slane %v392_v50, 4  ;;  %v5341_v45 = vsub.s32 %v436_v30, %v5313_v42  ;;  %v375_v49 = vld [vmem:[#allocation11] sm:$0x3]  ;;  %v1190_v30 = vld [vmem:[#allocation14 + $0x148] sm:$0xff] }
 0x250   :  { %v385_v55 = vadd.f32 %v384_v52, %v377_v47  ;;  %v400_v56 = vrot.slane %v393_v53, 4 }
 0x251   :  { %v380_v57 = vrot.slane %v379_v0, 2  ;;  %v395_v58 = vadd.f32 %v394_v54, %v392_v50 }
 0x252   :  { %v386_v59 = vrot.slane %v385_v55, 2  ;;  %v401_v60 = vadd.f32 %v400_v56, %v393_v53 }
 0x253   :  { %v381_v61 = vadd.f32 %v380_v57, %v379_v0  ;;  %v396_v62 = vrot.slane %v395_v58, 2 }
 0x254   :  { %v387_v63 = vadd.f32 %v386_v59, %v385_v55  ;;  %v402_v1 = vrot.slane %v401_v60, 2  ;;  %v1157_v59 = vld [vmem:[#allocation14 + $0x40] sm:$0xff] }
 0x255   :  { %v382_v2 = vrot.slane %v381_v61, 1  ;;  %v397_v3 = vadd.f32 %v396_v62, %v395_v58  ;;  %v1161_v62 = vld [vmem:[#allocation14 + $0x60] sm:$0xff] }
 0x256   :  { %v388_v4 = vrot.slane %v387_v63, 1  ;;  %v403_v5 = vadd.f32 %v402_v1, %v401_v60  ;;  %v1162_v1 = vld [vmem:[#allocation14 + $0x68] sm:$0xff] }
 0x257   :  { %v383_v6 = vadd.f32 %v382_v2, %v381_v61  ;;  %v398_v7 = vrot.slane %v397_v3, 1 }
 0x258   :  { %v389_v8 = vadd.f32 %v388_v4, %v387_v63  ;;  %v404_v9 = vrot.slane %v403_v5, 1  ;;  %v1158_v63 = vld [vmem:[#allocation14 + $0x48] sm:$0xff] }
 0x259   :  { %v390_v10 = vmul.f32 0.25, %v383_v6  ;;  %v399_v11 = vadd.f32 %v398_v7, %v397_v3  ;;  %v4221_v6 = vcombine.low %v1157_v59, %v1161_v62  ;;  %v4223_v7 = vcombine.low %v1158_v63, %v1162_v1 }
 0x25a   :  { %v391_v12 = vmul.f32 0.25, %v389_v8  ;;  %v405_v13 = vadd.f32 %v404_v9, %v403_v5  ;;  %v4222_v5 = vcombine.high %v1157_v59, %v1161_v62  ;;  %v1165_v8 = vld [vmem:[#allocation14 + $0x80] sm:$0xff] }
 0x25b   :  { %v406_v14 = vmul.f32 0.25, %v399_v11  ;;  %v408_v15 = vmul.f32 %v390_v10, %v390_v10  ;;  %v1169_v9 = vld [vmem:[#allocation14 + $0xa0] sm:$0xff] }
 0x25c   :  { %v407_v16 = vmul.f32 0.25, %v405_v13  ;;  %v409_v17 = vmul.f32 %v391_v12, %v391_v12  ;;  %v4230_v11 = vcombine.high %v1165_v8, %v1169_v9  ;;  %v4229_v13 = vcombine.low %v1165_v8, %v1169_v9  ;;  %v1213_v62 = vld [vmem:[#allocation14 + $0x200] sm:$0xff]  ;;  %v1226_v9 = vld [vmem:[#allocation14 + $0x268] sm:$0xff] }
 0x25d   :  { %v410_v18 = vsub.f32 %v406_v14, %v408_v15 }
 0x25e   :  { %v411_v19 = vsub.f32 %v407_v16, %v409_v17  ;;  %v4239_v16 = vcombine.low %v1174_v35, %v1178_v38  ;;  %v4240_v17 = vcombine.high %v1174_v35, %v1178_v38 }
 0x25f   :  { %v412_v20 = vadd.f32 0.8, %v410_v18  ;;  %v1181_v18 = vld [vmem:[#allocation14 + $0x100] sm:$0xff] }
 0x260   :  { %v413_v21 = vadd.f32 0.8, %v411_v19  ;;  %v1185_v19 = vld [vmem:[#allocation14 + $0x120] sm:$0xff] }
 0x261   :  { %4856 = vrsqrt.f32 %v412_v20  ;;  %v1182_v20 = vld [vmem:[#allocation14 + $0x108] sm:$0xff]  ;;  %v4245_v25 = vcombine.low %v1181_v18, %v1185_v19 }
 0x262   :  { %4858 = vrsqrt.f32 %v413_v21  ;;  %v4246_v21 = vcombine.high %v1181_v18, %v1185_v19  ;;  %v4247_v26 = vcombine.low %v1182_v20, %v1186_v23  ;;  %v1242_v19 = vld [vmem:[#allocation14 + $0x2e8] sm:$0xff] }
 0x26b   :  { %v4857_v29 = vpop.eup %4856 }
 0x26c   :  { %v4859_v31 = vpop.eup %4858  ;;  %v427_v32 = vmul.f32 %v4857_v29, %v420_v27  ;;  %v4248_v27 = vcombine.high %v1182_v20, %v1186_v23  ;;  %v1193_v29 = vld [vmem:[#allocation14 + $0x160] sm:$0xff] }
 0x26d   :  { %v428_v37 = vmul.f32 %v4859_v31, %v424_v28  ;;  %v1189_v28 = vld [vmem:[#allocation14 + $0x140] sm:$0xff] }
 0x26e   :  { %v429_v40 = vmul.f32 %v427_v32, %v390_v10  ;;  %v453_v50 = vrot.slane %v427_v32, %v5330_v22  ;;  %v1166_v10 = vld [vmem:[#allocation14 + $0x88] sm:$0xff]  ;;  %v4254_v31 = vcombine.high %v1189_v28, %v1193_v29 }
 0x26f   :  { %v430_v41 = vmul.f32 %v428_v37, %v391_v12  ;;  %v457_v52 = vrot.slane %v428_v37, %v5330_v22  ;;  %v1170_v12 = vld [vmem:[#allocation14 + $0xa8] sm:$0xff]  ;;  %v4253_v37 = vcombine.low %v1189_v28, %v1193_v29 }
 0x270   :  { %v458_v0 = vmul.f32 %v453_v50, %v5319_v44  ;;  %v4231_v14 = vcombine.low %v1166_v10, %v1170_v12  ;;  %v4232_v15 = vcombine.high %v1166_v10, %v1170_v12  ;;  %v1194_v32 = vld [vmem:[#allocation14 + $0x168] sm:$0xff] }
 0x271   :  { %v433_v47 = vcombine.low %v429_v40, %v430_v41  ;;  %v459_v54 = vmul.f32 %v457_v52, %v5323_v46  ;;  %v4224_v46 = vcombine.high %v1158_v63, %v1162_v1  ;;  %v4255_v40 = vcombine.low %v1190_v30, %v1194_v32  ;;  %v1217_v63 = vld [vmem:[#allocation14 + $0x220] sm:$0xff]  ;;  %v1214_v1 = vld [vmem:[#allocation14 + $0x208] sm:$0xff] }
 0x272   :  { %v4256_v41 = vcombine.high %v1190_v30, %v1194_v32  ;;  %v1250_v29 = vld [vmem:[#allocation14 + $0x328] sm:$0xff] }
 0x273   :  { %v440_v48 = vrot.slane %v433_v47, %v5341_v45  ;;  %v1197_v47 = vld [vmem:[#allocation14 + $0x180] sm:$0xff] }
 0x275   :  { %v447_v51 = vrot.slane %v440_v48, %v5341_v45  ;;  %v1201_v48 = vld [vmem:[#allocation14 + $0x1a0] sm:$0xff] }
 0x276   :  { %v4262_v50 = vcombine.high %v1197_v47, %v1201_v48  ;;  %v4261_v52 = vcombine.low %v1197_v47, %v1201_v48  ;;  %v1258_v48 = vld [vmem:[#allocation14 + $0x368] sm:$0xff] }
 0x277   :  { %v449_v53 = vsub.f32 %v375_v49, %v447_v51  ;;  %v1198_v49 = vld [vmem:[#allocation14 + $0x188] sm:$0xff] }
 0x278   :  { %v1202_v51 = vld [vmem:[#allocation14 + $0x1a8] sm:$0xff] }
 0x279   :  { %v464_v55 = vrot.slane %v449_v53, %v5330_v22  ;;  %v468_v56 = vrot.slane %v449_v53, %v5336_v24  ;;  %v4263_v53 = vcombine.low %v1198_v49, %v1202_v51 }
 0x27b   :  { %v472_v57 = vadd.f32 %v468_v56, %v459_v54  ;;  %v471_v58 = vadd.f32 %v464_v55, %v458_v0  ;;  %v4264_v0 = vcombine.high %v1198_v49, %v1202_v51  ;;  %v1205_v54 = vld [vmem:[#allocation14 + $0x1c0] sm:$0xff]  ;;  %v1206_v56 = vld [vmem:[#allocation14 + $0x1c8] sm:$0xff] }
 0x27c   :  { %v1209_v55 = vld [vmem:[#allocation14 + $0x1e0] sm:$0xff] }
 0x27d   :  { %vm474_vm5 = vcmp.ge.f32.partialorder %v472_v57, 0.0  ;;  %v476_v60 = vmul.f32 0.2, %v472_v57  ;;  %vm473_vm6 = vcmp.ge.f32.partialorder %v471_v58, 0.0  ;;  %v475_v61 = vmul.f32 0.2, %v471_v58 }
 0x27e   :  { %v4269_v59 = vcombine.low %v1205_v54, %v1209_v55 }
 0x27f   :  { %v478_v2 = vsel %vm474_vm5, %v472_v57, %v476_v60  ;;  %v477_v3 = vsel %vm473_vm6, %v471_v58, %v475_v61  ;;  %v4270_v57 = vcombine.high %v1205_v54, %v1209_v55  ;;  %v1210_v58 = vld [vmem:[#allocation14 + $0x1e8] sm:$0xff] }
 0x280   :  { %v480_v4 = vpack.c.bf16 %v478_v2, %v478_v2  ;;  %v479_v44 = vpack.c.bf16 %v477_v3, %v477_v3  ;;  %v4271_v60 = vcombine.low %v1206_v56, %v1210_v58  ;;  %v4272_v61 = vcombine.high %v1206_v56, %v1210_v58  ;;  %v1218_v3 = vld [vmem:[#allocation14 + $0x228] sm:$0xff] }
 0x281   :  { %v4278_v2 = vcombine.high %v1213_v62, %v1217_v63  ;;  %v1266_v55 = vld [vmem:[#allocation14 + $0x3a8] sm:$0xff] }
 0x282   :  { %897 = vmatprep.mubr.bf16.mxu0 %v480_v4  ;;  %938 = vmatprep.mubr.bf16.mxu1 %v480_v4  ;;  %v4277_v4 = vcombine.low %v1213_v62, %v1217_v63  ;;  %v1274_v63 = vld [vmem:[#allocation14 + $0x3e8] sm:$0xff] }
 0x283   :  { %898 = vmatmul.mubr.bf16.vlgmr.msra.gmra.mrb[4].mxu0 %v479_v44  ;;  %939 = vmatmul.mubr.bf16.vlgmr.msra.gmra.mrb[4].mxu1 %v479_v44  ;;  %v4279_v44 = vcombine.low %v1214_v1, %v1218_v3 }
 0x284   :  { %2686 = vmatpush1.bf16.msra.mxu0 %v4213_v36  ;;  %2768 = vmatpush1.bf16.msra.mxu1 %v4215_v39  ;;  %v4238_v36 = vcombine.high %v1173_v33, %v1177_v34  ;;  %v4237_v39 = vcombine.low %v1173_v33, %v1177_v34  ;;  %v1234_v34 = vld [vmem:[#allocation14 + $0x2a8] sm:$0xff] }
 0x285   :  { %2687 = vmatprep.subr.bf16.mxu0 %v4222_v5  ;;  %2769 = vmatprep.subr.bf16.mxu1 %v4224_v46  ;;  %v4280_v5 = vcombine.high %v1214_v1, %v1218_v3  ;;  %v1221_v46 = vld [vmem:[#allocation14 + $0x240] sm:$0xff] }
 0x288   :  { %2688 = vmatpush1.bf16.msra.mxu0 %v4221_v6  ;;  %2770 = vmatpush1.bf16.msra.mxu1 %v4223_v7  ;;  %v1225_v6 = vld [vmem:[#allocation14 + $0x260] sm:$0xff]  ;;  %v1222_v7 = vld [vmem:[#allocation14 + $0x248] sm:$0xff] }
 0x289   :  { %2689 = vmatprep.subr.bf16.mxu0 %v4230_v11  ;;  %2771 = vmatprep.subr.bf16.mxu1 %v4232_v15  ;;  %v4286_v8 = vcombine.high %v1221_v46, %v1225_v6  ;;  %v4285_v10 = vcombine.low %v1221_v46, %v1225_v6  ;;  %v4287_v11 = vcombine.low %v1222_v7, %v1226_v9  ;;  %v1230_v15 = vld [vmem:[#allocation14 + $0x288] sm:$0xff] }
 0x28a   :  { %v4288_v12 = vcombine.high %v1222_v7, %v1226_v9  ;;  %v4296_v38 = vcombine.high %v1230_v15, %v1234_v34  ;;  %v5365_v6 = vld [vmem:[#allocation14 + $0x428] sm:$0xff] }
 0x28c   :  { %2690 = vmatpush1.bf16.msra.mxu0 %v4229_v13  ;;  %2772 = vmatpush1.bf16.msra.mxu1 %v4231_v14  ;;  %v1229_v13 = vld [vmem:[#allocation14 + $0x280] sm:$0xff] }
 0x28d   :  { %2691 = vmatprep.subr.bf16.mxu0 %v4238_v36  ;;  %2773 = vmatprep.subr.bf16.mxu1 %v4240_v17  ;;  %v1233_v14 = vld [vmem:[#allocation14 + $0x2a0] sm:$0xff]  ;;  %v4295_v36 = vcombine.low %v1230_v15, %v1234_v34  ;;  %v1238_v17 = vld [vmem:[#allocation14 + $0x2c8] sm:$0xff] }
 0x28e   :  { %v4294_v33 = vcombine.high %v1229_v13, %v1233_v14  ;;  %v4293_v35 = vcombine.low %v1229_v13, %v1233_v14  ;;  %v4304_v23 = vcombine.high %v1238_v17, %v1242_v19 }
 0x290   :  { %2692 = vmatpush1.bf16.msra.mxu0 %v4237_v39  ;;  %2774 = vmatpush1.bf16.msra.mxu1 %v4239_v16  ;;  %v1237_v39 = vld [vmem:[#allocation14 + $0x2c0] sm:$0xff] }
 0x291   :  { %2693 = vmatprep.subr.bf16.mxu0 %v4246_v21  ;;  %2775 = vmatprep.subr.bf16.mxu1 %v4248_v27  ;;  %v1241_v16 = vld [vmem:[#allocation14 + $0x2e0] sm:$0xff]  ;;  %v4303_v21 = vcombine.low %v1238_v17, %v1242_v19  ;;  %v1246_v27 = vld [vmem:[#allocation14 + $0x308] sm:$0xff] }
 0x292   :  { %v4302_v18 = vcombine.high %v1237_v39, %v1241_v16  ;;  %v4301_v20 = vcombine.low %v1237_v39, %v1241_v16  ;;  %v4312_v32 = vcombine.high %v1246_v27, %v1250_v29 }
 0x294   :  { %2694 = vmatpush1.bf16.msra.mxu0 %v4245_v25  ;;  %2776 = vmatpush1.bf16.msra.mxu1 %v4247_v26  ;;  %v1245_v25 = vld [vmem:[#allocation14 + $0x300] sm:$0xff] }
 0x295   :  { %2695 = vmatprep.subr.bf16.mxu0 %v4254_v31  ;;  %2777 = vmatprep.subr.bf16.mxu1 %v4256_v41  ;;  %v1249_v26 = vld [vmem:[#allocation14 + $0x320] sm:$0xff]  ;;  %v4311_v31 = vcombine.low %v1246_v27, %v1250_v29  ;;  %v1254_v41 = vld [vmem:[#allocation14 + $0x348] sm:$0xff] }
 0x296   :  { %v4310_v28 = vcombine.high %v1245_v25, %v1249_v26  ;;  %v4309_v30 = vcombine.low %v1245_v25, %v1249_v26  ;;  %v4320_v51 = vcombine.high %v1254_v41, %v1258_v48 }
 0x298   :  { %2696 = vmatpush1.bf16.msra.mxu0 %v4253_v37  ;;  %2778 = vmatpush1.bf16.msra.mxu1 %v4255_v40  ;;  %v1253_v37 = vld [vmem:[#allocation14 + $0x340] sm:$0xff] }
 0x299   :  { %2697 = vmatprep.subr.bf16.mxu0 %v4262_v50  ;;  %2779 = vmatprep.subr.bf16.mxu1 %v4264_v0  ;;  %v1257_v40 = vld [vmem:[#allocation14 + $0x360] sm:$0xff]  ;;  %v4319_v50 = vcombine.low %v1254_v41, %v1258_v48  ;;  %v1262_v0 = vld [vmem:[#allocation14 + $0x388] sm:$0xff] }
 0x29a   :  { %v4318_v47 = vcombine.high %v1253_v37, %v1257_v40  ;;  %v4317_v49 = vcombine.low %v1253_v37, %v1257_v40  ;;  %v4328_v58 = vcombine.high %v1262_v0, %v1266_v55 }
 0x29c   :  { %2698 = vmatpush1.bf16.msra.mxu0 %v4261_v52  ;;  %2780 = vmatpush1.bf16.msra.mxu1 %v4263_v53  ;;  %v1261_v52 = vld [vmem:[#allocation14 + $0x380] sm:$0xff] }
 0x29d   :  { %2699 = vmatprep.subr.bf16.mxu0 %v4270_v57  ;;  %2781 = vmatprep.subr.bf16.mxu1 %v4272_v61  ;;  %v1265_v53 = vld [vmem:[#allocation14 + $0x3a0] sm:$0xff]  ;;  %v4327_v57 = vcombine.low %v1262_v0, %v1266_v55  ;;  %v1270_v61 = vld [vmem:[#allocation14 + $0x3c8] sm:$0xff] }
 0x29e   :  { %v4326_v54 = vcombine.high %v1261_v52, %v1265_v53  ;;  %v4325_v56 = vcombine.low %v1261_v52, %v1265_v53  ;;  %v4336_v3 = vcombine.high %v1270_v61, %v1274_v63 }
 0x2a0   :  { %2700 = vmatpush1.bf16.msra.mxu0 %v4269_v59  ;;  %2782 = vmatpush1.bf16.msra.mxu1 %v4271_v60  ;;  %v1269_v59 = vld [vmem:[#allocation14 + $0x3c0] sm:$0xff] }
 0x2a1   :  { %2701 = vmatprep.subr.bf16.mxu0 %v4278_v2  ;;  %2783 = vmatprep.subr.bf16.mxu1 %v4280_v5  ;;  %v1273_v60 = vld [vmem:[#allocation14 + $0x3e0] sm:$0xff]  ;;  %v4335_v2 = vcombine.low %v1270_v61, %v1274_v63  ;;  %v5361_v5 = vld [vmem:[#allocation14 + $0x408] sm:$0xff] }
 0x2a2   :  { %v4334_v62 = vcombine.high %v1269_v59, %v1273_v60  ;;  %v4333_v1 = vcombine.low %v1269_v59, %v1273_v60  ;;  %v4344_v9 = vcombine.high %v5361_v5, %v5365_v6 }
 0x2a4   :  { %2702 = vmatpush1.bf16.msra.mxu0 %v4277_v4  ;;  %2784 = vmatpush1.bf16.msra.mxu1 %v4279_v44  ;;  %v5357_v4 = vld [vmem:[#allocation14 + $0x400] sm:$0xff] }
 0x2a5   :  { %2703 = vmatprep.subr.bf16.mxu0 %v4286_v8  ;;  %2785 = vmatprep.subr.bf16.mxu1 %v4288_v12  ;;  %v5359_v44 = vld [vmem:[#allocation14 + $0x420] sm:$0xff]  ;;  %v4343_v8 = vcombine.low %v5361_v5, %v5365_v6 }
 0x2a6   :  { %v4342_v46 = vcombine.high %v5357_v4, %v5359_v44  ;;  %v4341_v7 = vcombine.low %v5357_v4, %v5359_v44 }
 0x2a8   :  { %2704 = vmatpush1.bf16.msra.mxu0 %v4285_v10  ;;  %2786 = vmatpush1.bf16.msra.mxu1 %v4287_v11 }
 0x2a9   :  { %2705 = vmatprep.subr.bf16.mxu0 %v4294_v33  ;;  %2787 = vmatprep.subr.bf16.mxu1 %v4296_v38 }
 0x2ac   :  { %2706 = vmatpush1.bf16.msra.mxu0 %v4293_v35  ;;  %2788 = vmatpush1.bf16.msra.mxu1 %v4295_v36 }
 0x2ad   :  { %2707 = vmatprep.subr.bf16.mxu0 %v4302_v18  ;;  %2789 = vmatprep.subr.bf16.mxu1 %v4304_v23 }
 0x2b0   :  { %2708 = vmatpush1.bf16.msra.mxu0 %v4301_v20  ;;  %2790 = vmatpush1.bf16.msra.mxu1 %v4303_v21 }
 0x2b1   :  { %2709 = vmatprep.subr.bf16.mxu0 %v4310_v28  ;;  %2791 = vmatprep.subr.bf16.mxu1 %v4312_v32 }
 0x2b4   :  { %2710 = vmatpush1.bf16.msra.mxu0 %v4309_v30  ;;  %2792 = vmatpush1.bf16.msra.mxu1 %v4311_v31 }
 0x2b5   :  { %2711 = vmatprep.subr.bf16.mxu0 %v4318_v47  ;;  %2793 = vmatprep.subr.bf16.mxu1 %v4320_v51 }
 0x2b8   :  { %2712 = vmatpush1.bf16.msra.mxu0 %v4317_v49  ;;  %2794 = vmatpush1.bf16.msra.mxu1 %v4319_v50 }
 0x2b9   :  { %2713 = vmatprep.subr.bf16.mxu0 %v4326_v54  ;;  %2795 = vmatprep.subr.bf16.mxu1 %v4328_v58 }
 0x2bc   :  { %2714 = vmatpush1.bf16.msra.mxu0 %v4325_v56  ;;  %2796 = vmatpush1.bf16.msra.mxu1 %v4327_v57 }
 0x2bd   :  { %2715 = vmatprep.subr.bf16.mxu0 %v4334_v62  ;;  %2797 = vmatprep.subr.bf16.mxu1 %v4336_v3 }
 0x2c0   :  { %2716 = vmatpush1.bf16.msra.mxu0 %v4333_v1  ;;  %2798 = vmatpush1.bf16.msra.mxu1 %v4335_v2 }
 0x2c1   :  { %2726 = vmatprep.subr.bf16.mxu0 %v4342_v46  ;;  %2808 = vmatprep.subr.bf16.mxu1 %v4344_v9 }
 0x356   :  { %v5373_v10 = vpop.f32.mrb[4].mxu0  ;;  %v5375_v11 = vpop.f32.mrb[4].mxu1 }
 0x357   :  { %v949_v12 = vmul.f32 %v5317_v43, %v5373_v10  ;;  %v951_v13 = vmul.f32 %v5317_v43, %v5375_v11  ;;  %v5381_v14 = vpop.f32.mrb[5].mxu0  ;;  %v5383_v15 = vpop.f32.mrb[5].mxu1 }
 0x358   :  { %v950_v33 = vmul.f32 %v5317_v43, %v5381_v14  ;;  %v952_v34 = vmul.f32 %v5317_v43, %v5383_v15  ;;  %v903_v35 = vpop.f32.mrb[6].mxu0  ;;  %v944_v36 = vpop.f32.mrb[6].mxu1 }
 0x359   :  { %v953_v38 = vrot.slane %v949_v12, 4  ;;  %v981_v39 = vmul.f32 %v949_v12, %v5373_v10  ;;  %v965_v16 = vrot.slane %v951_v13, 4  ;;  %v983_v17 = vmul.f32 %v951_v13, %v5375_v11  ;;  %v904_v18 = vpop.f32.mrb[7].mxu0  ;;  %v945_v19 = vpop.f32.mrb[7].mxu1 }
 0x35a   :  { %v959_v20 = vrot.slane %v950_v33, 4  ;;  %v982_v21 = vmul.f32 %v950_v33, %v5381_v14  ;;  %v971_v23 = vrot.slane %v952_v34, 4  ;;  %v984_v25 = vmul.f32 %v952_v34, %v5383_v15 }
 0x35b   :  { %v954_v26 = vadd.f32 %v953_v38, %v949_v12  ;;  %v985_v27 = vrot.slane %v981_v39, 4  ;;  %v966_v28 = vadd.f32 %v965_v16, %v951_v13  ;;  %v997_v29 = vrot.slane %v983_v17, 4 }
 0x35c   :  { %v960_v30 = vadd.f32 %v959_v20, %v950_v33  ;;  %v991_v31 = vrot.slane %v982_v21, 4  ;;  %v972_v32 = vadd.f32 %v971_v23, %v952_v34  ;;  %v1003_v37 = vrot.slane %v984_v25, 4 }
 0x35d   :  { %v955_v40 = vrot.slane %v954_v26, 2  ;;  %v986_v41 = vadd.f32 %v985_v27, %v981_v39  ;;  %v967_v47 = vrot.slane %v966_v28, 2  ;;  %v998_v48 = vadd.f32 %v997_v29, %v983_v17 }
 0x35e   :  { %v961_v49 = vrot.slane %v960_v30, 2  ;;  %v992_v50 = vadd.f32 %v991_v31, %v982_v21  ;;  %v973_v51 = vrot.slane %v972_v32, 2  ;;  %v1004_v52 = vadd.f32 %v1003_v37, %v984_v25 }
 0x35f   :  { %v956_v53 = vadd.f32 %v955_v40, %v954_v26  ;;  %v987_v0 = vrot.slane %v986_v41, 2  ;;  %v968_v54 = vadd.f32 %v967_v47, %v966_v28  ;;  %v999_v55 = vrot.slane %v998_v48, 2 }
 0x360   :  { %v962_v56 = vadd.f32 %v961_v49, %v960_v30  ;;  %v993_v57 = vrot.slane %v992_v50, 2  ;;  %v974_v58 = vadd.f32 %v973_v51, %v972_v32  ;;  %v1005_v59 = vrot.slane %v1004_v52, 2 }
 0x361   :  { %v957_v60 = vrot.slane %v956_v53, 1  ;;  %v988_v61 = vadd.f32 %v987_v0, %v986_v41  ;;  %v969_v62 = vrot.slane %v968_v54, 1  ;;  %v1000_v63 = vadd.f32 %v999_v55, %v998_v48 }
 0x362   :  { %v963_v1 = vrot.slane %v962_v56, 1  ;;  %v994_v2 = vadd.f32 %v993_v57, %v992_v50  ;;  %v975_v3 = vrot.slane %v974_v58, 1  ;;  %v1006_v46 = vadd.f32 %v1005_v59, %v1004_v52  ;;  %v947_v52 = vld [vmem:[%s5606_s7] sm:$0xf] }
 0x363   :  { %v958_v9 = vadd.f32 %v957_v60, %v956_v53  ;;  %v989_v12 = vrot.slane %v988_v61, 1  ;;  %v970_v13 = vadd.f32 %v969_v62, %v968_v54  ;;  %v1001_v33 = vrot.slane %v1000_v63, 1 }
 0x364   :  { %v964_v34 = vadd.f32 %v963_v1, %v962_v56  ;;  %v995_v35 = vrot.slane %v994_v2, 1  ;;  %v976_v36 = vadd.f32 %v975_v3, %v974_v58  ;;  %v1007_v38 = vrot.slane %v1006_v46, 1 }
 0x365   :  { %v977_v39 = vmul.f32 0.25, %v958_v9  ;;  %v990_v16 = vadd.f32 %v989_v12, %v988_v61  ;;  %v979_v17 = vmul.f32 0.25, %v970_v13  ;;  %v1002_v18 = vadd.f32 %v1001_v33, %v1000_v63 }
 0x366   :  { %v978_v19 = vmul.f32 0.25, %v964_v34  ;;  %v996_v20 = vadd.f32 %v995_v35, %v994_v2  ;;  %v980_v21 = vmul.f32 0.25, %v976_v36  ;;  %v1008_v23 = vadd.f32 %v1007_v38, %v1006_v46 }
 0x367   :  { %v1009_v25 = vmul.f32 0.25, %v990_v16  ;;  %v1013_v26 = vmul.f32 %v977_v39, %v977_v39  ;;  %v1011_v27 = vmul.f32 0.25, %v1002_v18  ;;  %v1015_v28 = vmul.f32 %v979_v17, %v979_v17 }
 0x368   :  { %v1010_v29 = vmul.f32 0.25, %v996_v20  ;;  %v1014_v30 = vmul.f32 %v978_v19, %v978_v19  ;;  %v1012_v31 = vmul.f32 0.25, %v1008_v23  ;;  %v1016_v32 = vmul.f32 %v980_v21, %v980_v21 }
 0x369   :  { %v1017_v37 = vsub.f32 %v1009_v25, %v1013_v26  ;;  %v1019_v40 = vsub.f32 %v1011_v27, %v1015_v28  ;;  %v5397_v53 = vsub.s32 2, %v5313_v42  ;;  %v5400_v0 = vsub.s32 3, %v5313_v42 }
 0x36a   :  { %v1018_v41 = vsub.f32 %v1010_v29, %v1014_v30  ;;  %v1020_v47 = vsub.f32 %v1012_v31, %v1016_v32  ;;  %v1033_v54 = vrot.slane %v947_v52, %v5330_v22  ;;  %v1037_v56 = vrot.slane %v947_v52, %v5336_v24 }
 0x36b   :  { %v1021_v48 = vadd.f32 0.8, %v1017_v37  ;;  %v1023_v49 = vadd.f32 0.8, %v1019_v40  ;;  %v1041_v55 = vrot.slane %v947_v52, %v5397_v53  ;;  %v1045_v58 = vrot.slane %v947_v52, %v5400_v0 }
 0x36c   :  { %v1022_v50 = vadd.f32 0.8, %v1018_v41  ;;  %v1024_v51 = vadd.f32 0.8, %v1020_v47  ;;  %v1289_v47 = vld [vmem:[#allocation14 + $0x460] sm:$0xff] }
 0x36d   :  { %4860 = vrsqrt.f32 %v1021_v48  ;;  %v1286_v48 = vld [vmem:[#allocation14 + $0x448] sm:$0xff] }
 0x36e   :  { %4862 = vrsqrt.f32 %v1023_v49  ;;  %v1290_v49 = vld [vmem:[#allocation14 + $0x468] sm:$0xff] }
 0x36f   :  { %4864 = vrsqrt.f32 %v1022_v50 }
 0x370   :  { %4866 = vrsqrt.f32 %v1024_v51 }
 0x377   :  { %v4861_v57 = vpop.eup %4860 }
 0x378   :  { %v4863_v59 = vpop.eup %4862  ;;  %v1050_v60 = vmul.f32 %v4861_v57, %v1033_v54  ;;  %v4352_v57 = vcombine.high %v1286_v48, %v1290_v49 }
 0x379   :  { %v4865_v61 = vpop.eup %4864  ;;  %v1052_v62 = vmul.f32 %v4863_v59, %v1041_v55  ;;  %v1293_v55 = vld [vmem:[#allocation14 + $0x480] sm:$0xff]  ;;  %v1294_v59 = vld [vmem:[#allocation14 + $0x488] sm:$0xff] }
 0x37a   :  { %v4867_v63 = vpop.eup %4866  ;;  %v1054_v1 = vmul.f32 %v1050_v60, %v977_v39  ;;  %v1051_v2 = vmul.f32 %v4865_v61, %v1037_v56  ;;  %v1091_v18 = vrot.slane %v1050_v60, %v5330_v22  ;;  %v1298_v60 = vld [vmem:[#allocation14 + $0x4a8] sm:$0xff] }
 0x37b   :  { %v1056_v3 = vmul.f32 %v1052_v62, %v979_v17  ;;  %v1099_v46 = vrot.slane %v1052_v62, %v5330_v22  ;;  %v1053_v9 = vmul.f32 %v4867_v63, %v1045_v58  ;;  %v948_v17 = vld [vmem:[%s5607_s8] sm:$0xf]  ;;  %v4351_v63 = vcombine.low %v1286_v48, %v1290_v49 }
 0x37c   :  { %v1055_v12 = vmul.f32 %v1051_v2, %v978_v19  ;;  %v1095_v39 = vrot.slane %v1051_v2, %v5330_v22  ;;  %v1297_v58 = vld [vmem:[#allocation14 + $0x4a0] sm:$0xff]  ;;  %v4360_v2 = vcombine.high %v1294_v59, %v1298_v60  ;;  %v4359_v44 = vcombine.low %v1294_v59, %v1298_v60 }
 0x37d   :  { %v1106_v13 = vmul.f32 %v1099_v46, %v5375_v11  ;;  %v1057_v33 = vmul.f32 %v1053_v9, %v980_v21  ;;  %v1103_v19 = vrot.slane %v1053_v9, %v5330_v22  ;;  %v1104_v21 = vmul.f32 %v1091_v18, %v5373_v10  ;;  %v1305_v46 = vld [vmem:[#allocation14 + $0x4e0] sm:$0xff]  ;;  %v1302_v9 = vld [vmem:[#allocation14 + $0x4c8] sm:$0xff] }
 0x37e   :  { %v1062_v34 = vcombine.low %v1054_v1, %v1055_v12  ;;  %v1105_v23 = vmul.f32 %v1095_v39, %v5381_v14  ;;  %v4358_v1 = vcombine.high %v1293_v55, %v1297_v58  ;;  %v1306_v12 = vld [vmem:[#allocation14 + $0x4e8] sm:$0xff]  ;;  %v4357_v4 = vcombine.low %v1293_v55, %v1297_v58  ;;  %v1321_v18 = vld [vmem:[#allocation14 + $0x560] sm:$0xff] }
 0x37f   :  { %v1063_v35 = vcombine.low %v1056_v3, %v1057_v33  ;;  %v1107_v25 = vmul.f32 %v1103_v19, %v5383_v15  ;;  %v1285_v15 = vld [vmem:[#allocation14 + $0x440] sm:$0xff]  ;;  %v4368_v6 = vcombine.high %v1302_v9, %v1306_v12  ;;  %v1314_v33 = vld [vmem:[#allocation14 + $0x528] sm:$0xff] }
 0x380   :  { %v1070_v36 = vrot.slane %v1062_v34, %v5341_v45  ;;  %v4350_v56 = vcombine.high %v1285_v15, %v1289_v47  ;;  %v4349_v62 = vcombine.low %v1285_v15, %v1289_v47  ;;  %v1301_v3 = vld [vmem:[#allocation14 + $0x4c0] sm:$0xff]  ;;  %v1318_v39 = vld [vmem:[#allocation14 + $0x548] sm:$0xff] }
 0x381   :  { %v1077_v38 = vrot.slane %v1063_v35, %v5341_v45  ;;  %v4366_v5 = vcombine.high %v1301_v3, %v1305_v46  ;;  %v4365_v34 = vcombine.low %v1301_v3, %v1305_v46  ;;  %v4367_v35 = vcombine.low %v1302_v9, %v1306_v12  ;;  %v1341_v49 = vld [vmem:[#allocation14 + $0x600] sm:$0xff]  ;;  %v1346_v55 = vld [vmem:[#allocation14 + $0x628] sm:$0xff] }
 0x382   :  { %v1349_v60 = vld [vmem:[#allocation14 + $0x640] sm:$0xff] }
 0x383   :  { %v1078_v16 = vcombine.low %v1070_v36, %v1077_v38  ;;  %v1357_v12 = vld [vmem:[#allocation14 + $0x680] sm:$0xff] }
 0x385   :  { %v1085_v11 = vrot.slane %v1078_v16, %v5341_v45  ;;  %v1317_v16 = vld [vmem:[#allocation14 + $0x540] sm:$0xff] }
 0x387   :  { %v1087_v20 = vsub.f32 %v948_v17, %v1085_v11  ;;  %v1322_v17 = vld [vmem:[#allocation14 + $0x568] sm:$0xff] }
 0x389   :  { %v1124_v26 = vrot.slane %v1087_v20, %v5400_v0  ;;  %v1116_v27 = vrot.slane %v1087_v20, %v5336_v24  ;;  %v1112_v28 = vrot.slane %v1087_v20, %v5330_v22  ;;  %v1120_v29 = vrot.slane %v1087_v20, %v5397_v53 }
 0x38a   :  { %v4382_v20 = vcombine.high %v1317_v16, %v1321_v18 }
 0x38b   :  { %v1132_v30 = vadd.f32 %v1124_v26, %v1107_v25  ;;  %v1130_v31 = vadd.f32 %v1116_v27, %v1105_v23  ;;  %v1129_v32 = vadd.f32 %v1112_v28, %v1104_v21  ;;  %v5424_v37 = vadd.f32 %v1120_v29, %v1106_v13  ;;  %v1310_v13 = vld [vmem:[#allocation14 + $0x508] sm:$0xff]  ;;  %v1325_v23 = vld [vmem:[#allocation14 + $0x580] sm:$0xff] }
 0x38c   :  { %v4376_v38 = vcombine.high %v1310_v13, %v1314_v33  ;;  %v4375_v11 = vcombine.low %v1310_v13, %v1314_v33  ;;  %v4384_v21 = vcombine.high %v1318_v39, %v1322_v17  ;;  %v1329_v25 = vld [vmem:[#allocation14 + $0x5a0] sm:$0xff]  ;;  %v1326_v26 = vld [vmem:[#allocation14 + $0x588] sm:$0xff]  ;;  %v4381_v28 = vcombine.low %v1317_v16, %v1321_v18 }
 0x38d   :  { %v1140_v40 = vmul.f32 0.2, %v1132_v30  ;;  %vm1134_vm7 = vcmp.ge.f32.partialorder %v1130_v31, 0.0  ;;  %v1138_v10 = vmul.f32 0.2, %v1130_v31  ;;  %vm1133_vm8 = vcmp.ge.f32.partialorder %v1129_v32, 0.0 }
 0x38e   :  { %v1137_v14 = vmul.f32 0.2, %v1129_v32  ;;  %vm1136_vm9 = vcmp.ge.f32.partialorder %v1132_v30, 0.0  ;;  %v1330_v27 = vld [vmem:[#allocation14 + $0x5a8] sm:$0xff]  ;;  %v4383_v29 = vcombine.low %v1318_v39, %v1322_v17  ;;  %v4389_v15 = vcombine.low %v1325_v23, %v1329_v25  ;;  %v1365_v33 = vld [vmem:[#allocation14 + $0x6c0] sm:$0xff] }
 0x38f   :  { %v1142_v41 = vsel %vm1134_vm7, %v1130_v31, %v1138_v10  ;;  %v1144_v52 = vsel %vm1136_vm9, %v1132_v30, %v1140_v40  ;;  %v4390_v30 = vcombine.high %v1325_v23, %v1329_v25  ;;  %v4392_v31 = vcombine.high %v1326_v26, %v1330_v27  ;;  %v1337_v40 = vld [vmem:[#allocation14 + $0x5e0] sm:$0xff]  ;;  %v1334_v10 = vld [vmem:[#allocation14 + $0x5c8] sm:$0xff] }
 0x390   :  { %v5426_v50 = vpack.c.bf16 %v1142_v41, %v1142_v41  ;;  %v1141_v51 = vsel %vm1133_vm8, %v1129_v32, %v1137_v14  ;;  %v5434_v61 = vpack.c.bf16 %v1144_v52, %v1144_v52  ;;  %v1333_v32 = vld [vmem:[#allocation14 + $0x5c0] sm:$0xff]  ;;  %v1338_v14 = vld [vmem:[#allocation14 + $0x5e8] sm:$0xff]  ;;  %v4391_v41 = vcombine.low %v1326_v26, %v1330_v27 }
 0x391   :  { %v5428_v54 = vpack.c.bf16 %v1141_v51, %v1141_v51  ;;  %v4398_v47 = vcombine.high %v1333_v32, %v1337_v40  ;;  %v4400_v48 = vcombine.high %v1334_v10, %v1338_v14  ;;  %v1345_v51 = vld [vmem:[#allocation14 + $0x620] sm:$0xff]  ;;  %v1342_v52 = vld [vmem:[#allocation14 + $0x608] sm:$0xff]  ;;  %vm1135_vm10 = vcmp.ge.f32.partialorder %v5424_v37, 0.0 }
 0x392   :  { %2717 = vmatprep.mubr.bf16.mxu0 %v5426_v50  ;;  %2799 = vmatprep.mubr.bf16.mxu1 %v5426_v50  ;;  %v4406_v58 = vcombine.high %v1341_v49, %v1345_v51  ;;  %v4408_v59 = vcombine.high %v1342_v52, %v1346_v55  ;;  %v4407_v3 = vcombine.low %v1342_v52, %v1346_v55  ;;  %v1373_v17 = vld [vmem:[#allocation14 + $0x700] sm:$0xff] }
 0x393   :  { %2718 = vmatmul.mubr.bf16.vlgmr.msra.gmra.mrb[8].mxu0 %v5428_v54  ;;  %2800 = vmatmul.mubr.bf16.vlgmr.msra.gmra.mrb[8].mxu1 %v5428_v54  ;;  %v1381_v27 = vld [vmem:[#allocation14 + $0x740] sm:$0xff] }
 0x394   :  { %2727 = vmatpush1.bf16.msra.mxu0 %v4341_v7  ;;  %2809 = vmatpush1.bf16.msra.mxu1 %v4343_v8  ;;  %v1309_v7 = vld [vmem:[#allocation14 + $0x500] sm:$0xff] }
 0x395   :  { %2758 = vmatprep.mubr.bf16.mxu0 %v5434_v61  ;;  %2840 = vmatprep.mubr.bf16.mxu1 %v5434_v61  ;;  %v1313_v8 = vld [vmem:[#allocation14 + $0x520] sm:$0xff] }
 0x396   :  { %2728 = vmatprep.subr.bf16.mxu0 %v4350_v56  ;;  %2810 = vmatprep.subr.bf16.mxu1 %v4352_v57  ;;  %v4374_v36 = vcombine.high %v1309_v7, %v1313_v8  ;;  %v4373_v19 = vcombine.low %v1309_v7, %v1313_v8  ;;  %v4397_v56 = vcombine.low %v1333_v32, %v1337_v40  ;;  %v1397_v55 = vld [vmem:[#allocation14 + $0x7c0] sm:$0xff] }
 0x397   :  { %v4399_v57 = vcombine.low %v1334_v10, %v1338_v14  ;;  %v1389_v14 = vld [vmem:[#allocation14 + $0x780] sm:$0xff] }
 0x398   :  { %2729 = vmatpush1.bf16.msra.mxu0 %v4349_v62  ;;  %2811 = vmatpush1.bf16.msra.mxu1 %v4351_v63  ;;  %v1353_v62 = vld [vmem:[#allocation14 + $0x660] sm:$0xff]  ;;  %v1350_v63 = vld [vmem:[#allocation14 + $0x648] sm:$0xff] }
 0x399   :  { %2730 = vmatprep.subr.bf16.mxu0 %v4358_v1  ;;  %2812 = vmatprep.subr.bf16.mxu1 %v4360_v2  ;;  %v1354_v1 = vld [vmem:[#allocation14 + $0x668] sm:$0xff]  ;;  %v4405_v2 = vcombine.low %v1341_v49, %v1345_v51  ;;  %v4414_v46 = vcombine.high %v1349_v60, %v1353_v62 }
 0x39a   :  { %v4416_v9 = vcombine.high %v1350_v63, %v1354_v1  ;;  %v4415_v7 = vcombine.low %v1350_v63, %v1354_v1  ;;  %v1151_v1 = vld [vmem:[#allocation14 + $0x10] sm:$0xff] }
 0x39c   :  { %2731 = vmatpush1.bf16.msra.mxu0 %v4357_v4  ;;  %2813 = vmatpush1.bf16.msra.mxu1 %v4359_v44  ;;  %v1361_v4 = vld [vmem:[#allocation14 + $0x6a0] sm:$0xff]  ;;  %v1358_v44 = vld [vmem:[#allocation14 + $0x688] sm:$0xff] }
 0x39d   :  { %2732 = vmatprep.subr.bf16.mxu0 %v4366_v5  ;;  %2814 = vmatprep.subr.bf16.mxu1 %v4368_v6  ;;  %v1362_v5 = vld [vmem:[#allocation14 + $0x6a8] sm:$0xff]  ;;  %v4413_v6 = vcombine.low %v1349_v60, %v1353_v62  ;;  %v4422_v8 = vcombine.high %v1357_v12, %v1361_v4 }
 0x39e   :  { %v4424_v13 = vcombine.high %v1358_v44, %v1362_v5  ;;  %v4423_v16 = vcombine.low %v1358_v44, %v1362_v5 }
 0x3a0   :  { %2733 = vmatpush1.bf16.msra.mxu0 %v4365_v34  ;;  %2815 = vmatpush1.bf16.msra.mxu1 %v4367_v35  ;;  %v1369_v34 = vld [vmem:[#allocation14 + $0x6e0] sm:$0xff]  ;;  %v1366_v35 = vld [vmem:[#allocation14 + $0x6c8] sm:$0xff] }
 0x3a1   :  { %2734 = vmatprep.subr.bf16.mxu0 %v4374_v36  ;;  %2816 = vmatprep.subr.bf16.mxu1 %v4376_v38  ;;  %v1370_v36 = vld [vmem:[#allocation14 + $0x6e8] sm:$0xff]  ;;  %v4421_v38 = vcombine.low %v1357_v12, %v1361_v4  ;;  %v4430_v18 = vcombine.high %v1365_v33, %v1369_v34 }
 0x3a2   :  { %v4432_v39 = vcombine.high %v1366_v35, %v1370_v36  ;;  %v4431_v23 = vcombine.low %v1366_v35, %v1370_v36 }
 0x3a4   :  { %2735 = vmatpush1.bf16.msra.mxu0 %v4373_v19  ;;  %2817 = vmatpush1.bf16.msra.mxu1 %v4375_v11  ;;  %v1377_v19 = vld [vmem:[#allocation14 + $0x720] sm:$0xff]  ;;  %v1374_v11 = vld [vmem:[#allocation14 + $0x708] sm:$0xff] }
 0x3a5   :  { %2736 = vmatprep.subr.bf16.mxu0 %v4382_v20  ;;  %2818 = vmatprep.subr.bf16.mxu1 %v4384_v21  ;;  %v1378_v20 = vld [vmem:[#allocation14 + $0x728] sm:$0xff]  ;;  %v4429_v21 = vcombine.low %v1365_v33, %v1369_v34  ;;  %v4438_v25 = vcombine.high %v1373_v17, %v1377_v19  ;;  %v1164_v33 = vld [vmem:[#allocation14 + $0x78] sm:$0xff] }
 0x3a6   :  { %v4440_v26 = vcombine.high %v1374_v11, %v1378_v20  ;;  %v4439_v32 = vcombine.low %v1374_v11, %v1378_v20 }
 0x3a8   :  { %2737 = vmatpush1.bf16.msra.mxu0 %v4381_v28  ;;  %2819 = vmatpush1.bf16.msra.mxu1 %v4383_v29  ;;  %v1385_v28 = vld [vmem:[#allocation14 + $0x760] sm:$0xff]  ;;  %v1382_v29 = vld [vmem:[#allocation14 + $0x748] sm:$0xff] }
 0x3a9   :  { %2738 = vmatprep.subr.bf16.mxu0 %v4390_v30  ;;  %2820 = vmatprep.subr.bf16.mxu1 %v4392_v31  ;;  %v1386_v30 = vld [vmem:[#allocation14 + $0x768] sm:$0xff]  ;;  %v4437_v31 = vcombine.low %v1373_v17, %v1377_v19  ;;  %v4446_v40 = vcombine.high %v1381_v27, %v1385_v28  ;;  %v1172_v17 = vld [vmem:[#allocation14 + $0xb8] sm:$0xff] }
 0x3aa   :  { %v4448_v10 = vcombine.high %v1382_v29, %v1386_v30  ;;  %v4447_v49 = vcombine.low %v1382_v29, %v1386_v30 }
 0x3ac   :  { %2739 = vmatpush1.bf16.msra.mxu0 %v4389_v15  ;;  %2821 = vmatpush1.bf16.msra.mxu1 %v4391_v41  ;;  %v1393_v15 = vld [vmem:[#allocation14 + $0x7a0] sm:$0xff]  ;;  %v1390_v41 = vld [vmem:[#allocation14 + $0x788] sm:$0xff] }
 0x3ad   :  { %2740 = vmatprep.subr.bf16.mxu0 %v4398_v47  ;;  %2822 = vmatprep.subr.bf16.mxu1 %v4400_v48  ;;  %v1394_v47 = vld [vmem:[#allocation14 + $0x7a8] sm:$0xff]  ;;  %v4445_v48 = vcombine.low %v1381_v27, %v1385_v28  ;;  %v4454_v51 = vcombine.high %v1389_v14, %v1393_v15  ;;  %v1180_v27 = vld [vmem:[#allocation14 + $0xf8] sm:$0xff] }
 0x3ae   :  { %v4456_v52 = vcombine.high %v1390_v41, %v1394_v47  ;;  %v4455_v60 = vcombine.low %v1390_v41, %v1394_v47 }
 0x3b0   :  { %2741 = vmatpush1.bf16.msra.mxu0 %v4397_v56  ;;  %2823 = vmatpush1.bf16.msra.mxu1 %v4399_v57  ;;  %v1401_v56 = vld [vmem:[#allocation14 + $0x7e0] sm:$0xff]  ;;  %v1398_v57 = vld [vmem:[#allocation14 + $0x7c8] sm:$0xff] }
 0x3b1   :  { %2742 = vmatprep.subr.bf16.mxu0 %v4406_v58  ;;  %2824 = vmatprep.subr.bf16.mxu1 %v4408_v59  ;;  %v1402_v58 = vld [vmem:[#allocation14 + $0x7e8] sm:$0xff]  ;;  %v4453_v59 = vcombine.low %v1389_v14, %v1393_v15  ;;  %v4462_v62 = vcombine.high %v1397_v55, %v1401_v56  ;;  %v4461_v12 = vcombine.low %v1397_v55, %v1401_v56 }
 0x3b2   :  { %v4464_v63 = vcombine.high %v1398_v57, %v1402_v58  ;;  %v4463_v4 = vcombine.low %v1398_v57, %v1402_v58 }
 0x3b4   :  { %2743 = vmatpush1.bf16.msra.mxu0 %v4405_v2  ;;  %2825 = vmatpush1.bf16.msra.mxu1 %v4407_v3  ;;  %v1139_v2 = vmul.f32 0.2, %v5424_v37  ;;  %v1155_v3 = vld [vmem:[#allocation14 + $0x30] sm:$0xff] }
 0x3b5   :  { %2744 = vmatprep.subr.bf16.mxu0 %v4414_v46  ;;  %2826 = vmatprep.subr.bf16.mxu1 %v4416_v9  ;;  %v1152_v46 = vld [vmem:[#allocation14 + $0x18] sm:$0xff]  ;;  %v4218_v44 = vcombine.high %v1151_v1, %v1155_v3  ;;  %v4217_v34 = vcombine.low %v1151_v1, %v1155_v3 }
 0x3b6   :  { %v1156_v9 = vld [vmem:[#allocation14 + $0x38] sm:$0xff] }
 0x3b7   :  { %v4220_v5 = vcombine.high %v1152_v46, %v1156_v9  ;;  %v4219_v36 = vcombine.low %v1152_v46, %v1156_v9  ;;  %v1207_v9 = vld [vmem:[#allocation14 + $0x1d0] sm:$0xff] }
 0x3b8   :  { %2745 = vmatpush1.bf16.msra.mxu0 %v4413_v6  ;;  %2827 = vmatpush1.bf16.msra.mxu1 %v4415_v7  ;;  %v1143_v6 = vsel %vm1135_vm10, %v5424_v37, %v1139_v2  ;;  %v1159_v7 = vld [vmem:[#allocation14 + $0x50] sm:$0xff]  ;;  %v1168_v37 = vld [vmem:[#allocation14 + $0x98] sm:$0xff] }
 0x3b9   :  { %2746 = vmatprep.subr.bf16.mxu0 %v4422_v8  ;;  %2828 = vmatprep.subr.bf16.mxu1 %v4424_v13  ;;  %v1163_v8 = vld [vmem:[#allocation14 + $0x70] sm:$0xff]  ;;  %v1160_v13 = vld [vmem:[#allocation14 + $0x58] sm:$0xff]  ;;  %v5447_v35 = vpack.c.bf16 %v1143_v6, %v1143_v6  ;;  %v4235_v29 = vcombine.low %v1168_v37, %v1172_v17 }
 0x3ba   :  { %v4225_v19 = vcombine.low %v1159_v7, %v1163_v8  ;;  %v4227_v11 = vcombine.low %v1160_v13, %v1164_v33 }
 0x3bc   :  { %2747 = vmatpush1.bf16.msra.mxu0 %v4421_v38  ;;  %2829 = vmatpush1.bf16.msra.mxu1 %v4423_v16  ;;  %v4226_v38 = vcombine.high %v1159_v7, %v1163_v8  ;;  %v4228_v16 = vcombine.high %v1160_v13, %v1164_v33  ;;  %v1215_v13 = vld [vmem:[#allocation14 + $0x210] sm:$0xff] }
 0x3bd   :  { %2748 = vmatprep.subr.bf16.mxu0 %v4430_v18  ;;  %2830 = vmatprep.subr.bf16.mxu1 %v4432_v39  ;;  %v1167_v18 = vld [vmem:[#allocation14 + $0x90] sm:$0xff] }
 0x3be   :  { %v1171_v39 = vld [vmem:[#allocation14 + $0xb0] sm:$0xff] }
 0x3bf   :  { %v4234_v20 = vcombine.high %v1167_v18, %v1171_v39  ;;  %v4233_v28 = vcombine.low %v1167_v18, %v1171_v39  ;;  %v1219_v33 = vld [vmem:[#allocation14 + $0x230] sm:$0xff] }
 0x3c0   :  { %2749 = vmatpush1.bf16.msra.mxu0 %v4429_v21  ;;  %2831 = vmatpush1.bf16.msra.mxu1 %v4431_v23  ;;  %v4236_v21 = vcombine.high %v1168_v37, %v1172_v17  ;;  %v1175_v23 = vld [vmem:[#allocation14 + $0xd0] sm:$0xff]  ;;  %v4282_v18 = vcombine.high %v1215_v13, %v1219_v33 }
 0x3c1   :  { %2750 = vmatprep.subr.bf16.mxu0 %v4438_v25  ;;  %2832 = vmatprep.subr.bf16.mxu1 %v4440_v26  ;;  %v1179_v25 = vld [vmem:[#allocation14 + $0xf0] sm:$0xff]  ;;  %v1176_v26 = vld [vmem:[#allocation14 + $0xd8] sm:$0xff] }
 0x3c2   :  { %v4242_v30 = vcombine.high %v1175_v23, %v1179_v25  ;;  %v4241_v14 = vcombine.low %v1175_v23, %v1179_v25  ;;  %v4243_v15 = vcombine.low %v1176_v26, %v1180_v27  ;;  %v1223_v37 = vld [vmem:[#allocation14 + $0x250] sm:$0xff] }
 0x3c3   :  { %v1227_v17 = vld [vmem:[#allocation14 + $0x270] sm:$0xff] }
 0x3c4   :  { %2751 = vmatpush1.bf16.msra.mxu0 %v4437_v31  ;;  %2833 = vmatpush1.bf16.msra.mxu1 %v4439_v32  ;;  %v4244_v31 = vcombine.high %v1176_v26, %v1180_v27  ;;  %v1183_v32 = vld [vmem:[#allocation14 + $0x110] sm:$0xff]  ;;  %v4290_v23 = vcombine.high %v1223_v37, %v1227_v17 }
 0x3c5   :  { %2752 = vmatprep.subr.bf16.mxu0 %v4446_v40  ;;  %2834 = vmatprep.subr.bf16.mxu1 %v4448_v10  ;;  %v1187_v40 = vld [vmem:[#allocation14 + $0x130] sm:$0xff]  ;;  %v1188_v10 = vld [vmem:[#allocation14 + $0x138] sm:$0xff] }
 0x3c6   :  { %v4250_v41 = vcombine.high %v1183_v32, %v1187_v40  ;;  %v4249_v55 = vcombine.low %v1183_v32, %v1187_v40  ;;  %v1231_v26 = vld [vmem:[#allocation14 + $0x290] sm:$0xff] }
 0x3c7   :  { %v1235_v27 = vld [vmem:[#allocation14 + $0x2b0] sm:$0xff] }
 0x3c8   :  { %2753 = vmatpush1.bf16.msra.mxu0 %v4445_v48  ;;  %2835 = vmatpush1.bf16.msra.mxu1 %v4447_v49  ;;  %v1191_v48 = vld [vmem:[#allocation14 + $0x150] sm:$0xff]  ;;  %v4298_v32 = vcombine.high %v1231_v26, %v1235_v27 }
 0x3c9   :  { %2754 = vmatprep.subr.bf16.mxu0 %v4454_v51  ;;  %2836 = vmatprep.subr.bf16.mxu1 %v4456_v52  ;;  %v1195_v49 = vld [vmem:[#allocation14 + $0x170] sm:$0xff]  ;;  %v1192_v51 = vld [vmem:[#allocation14 + $0x158] sm:$0xff] }
 0x3ca   :  { %v1196_v52 = vld [vmem:[#allocation14 + $0x178] sm:$0xff]  ;;  %v4258_v57 = vcombine.high %v1191_v48, %v1195_v49  ;;  %v4257_v1 = vcombine.low %v1191_v48, %v1195_v49 }
 0x3cb   :  { %v4260_v58 = vcombine.high %v1192_v51, %v1196_v52  ;;  %v4259_v2 = vcombine.low %v1192_v51, %v1196_v52  ;;  %v1247_v51 = vld [vmem:[#allocation14 + $0x310] sm:$0xff] }
 0x3cc   :  { %2755 = vmatpush1.bf16.msra.mxu0 %v4453_v59  ;;  %2837 = vmatpush1.bf16.msra.mxu1 %v4455_v60  ;;  %v1199_v59 = vld [vmem:[#allocation14 + $0x190] sm:$0xff] }
 0x3cd   :  { %2756 = vmatprep.subr.bf16.mxu0 %v4462_v62  ;;  %2838 = vmatprep.subr.bf16.mxu1 %v4464_v63  ;;  %v1203_v60 = vld [vmem:[#allocation14 + $0x1b0] sm:$0xff]  ;;  %v1200_v62 = vld [vmem:[#allocation14 + $0x198] sm:$0xff] }
 0x3ce   :  { %v1204_v63 = vld [vmem:[#allocation14 + $0x1b8] sm:$0xff]  ;;  %v4266_v3 = vcombine.high %v1199_v59, %v1203_v60  ;;  %v1251_v52 = vld [vmem:[#allocation14 + $0x330] sm:$0xff] }
 0x3cf   :  { %v4268_v46 = vcombine.high %v1200_v62, %v1204_v63  ;;  %v4267_v6 = vcombine.low %v1200_v62, %v1204_v63  ;;  %v1255_v62 = vld [vmem:[#allocation14 + $0x350] sm:$0xff] }
 0x3d0   :  { %2757 = vmatpush1.bf16.msra.mxu0 %v4461_v12  ;;  %2839 = vmatpush1.bf16.msra.mxu1 %v4463_v4  ;;  %v1211_v12 = vld [vmem:[#allocation14 + $0x1f0] sm:$0xff]  ;;  %v1208_v4 = vld [vmem:[#allocation14 + $0x1d8] sm:$0xff] }
 0x3d1   :  { %2849 = vmatprep.subr.bf16.mxu0 %v4218_v44  ;;  %2931 = vmatprep.subr.bf16.mxu1 %v4220_v5  ;;  %v1212_v44 = vld [vmem:[#allocation14 + $0x1f8] sm:$0xff]  ;;  %v4265_v5 = vcombine.low %v1199_v59, %v1203_v60  ;;  %v4274_v7 = vcombine.high %v1207_v9, %v1211_v12  ;;  %v4314_v59 = vcombine.high %v1247_v51, %v1251_v52  ;;  %v1259_v63 = vld [vmem:[#allocation14 + $0x370] sm:$0xff] }
 0x3d2   :  { %v4276_v8 = vcombine.high %v1208_v4, %v1212_v44 }
 0x3d3   :  { %2759 = vmatmul.mubr.bf16.vlgmr.msra.gmra.mrb[8].mxu0 %v5447_v35  ;;  %2841 = vmatmul.mubr.bf16.vlgmr.msra.gmra.mrb[8].mxu1 %v5447_v35 }
 0x3d4   :  { %2850 = vmatpush1.bf16.msra.mxu0 %v4217_v34  ;;  %2881 = vmatprep.mubr.bf16.mxu0 %v5426_v50  ;;  %v1216_v34 = vld [vmem:[#allocation14 + $0x218] sm:$0xff] }
 0x3d5   :  { %2932 = vmatpush1.bf16.msra.mxu1 %v4219_v36  ;;  %2963 = vmatprep.mubr.bf16.mxu1 %v5426_v50  ;;  %v1184_v50 = vld [vmem:[#allocation14 + $0x118] sm:$0xff] }
 0x3d6   :  { %2851 = vmatprep.subr.bf16.mxu0 %v4226_v38  ;;  %2933 = vmatprep.subr.bf16.mxu1 %v4228_v16  ;;  %v4252_v47 = vcombine.high %v1184_v50, %v1188_v10  ;;  %v4251_v56 = vcombine.low %v1184_v50, %v1188_v10  ;;  %v1220_v36 = vld [vmem:[#allocation14 + $0x238] sm:$0xff]  ;;  %v4273_v38 = vcombine.low %v1207_v9, %v1211_v12  ;;  %v1239_v50 = vld [vmem:[#allocation14 + $0x2d0] sm:$0xff] }
 0x3d7   :  { %v4275_v16 = vcombine.low %v1208_v4, %v1212_v44  ;;  %v4284_v39 = vcombine.high %v1216_v34, %v1220_v36  ;;  %v1243_v10 = vld [vmem:[#allocation14 + $0x2f0] sm:$0xff]  ;;  %v4322_v9 = vcombine.high %v1255_v62, %v1259_v63 }
 0x3d8   :  { %2852 = vmatpush1.bf16.msra.mxu0 %v4225_v19  ;;  %v1224_v19 = vld [vmem:[#allocation14 + $0x258] sm:$0xff]  ;;  %v4306_v48 = vcombine.high %v1239_v50, %v1243_v10  ;;  %v1263_v4 = vld [vmem:[#allocation14 + $0x390] sm:$0xff] }
 0x3d9   :  { %2934 = vmatpush1.bf16.msra.mxu1 %v4227_v11  ;;  %2853 = vmatprep.subr.bf16.mxu0 %v4234_v20  ;;  %v1228_v11 = vld [vmem:[#allocation14 + $0x278] sm:$0xff]  ;;  %v4281_v20 = vcombine.low %v1215_v13, %v1219_v33  ;;  %v1267_v44 = vld [vmem:[#allocation14 + $0x3b0] sm:$0xff] }
 0x3da   :  { %2935 = vmatprep.subr.bf16.mxu1 %v4236_v21  ;;  %v4283_v21 = vcombine.low %v1216_v34, %v1220_v36  ;;  %v4292_v25 = vcombine.high %v1224_v19, %v1228_v11  ;;  %v4330_v13 = vcombine.high %v1263_v4, %v1267_v44  ;;  %v1271_v34 = vld [vmem:[#allocation14 + $0x3d0] sm:$0xff] }
 0x3db   :  { %v1275_v36 = vld [vmem:[#allocation14 + $0x3f0] sm:$0xff] }
 0x3dc   :  { %2854 = vmatpush1.bf16.msra.mxu0 %v4233_v28  ;;  %v1232_v28 = vld [vmem:[#allocation14 + $0x298] sm:$0xff] }
 0x3dd   :  { %2936 = vmatpush1.bf16.msra.mxu1 %v4235_v29  ;;  %2855 = vmatprep.subr.bf16.mxu0 %v4242_v30  ;;  %v1236_v29 = vld [vmem:[#allocation14 + $0x2b8] sm:$0xff]  ;;  %v4289_v30 = vcombine.low %v1223_v37, %v1227_v17  ;;  %v4338_v37 = vcombine.high %v1271_v34, %v1275_v36 }
 0x3de   :  { %2937 = vmatprep.subr.bf16.mxu1 %v4244_v31  ;;  %v4291_v31 = vcombine.low %v1224_v19, %v1228_v11  ;;  %v4300_v40 = vcombine.high %v1232_v28, %v1236_v29  ;;  %v1279_v19 = vld [vmem:[#allocation14 + $0x410] sm:$0xff] }
 0x3df   :  { %v1283_v11 = vld [vmem:[#allocation14 + $0x430] sm:$0xff] }
 0x3e0   :  { %2856 = vmatpush1.bf16.msra.mxu0 %v4241_v14  ;;  %v1240_v14 = vld [vmem:[#allocation14 + $0x2d8] sm:$0xff] }
 0x3e1   :  { %2938 = vmatpush1.bf16.msra.mxu1 %v4243_v15  ;;  %2857 = vmatprep.subr.bf16.mxu0 %v4250_v41  ;;  %v1244_v15 = vld [vmem:[#allocation14 + $0x2f8] sm:$0xff]  ;;  %v4297_v41 = vcombine.low %v1231_v26, %v1235_v27  ;;  %v4346_v26 = vcombine.high %v1279_v19, %v1283_v11 }
 0x3e2   :  { %2939 = vmatprep.subr.bf16.mxu1 %v4252_v47  ;;  %v4299_v47 = vcombine.low %v1232_v28, %v1236_v29  ;;  %v4308_v49 = vcombine.high %v1240_v14, %v1244_v15  ;;  %v1287_v28 = vld [vmem:[#allocation14 + $0x450] sm:$0xff] }
 0x3e3   :  { %v1291_v29 = vld [vmem:[#allocation14 + $0x470] sm:$0xff] }
 0x3e4   :  { %2858 = vmatpush1.bf16.msra.mxu0 %v4249_v55  ;;  %v1248_v55 = vld [vmem:[#allocation14 + $0x318] sm:$0xff] }
 0x3e5   :  { %2940 = vmatpush1.bf16.msra.mxu1 %v4251_v56  ;;  %2859 = vmatprep.subr.bf16.mxu0 %v4258_v57  ;;  %v1252_v56 = vld [vmem:[#allocation14 + $0x338] sm:$0xff]  ;;  %v4305_v57 = vcombine.low %v1239_v50, %v1243_v10  ;;  %v4354_v50 = vcombine.high %v1287_v28, %v1291_v29  ;;  %v1295_v10 = vld [vmem:[#allocation14 + $0x490] sm:$0xff] }
 0x3e6   :  { %2941 = vmatprep.subr.bf16.mxu1 %v4260_v58  ;;  %v4307_v58 = vcombine.low %v1240_v14, %v1244_v15  ;;  %v4316_v60 = vcombine.high %v1248_v55, %v1252_v56  ;;  %v1299_v14 = vld [vmem:[#allocation14 + $0x4b0] sm:$0xff] }
 0x3e8   :  { %2860 = vmatpush1.bf16.msra.mxu0 %v4257_v1  ;;  %v1256_v1 = vld [vmem:[#allocation14 + $0x358] sm:$0xff] }
 0x3e9   :  { %2942 = vmatpush1.bf16.msra.mxu1 %v4259_v2  ;;  %2861 = vmatprep.subr.bf16.mxu0 %v4266_v3  ;;  %v1260_v2 = vld [vmem:[#allocation14 + $0x378] sm:$0xff]  ;;  %v4313_v3 = vcombine.low %v1247_v51, %v1251_v52  ;;  %v4362_v51 = vcombine.high %v1295_v10, %v1299_v14 }
 0x3ea   :  { %2943 = vmatprep.subr.bf16.mxu1 %v4268_v46  ;;  %v4315_v46 = vcombine.low %v1248_v55, %v1252_v56  ;;  %v4324_v12 = vcombine.high %v1256_v1, %v1260_v2  ;;  %v1303_v55 = vld [vmem:[#allocation14 + $0x4d0] sm:$0xff] }
 0x3eb   :  { %v1307_v56 = vld [vmem:[#allocation14 + $0x4f0] sm:$0xff] }
 0x3ec   :  { %2862 = vmatpush1.bf16.msra.mxu0 %v4265_v5  ;;  %v1264_v5 = vld [vmem:[#allocation14 + $0x398] sm:$0xff] }
 0x3ed   :  { %2944 = vmatpush1.bf16.msra.mxu1 %v4267_v6  ;;  %2863 = vmatprep.subr.bf16.mxu0 %v4274_v7  ;;  %v1268_v6 = vld [vmem:[#allocation14 + $0x3b8] sm:$0xff]  ;;  %v4321_v7 = vcombine.low %v1255_v62, %v1259_v63  ;;  %v1311_v63 = vld [vmem:[#allocation14 + $0x510] sm:$0xff] }
 0x3ee   :  { %2945 = vmatprep.subr.bf16.mxu1 %v4276_v8  ;;  %v4323_v8 = vcombine.low %v1256_v1, %v1260_v2  ;;  %v4332_v33 = vcombine.high %v1264_v5, %v1268_v6  ;;  %v1315_v1 = vld [vmem:[#allocation14 + $0x530] sm:$0xff]  ;;  %v1312_v2 = vld [vmem:[#allocation14 + $0x518] sm:$0xff] }
 0x3f0   :  { %2864 = vmatpush1.bf16.msra.mxu0 %v4273_v38  ;;  %v1272_v38 = vld [vmem:[#allocation14 + $0x3d8] sm:$0xff] }
 0x3f1   :  { %2946 = vmatpush1.bf16.msra.mxu1 %v4275_v16  ;;  %2865 = vmatprep.subr.bf16.mxu0 %v4282_v18  ;;  %v1276_v16 = vld [vmem:[#allocation14 + $0x3f8] sm:$0xff]  ;;  %v4329_v18 = vcombine.low %v1263_v4, %v1267_v44  ;;  %v1319_v4 = vld [vmem:[#allocation14 + $0x550] sm:$0xff] }
 0x3f2   :  { %2947 = vmatprep.subr.bf16.mxu1 %v4284_v39  ;;  %v4331_v39 = vcombine.low %v1264_v5, %v1268_v6  ;;  %v4340_v17 = vcombine.high %v1272_v38, %v1276_v16  ;;  %v1323_v44 = vld [vmem:[#allocation14 + $0x570] sm:$0xff]  ;;  %v1320_v5 = vld [vmem:[#allocation14 + $0x558] sm:$0xff] }
 0x3f3   :  { %v1324_v6 = vld [vmem:[#allocation14 + $0x578] sm:$0xff] }
 0x3f4   :  { %2866 = vmatpush1.bf16.msra.mxu0 %v4281_v20  ;;  %v1280_v20 = vld [vmem:[#allocation14 + $0x418] sm:$0xff] }
 0x3f5   :  { %2948 = vmatpush1.bf16.msra.mxu1 %v4283_v21  ;;  %2867 = vmatprep.subr.bf16.mxu0 %v4290_v23  ;;  %v1284_v21 = vld [vmem:[#allocation14 + $0x438] sm:$0xff]  ;;  %v4337_v23 = vcombine.low %v1271_v34, %v1275_v36  ;;  %v1327_v34 = vld [vmem:[#allocation14 + $0x590] sm:$0xff] }
 0x3f6   :  { %2949 = vmatprep.subr.bf16.mxu1 %v4292_v25  ;;  %v4339_v25 = vcombine.low %v1272_v38, %v1276_v16  ;;  %v4348_v27 = vcombine.high %v1280_v20, %v1284_v21  ;;  %v1331_v36 = vld [vmem:[#allocation14 + $0x5b0] sm:$0xff]  ;;  %v1328_v38 = vld [vmem:[#allocation14 + $0x598] sm:$0xff] }
 0x3f7   :  { %v1332_v16 = vld [vmem:[#allocation14 + $0x5b8] sm:$0xff] }
 0x3f8   :  { %2868 = vmatpush1.bf16.msra.mxu0 %v4289_v30  ;;  %v4345_v30 = vcombine.low %v1279_v19, %v1283_v11  ;;  %v1335_v19 = vld [vmem:[#allocation14 + $0x5d0] sm:$0xff] }
 0x3f9   :  { %2950 = vmatpush1.bf16.msra.mxu1 %v4291_v31  ;;  %2869 = vmatprep.subr.bf16.mxu0 %v4298_v32  ;;  %v1288_v31 = vld [vmem:[#allocation14 + $0x458] sm:$0xff]  ;;  %v1339_v11 = vld [vmem:[#allocation14 + $0x5f0] sm:$0xff] }
 0x3fa   :  { %2951 = vmatprep.subr.bf16.mxu1 %v4300_v40  ;;  %v1292_v32 = vld [vmem:[#allocation14 + $0x478] sm:$0xff]  ;;  %v4347_v40 = vcombine.low %v1280_v20, %v1284_v21 }
 0x3fb   :  { %v4356_v15 = vcombine.high %v1288_v31, %v1292_v32  ;;  %v1336_v20 = vld [vmem:[#allocation14 + $0x5d8] sm:$0xff] }
 0x3fc   :  { %2870 = vmatpush1.bf16.msra.mxu0 %v4297_v41  ;;  %v1296_v41 = vld [vmem:[#allocation14 + $0x498] sm:$0xff] }
 0x3fd   :  { %2952 = vmatpush1.bf16.msra.mxu1 %v4299_v47  ;;  %2871 = vmatprep.subr.bf16.mxu0 %v4306_v48  ;;  %v1300_v47 = vld [vmem:[#allocation14 + $0x4b8] sm:$0xff]  ;;  %v4353_v48 = vcombine.low %v1287_v28, %v1291_v29  ;;  %v1343_v28 = vld [vmem:[#allocation14 + $0x610] sm:$0xff] }
 0x3fe   :  { %2953 = vmatprep.subr.bf16.mxu1 %v4308_v49  ;;  %v4355_v49 = vcombine.low %v1288_v31, %v1292_v32  ;;  %v4364_v52 = vcombine.high %v1296_v41, %v1300_v47  ;;  %v1340_v21 = vld [vmem:[#allocation14 + $0x5f8] sm:$0xff]  ;;  %v1347_v29 = vld [vmem:[#allocation14 + $0x630] sm:$0xff]  ;;  %v4401_v32 = vcombine.low %v1335_v19, %v1339_v11 }
 0x3ff   :  { %v1348_v31 = vld [vmem:[#allocation14 + $0x638] sm:$0xff] }
 0x400   :  { %2872 = vmatpush1.bf16.msra.mxu0 %v4305_v57  ;;  %v1304_v57 = vld [vmem:[#allocation14 + $0x4d8] sm:$0xff] }
 0x401   :  { %2954 = vmatpush1.bf16.msra.mxu1 %v4307_v58  ;;  %2873 = vmatprep.subr.bf16.mxu0 %v4314_v59  ;;  %v1308_v58 = vld [vmem:[#allocation14 + $0x4f8] sm:$0xff]  ;;  %v4361_v59 = vcombine.low %v1295_v10, %v1299_v14  ;;  %v1351_v14 = vld [vmem:[#allocation14 + $0x650] sm:$0xff] }
 0x402   :  { %2955 = vmatprep.subr.bf16.mxu1 %v4316_v60  ;;  %v4370_v60 = vcombine.high %v1303_v55, %v1307_v56  ;;  %v4372_v62 = vcombine.high %v1304_v57, %v1308_v58 }
 0x404   :  { %2874 = vmatpush1.bf16.msra.mxu0 %v4313_v3  ;;  %v1316_v3 = vld [vmem:[#allocation14 + $0x538] sm:$0xff] }
 0x405   :  { %2956 = vmatpush1.bf16.msra.mxu1 %v4315_v46  ;;  %2875 = vmatprep.subr.bf16.mxu0 %v4322_v9  ;;  %v4371_v46 = vcombine.low %v1304_v57, %v1308_v58  ;;  %v4378_v9 = vcombine.high %v1311_v63, %v1315_v1  ;;  %v1360_v57 = vld [vmem:[#allocation14 + $0x698] sm:$0xff] }
 0x406   :  { %2957 = vmatprep.subr.bf16.mxu1 %v4324_v12  ;;  %v4380_v12 = vcombine.high %v1312_v2, %v1316_v3  ;;  %v1364_v58 = vld [vmem:[#allocation14 + $0x6b8] sm:$0xff] }
 0x408   :  { %2876 = vmatpush1.bf16.msra.mxu0 %v4321_v7  ;;  %v4377_v7 = vcombine.low %v1311_v63, %v1315_v1  ;;  %v1367_v63 = vld [vmem:[#allocation14 + $0x6d0] sm:$0xff] }
 0x409   :  { %2958 = vmatpush1.bf16.msra.mxu1 %v4323_v8  ;;  %2877 = vmatprep.subr.bf16.mxu0 %v4330_v13  ;;  %v4379_v8 = vcombine.low %v1312_v2, %v1316_v3  ;;  %v4386_v13 = vcombine.high %v1319_v4, %v1323_v44  ;;  %v1371_v1 = vld [vmem:[#allocation14 + $0x6f0] sm:$0xff]  ;;  %v1368_v2 = vld [vmem:[#allocation14 + $0x6d8] sm:$0xff] }
 0x40a   :  { %2959 = vmatprep.subr.bf16.mxu1 %v4332_v33  ;;  %v4388_v33 = vcombine.high %v1320_v5, %v1324_v6  ;;  %v1372_v3 = vld [vmem:[#allocation14 + $0x6f8] sm:$0xff] }
 0x40c   :  { %2878 = vmatpush1.bf16.msra.mxu0 %v4329_v18  ;;  %v4385_v18 = vcombine.low %v1319_v4, %v1323_v44  ;;  %v1375_v4 = vld [vmem:[#allocation14 + $0x710] sm:$0xff] }
 0x40d   :  { %2960 = vmatpush1.bf16.msra.mxu1 %v4331_v39  ;;  %2879 = vmatprep.subr.bf16.mxu0 %v4338_v37  ;;  %v4387_v39 = vcombine.low %v1320_v5, %v1324_v6  ;;  %v4394_v37 = vcombine.high %v1327_v34, %v1331_v36  ;;  %v1379_v44 = vld [vmem:[#allocation14 + $0x730] sm:$0xff]  ;;  %v1376_v5 = vld [vmem:[#allocation14 + $0x718] sm:$0xff] }
 0x40e   :  { %2961 = vmatprep.subr.bf16.mxu1 %v4340_v17  ;;  %v4396_v17 = vcombine.high %v1328_v38, %v1332_v16  ;;  %v1380_v6 = vld [vmem:[#allocation14 + $0x738] sm:$0xff] }
 0x410   :  { %2880 = vmatpush1.bf16.msra.mxu0 %v4337_v23  ;;  %v4393_v23 = vcombine.low %v1327_v34, %v1331_v36  ;;  %v1383_v34 = vld [vmem:[#allocation14 + $0x750] sm:$0xff] }
 0x411   :  { %2962 = vmatpush1.bf16.msra.mxu1 %v4339_v25  ;;  %2890 = vmatprep.subr.bf16.mxu0 %v4346_v26  ;;  %v4395_v25 = vcombine.low %v1328_v38, %v1332_v16  ;;  %v4402_v26 = vcombine.high %v1335_v19, %v1339_v11  ;;  %v1387_v36 = vld [vmem:[#allocation14 + $0x770] sm:$0xff]  ;;  %v1384_v38 = vld [vmem:[#allocation14 + $0x758] sm:$0xff] }
 0x412   :  { %2972 = vmatprep.subr.bf16.mxu1 %v4348_v27  ;;  %v4404_v27 = vcombine.high %v1336_v20, %v1340_v21  ;;  %v1388_v16 = vld [vmem:[#allocation14 + $0x778] sm:$0xff]  ;;  %v1391_v19 = vld [vmem:[#allocation14 + $0x790] sm:$0xff] }
 0x413   :  { %2882 = vmatmul.mubr.bf16.vlgmr.msra.gmra.mrb[12].mxu0 %v5428_v54  ;;  %v1395_v11 = vld [vmem:[#allocation14 + $0x7b0] sm:$0xff] }
 0x414   :  { %2964 = vmatmul.mubr.bf16.vlgmr.msra.gmra.mrb[12].mxu1 %v5428_v54  ;;  %2891 = vmatpush1.bf16.msra.mxu0 %v4345_v30  ;;  %v4363_v54 = vcombine.low %v1296_v41, %v1300_v47  ;;  %v1344_v30 = vld [vmem:[#allocation14 + $0x618] sm:$0xff] }
 0x415   :  { %2922 = vmatprep.mubr.bf16.mxu0 %v5434_v61  ;;  %2973 = vmatpush1.bf16.msra.mxu1 %v4347_v40  ;;  %v4403_v40 = vcombine.low %v1336_v20, %v1340_v21  ;;  %v4412_v10 = vcombine.high %v1344_v30, %v1348_v31  ;;  %v1352_v41 = vld [vmem:[#allocation14 + $0x658] sm:$0xff] }
 0x416   :  { %3004 = vmatprep.mubr.bf16.mxu1 %v5434_v61  ;;  %2892 = vmatprep.subr.bf16.mxu0 %v4354_v50  ;;  %v4369_v61 = vcombine.low %v1303_v55, %v1307_v56  ;;  %v4410_v50 = vcombine.high %v1343_v28, %v1347_v29  ;;  %v1356_v47 = vld [vmem:[#allocation14 + $0x678] sm:$0xff]  ;;  %v1359_v55 = vld [vmem:[#allocation14 + $0x690] sm:$0xff] }
 0x417   :  { %2974 = vmatprep.subr.bf16.mxu1 %v4356_v15  ;;  %v1355_v15 = vld [vmem:[#allocation14 + $0x670] sm:$0xff]  ;;  %v1392_v20 = vld [vmem:[#allocation14 + $0x798] sm:$0xff] }
 0x418   :  { %2893 = vmatpush1.bf16.msra.mxu0 %v4353_v48  ;;  %v4409_v48 = vcombine.low %v1343_v28, %v1347_v29  ;;  %v1363_v56 = vld [vmem:[#allocation14 + $0x6b0] sm:$0xff]  ;;  %v1396_v21 = vld [vmem:[#allocation14 + $0x7b8] sm:$0xff] }
 0x419   :  { %2975 = vmatpush1.bf16.msra.mxu1 %v4355_v49  ;;  %2894 = vmatprep.subr.bf16.mxu0 %v4362_v51  ;;  %v4411_v49 = vcombine.low %v1344_v30, %v1348_v31  ;;  %v4418_v51 = vcombine.high %v1351_v14, %v1355_v15  ;;  %v1399_v28 = vld [vmem:[#allocation14 + $0x7d0] sm:$0xff]  ;;  %v1400_v30 = vld [vmem:[#allocation14 + $0x7d8] sm:$0xff] }
 0x41a   :  { %2976 = vmatprep.subr.bf16.mxu1 %v4364_v52  ;;  %v4420_v52 = vcombine.high %v1352_v41, %v1356_v47  ;;  %v1403_v29 = vld [vmem:[#allocation14 + $0x7f0] sm:$0xff]  ;;  %v1404_v31 = vld [vmem:[#allocation14 + $0x7f8] sm:$0xff] }
 0x41c   :  { %2895 = vmatpush1.bf16.msra.mxu0 %v4361_v59  ;;  %v4417_v59 = vcombine.low %v1351_v14, %v1355_v15  ;;  %v4465_v14 = vcombine.low %v1399_v28, %v1403_v29  ;;  %v4467_v15 = vcombine.low %v1400_v30, %v1404_v31 }
 0x41d   :  { %2977 = vmatpush1.bf16.msra.mxu1 %v4363_v54  ;;  %2896 = vmatprep.subr.bf16.mxu0 %v4370_v60  ;;  %v4419_v54 = vcombine.low %v1352_v41, %v1356_v47  ;;  %v4426_v60 = vcombine.high %v1359_v55, %v1363_v56 }
 0x41e   :  { %2978 = vmatprep.subr.bf16.mxu1 %v4372_v62  ;;  %v4428_v62 = vcombine.high %v1360_v57, %v1364_v58 }
 0x420   :  { %2897 = vmatpush1.bf16.msra.mxu0 %v4369_v61  ;;  %v4425_v61 = vcombine.low %v1359_v55, %v1363_v56 }
 0x421   :  { %2979 = vmatpush1.bf16.msra.mxu1 %v4371_v46  ;;  %2898 = vmatprep.subr.bf16.mxu0 %v4378_v9  ;;  %v4427_v46 = vcombine.low %v1360_v57, %v1364_v58  ;;  %v4434_v9 = vcombine.high %v1367_v63, %v1371_v1 }
 0x422   :  { %2980 = vmatprep.subr.bf16.mxu1 %v4380_v12  ;;  %v4436_v12 = vcombine.high %v1368_v2, %v1372_v3 }
 0x424   :  { %2899 = vmatpush1.bf16.msra.mxu0 %v4377_v7  ;;  %v4433_v7 = vcombine.low %v1367_v63, %v1371_v1 }
 0x425   :  { %2981 = vmatpush1.bf16.msra.mxu1 %v4379_v8  ;;  %2900 = vmatprep.subr.bf16.mxu0 %v4386_v13  ;;  %v4435_v8 = vcombine.low %v1368_v2, %v1372_v3  ;;  %v4442_v13 = vcombine.high %v1375_v4, %v1379_v44 }
 0x426   :  { %2982 = vmatprep.subr.bf16.mxu1 %v4388_v33  ;;  %v4444_v33 = vcombine.high %v1376_v5, %v1380_v6 }
 0x428   :  { %2901 = vmatpush1.bf16.msra.mxu0 %v4385_v18  ;;  %v4441_v18 = vcombine.low %v1375_v4, %v1379_v44 }
 0x429   :  { %2983 = vmatpush1.bf16.msra.mxu1 %v4387_v39  ;;  %2902 = vmatprep.subr.bf16.mxu0 %v4394_v37  ;;  %v4443_v39 = vcombine.low %v1376_v5, %v1380_v6  ;;  %v4450_v37 = vcombine.high %v1383_v34, %v1387_v36 }
 0x42a   :  { %2984 = vmatprep.subr.bf16.mxu1 %v4396_v17  ;;  %v4452_v17 = vcombine.high %v1384_v38, %v1388_v16 }
 0x42c   :  { %2903 = vmatpush1.bf16.msra.mxu0 %v4393_v23  ;;  %v4449_v23 = vcombine.low %v1383_v34, %v1387_v36 }
 0x42d   :  { %2985 = vmatpush1.bf16.msra.mxu1 %v4395_v25  ;;  %2904 = vmatprep.subr.bf16.mxu0 %v4402_v26  ;;  %v4451_v25 = vcombine.low %v1384_v38, %v1388_v16  ;;  %v4458_v26 = vcombine.high %v1391_v19, %v1395_v11 }
 0x42e   :  { %2986 = vmatprep.subr.bf16.mxu1 %v4404_v27  ;;  %v4460_v27 = vcombine.high %v1392_v20, %v1396_v21 }
 0x430   :  { %2905 = vmatpush1.bf16.msra.mxu0 %v4401_v32  ;;  %v4457_v32 = vcombine.low %v1391_v19, %v1395_v11 }
 0x431   :  { %2987 = vmatpush1.bf16.msra.mxu1 %v4403_v40  ;;  %2906 = vmatprep.subr.bf16.mxu0 %v4410_v50  ;;  %v4459_v40 = vcombine.low %v1392_v20, %v1396_v21  ;;  %v4466_v50 = vcombine.high %v1399_v28, %v1403_v29 }
 0x432   :  { %2988 = vmatprep.subr.bf16.mxu1 %v4412_v10  ;;  %v4468_v10 = vcombine.high %v1400_v30, %v1404_v31 }
 0x434   :  { %2907 = vmatpush1.bf16.msra.mxu0 %v4409_v48 }
 0x435   :  { %2989 = vmatpush1.bf16.msra.mxu1 %v4411_v49  ;;  %2908 = vmatprep.subr.bf16.mxu0 %v4418_v51 }
 0x436   :  { %2990 = vmatprep.subr.bf16.mxu1 %v4420_v52 }
 0x438   :  { %2909 = vmatpush1.bf16.msra.mxu0 %v4417_v59 }
 0x439   :  { %2991 = vmatpush1.bf16.msra.mxu1 %v4419_v54  ;;  %2910 = vmatprep.subr.bf16.mxu0 %v4426_v60 }
 0x43a   :  { %2992 = vmatprep.subr.bf16.mxu1 %v4428_v62 }
 0x43c   :  { %2911 = vmatpush1.bf16.msra.mxu0 %v4425_v61 }
 0x43d   :  { %2993 = vmatpush1.bf16.msra.mxu1 %v4427_v46  ;;  %2912 = vmatprep.subr.bf16.mxu0 %v4434_v9 }
 0x43e   :  { %2994 = vmatprep.subr.bf16.mxu1 %v4436_v12 }
 0x440   :  { %2913 = vmatpush1.bf16.msra.mxu0 %v4433_v7 }
 0x441   :  { %2995 = vmatpush1.bf16.msra.mxu1 %v4435_v8  ;;  %2914 = vmatprep.subr.bf16.mxu0 %v4442_v13 }
 0x442   :  { %2996 = vmatprep.subr.bf16.mxu1 %v4444_v33 }
 0x444   :  { %2915 = vmatpush1.bf16.msra.mxu0 %v4441_v18 }
 0x445   :  { %2997 = vmatpush1.bf16.msra.mxu1 %v4443_v39  ;;  %2916 = vmatprep.subr.bf16.mxu0 %v4450_v37 }
 0x446   :  { %2998 = vmatprep.subr.bf16.mxu1 %v4452_v17 }
 0x448   :  { %2917 = vmatpush1.bf16.msra.mxu0 %v4449_v23 }
 0x449   :  { %2999 = vmatpush1.bf16.msra.mxu1 %v4451_v25  ;;  %2918 = vmatprep.subr.bf16.mxu0 %v4458_v26 }
 0x44a   :  { %3000 = vmatprep.subr.bf16.mxu1 %v4460_v27 }
 0x44c   :  { %2919 = vmatpush1.bf16.msra.mxu0 %v4457_v32 }
 0x44d   :  { %3001 = vmatpush1.bf16.msra.mxu1 %v4459_v40  ;;  %2920 = vmatprep.subr.bf16.mxu0 %v4466_v50 }
 0x44e   :  { %3002 = vmatprep.subr.bf16.mxu1 %v4468_v10 }
 0x450   :  { %2921 = vmatpush1.bf16.msra.mxu0 %v4465_v14 }
 0x451   :  { %3003 = vmatpush1.bf16.msra.mxu1 %v4467_v15 }
 0x453   :  { %2923 = vmatmul.mubr.bf16.vlgmr.msra.gmra.mrb[12].mxu0 %v5447_v35 }
 0x454   :  { %3005 = vmatmul.mubr.bf16.vlgmr.msra.gmra.mrb[12].mxu1 %v5447_v35 }
 0x4a6   :  { %v5459_v41 = vpop.f32.mrb[8].mxu0  ;;  %v5461_v47 = vpop.f32.mrb[8].mxu1 }
 0x4a7   :  { %v3015_v48 = vmul.f32 %v5317_v43, %v5459_v41  ;;  %v3017_v49 = vmul.f32 %v5317_v43, %v5461_v47  ;;  %v5467_v51 = vpop.f32.mrb[9].mxu0  ;;  %v5469_v52 = vpop.f32.mrb[9].mxu1 }
 0x4a8   :  { %v3016_v55 = vmul.f32 %v5317_v43, %v5467_v51  ;;  %v3018_v35 = vmul.f32 %v5317_v43, %v5469_v52  ;;  %v2764_v56 = vpop.f32.mrb[10].mxu0  ;;  %v2846_v57 = vpop.f32.mrb[10].mxu1 }
 0x4a9   :  { %v3023_v58 = vrot.slane %v3015_v48, 4  ;;  %v3079_v59 = vmul.f32 %v3015_v48, %v5459_v41  ;;  %v3035_v54 = vrot.slane %v3017_v49, 4  ;;  %v3081_v60 = vmul.f32 %v3017_v49, %v5461_v47  ;;  %v2765_v62 = vpop.f32.mrb[11].mxu0  ;;  %v2847_v63 = vpop.f32.mrb[11].mxu1 }
 0x4aa   :  { %v3029_v1 = vrot.slane %v3016_v55, 4  ;;  %v3080_v2 = vmul.f32 %v3016_v55, %v5467_v51  ;;  %v3041_v3 = vrot.slane %v3018_v35, 4  ;;  %v3082_v61 = vmul.f32 %v3018_v35, %v5469_v52 }
 0x4ab   :  { %v3024_v46 = vadd.f32 %v3023_v58, %v3015_v48  ;;  %v3087_v9 = vrot.slane %v3079_v59, 4  ;;  %v3036_v12 = vadd.f32 %v3035_v54, %v3017_v49  ;;  %v3099_v4 = vrot.slane %v3081_v60, 4 }
 0x4ac   :  { %v3030_v44 = vadd.f32 %v3029_v1, %v3016_v55  ;;  %v3093_v5 = vrot.slane %v3080_v2, 4  ;;  %v3042_v6 = vadd.f32 %v3041_v3, %v3018_v35  ;;  %v3105_v7 = vrot.slane %v3082_v61, 4 }
 0x4ad   :  { %v3025_v8 = vrot.slane %v3024_v46, 2  ;;  %v3088_v13 = vadd.f32 %v3087_v9, %v3079_v59  ;;  %v3037_v33 = vrot.slane %v3036_v12, 2  ;;  %v3100_v34 = vadd.f32 %v3099_v4, %v3081_v60 }
 0x4ae   :  { %v3031_v36 = vrot.slane %v3030_v44, 2  ;;  %v3094_v38 = vadd.f32 %v3093_v5, %v3080_v2  ;;  %v3043_v16 = vrot.slane %v3042_v6, 2  ;;  %v3106_v18 = vadd.f32 %v3105_v7, %v3082_v61 }
 0x4af   :  { %v3026_v39 = vadd.f32 %v3025_v8, %v3024_v46  ;;  %v3089_v37 = vrot.slane %v3088_v13, 2  ;;  %v3038_v17 = vadd.f32 %v3037_v33, %v3036_v12  ;;  %v3101_v19 = vrot.slane %v3100_v34, 2 }
 0x4b0   :  { %v3032_v11 = vadd.f32 %v3031_v36, %v3030_v44  ;;  %v3095_v20 = vrot.slane %v3094_v38, 2  ;;  %v3044_v21 = vadd.f32 %v3043_v16, %v3042_v6  ;;  %v3107_v23 = vrot.slane %v3106_v18, 2  ;;  %v4792_v36 = vld [vmem:[#allocation15 + $0x40] sm:$0xff]  }
 0x4b1   :  { %v3027_v25 = vrot.slane %v3026_v39, 1  ;;  %v3090_v26 = vadd.f32 %v3089_v37, %v3088_v13  ;;  %v3039_v27 = vrot.slane %v3038_v17, 1  ;;  %v3102_v28 = vadd.f32 %v3101_v19, %v3100_v34  ;;  %v5482_v34 = vld [vmem:[%s5609_s10] sm:$0xff]  ;;  %4537 = vmatprep.subr.bf16.mxu0 %v4792_v36  ;;  %v4823_v36 = vld [vmem:[#allocation15 + $0xb8] sm:$0xff]  }
 0x4b2   :  { %v3033_v29 = vrot.slane %v3032_v11, 1  ;;  %v3096_v30 = vadd.f32 %v3095_v20, %v3094_v38  ;;  %v3045_v31 = vrot.slane %v3044_v21, 1  ;;  %v3108_v32 = vadd.f32 %v3107_v23, %v3106_v18  ;;  %v4793_v38 = vld [vmem:[#allocation15 + $0xc0] sm:$0xff]   ;;  %v4796_v19 = vld [vmem:[#allocation15 + $0x48] sm:$0xff]  }
 0x4b3   :  { %v3028_v40 = vadd.f32 %v3027_v25, %v3026_v39  ;;  %v3091_v50 = vrot.slane %v3090_v26, 1  ;;  %v3040_v10 = vadd.f32 %v3039_v27, %v3038_v17  ;;  %v3103_v14 = vrot.slane %v3102_v28, 1  ;;  %v4794_v16 = vld [vmem:[#allocation15] sm:$0xff]   ;;  %4559 = vmatprep.subr.bf16.mxu1 %v4793_v38  ;;  %v4798_v23 = vld [vmem:[#allocation15 + $0x8] sm:$0xff]  }
 0x4b4   :  { %v3034_v15 = vadd.f32 %v3033_v29, %v3032_v11  ;;  %v3097_v48 = vrot.slane %v3096_v30, 1  ;;  %v3046_v49 = vadd.f32 %v3045_v31, %v3044_v21  ;;  %v3109_v55 = vrot.slane %v3108_v32, 1  ;;  %v4795_v18 = vld [vmem:[#allocation15 + $0x80] sm:$0xff]   ;;  %4538 = vmatpush3.bf16.msra.mxu0 %v4794_v16  ;;  %v4797_v11 = vld [vmem:[#allocation15 + $0xc8] sm:$0xff]  }
 0x4b5   :  { %v3071_v35 = vmul.f32 0.25, %v3028_v40  ;;  %v3092_v56 = vadd.f32 %v3091_v50, %v3090_v26  ;;  %v3073_v57 = vmul.f32 0.25, %v3040_v10  ;;  %v3104_v58 = vadd.f32 %v3103_v14, %v3102_v28  ;;  %4560 = vmatpush3.bf16.msra.mxu1 %v4795_v18  ;;  %v4799_v25 = vld [vmem:[#allocation15 + $0x88] sm:$0xff]   ;;  %4539 = vmatprep.subr.bf16.mxu0 %v4796_v19  ;;  %v4800_v40 = vld [vmem:[#allocation15 + $0x50] sm:$0xff]   ;;  %v4824_v38 = vld [vmem:[#allocation15 + $0x140] sm:$0xff]  }
 0x4b6   :  { %v3072_v59 = vmul.f32 0.25, %v3034_v15  ;;  %v3098_v54 = vadd.f32 %v3097_v48, %v3096_v30  ;;  %v3074_v60 = vmul.f32 0.25, %v3046_v49  ;;  %v3110_v62 = vadd.f32 %v3109_v55, %v3108_v32  ;;  %4561 = vmatprep.subr.bf16.mxu1 %v4797_v11  ;;  %v4801_v50 = vld [vmem:[#allocation15 + $0xd0] sm:$0xff]   ;;  %v4825_v16 = vld [vmem:[#allocation15 + $0x1c0] sm:$0xff]  }
 0x4b7   :  { %v3135_v63 = vmul.f32 0.25, %v3092_v56  ;;  %v3143_v1 = vmul.f32 %v3071_v35, %v3071_v35  ;;  %v3137_v2 = vmul.f32 0.25, %v3104_v58  ;;  %v3145_v3 = vmul.f32 %v3073_v57, %v3073_v57  ;;  %v4802_v15 = vld [vmem:[#allocation15 + $0x10] sm:$0xff]   ;;  %v4805_v58 = vld [vmem:[#allocation15 + $0xd8] sm:$0xff]  }
 0x4b8   :  { %v3136_v61 = vmul.f32 0.25, %v3098_v54  ;;  %v3144_v46 = vmul.f32 %v3072_v59, %v3072_v59  ;;  %v3138_v9 = vmul.f32 0.25, %v3110_v62  ;;  %v3146_v12 = vmul.f32 %v3074_v60, %v3074_v60  ;;  %4540 = vmatpush3.bf16.msra.mxu0 %v4798_v23  ;;  %v4803_v48 = vld [vmem:[#allocation15 + $0x90] sm:$0xff]   ;;  %v4806_v62 = vld [vmem:[#allocation15 + $0x18] sm:$0xff]  }
 0x4b9   :  { %v3151_v4 = vsub.f32 %v3135_v63, %v3143_v1  ;;  %v3153_v44 = vsub.f32 %v3137_v2, %v3145_v3  ;;  %v3179_v39 = vrot.slane %v5482_v34, %v5330_v22  ;;  %v3187_v37 = vrot.slane %v5482_v34, %v5397_v53  ;;  %4562 = vmatpush3.bf16.msra.mxu1 %v4799_v25  ;;  %v4807_v63 = vld [vmem:[#allocation15 + $0x98] sm:$0xff]   ;;  %v4810_v3 = vld [vmem:[#allocation15 + $0x20] sm:$0xff]  }
 0x4ba   :  { %v3152_v5 = vsub.f32 %v3136_v61, %v3144_v46  ;;  %v3154_v6 = vsub.f32 %v3138_v9, %v3146_v12  ;;  %v3183_v17 = vrot.slane %v5482_v34, %v5336_v24  ;;  %v3191_v21 = vrot.slane %v5482_v34, %v5400_v0  ;;  %4541 = vmatprep.subr.bf16.mxu0 %v4800_v40  ;;  %v4811_v61 = vld [vmem:[#allocation15 + $0xa0] sm:$0xff]   ;;  %v4812_v46 = vld [vmem:[#allocation15 + $0x68] sm:$0xff]  }
 0x4bb   :  { %v3159_v7 = vadd.f32 0.8, %v3151_v4  ;;  %v3161_v8 = vadd.f32 0.8, %v3153_v44  ;;  %4563 = vmatprep.subr.bf16.mxu1 %v4801_v50  ;;  %v4813_v9 = vld [vmem:[#allocation15 + $0xe8] sm:$0xff]   ;;  %v4816_v44 = vld [vmem:[#allocation15 + $0x70] sm:$0xff]  }
 0x4bc   :  { %v3160_v13 = vadd.f32 0.8, %v3152_v5  ;;  %v3162_v33 = vadd.f32 0.8, %v3154_v6  ;;  %4542 = vmatpush3.bf16.msra.mxu0 %v4802_v15  ;;  %v4814_v12 = vld [vmem:[#allocation15 + $0x28] sm:$0xff]   ;;  %v4817_v5 = vld [vmem:[#allocation15 + $0xf0] sm:$0xff]  }
 0x4bd   :  { %4868 = vrsqrt.f32 %v3159_v7  ;;  %4564 = vmatpush3.bf16.msra.mxu1 %v4803_v48  ;;  %v4815_v4 = vld [vmem:[#allocation15 + $0xa8] sm:$0xff]   ;;  %v4818_v6 = vld [vmem:[#allocation15 + $0x30] sm:$0xff]  }
 0x4be   :  { %4870 = vrsqrt.f32 %v3161_v8  ;;  %4565 = vmatprep.subr.bf16.mxu1 %v4805_v58  ;;  %v4819_v7 = vld [vmem:[#allocation15 + $0xb0] sm:$0xff]   ;;  %v4820_v8 = vld [vmem:[#allocation15 + $0x78] sm:$0xff]  }
 0x4bf   :  { %4872 = vrsqrt.f32 %v3160_v13  ;;  %v4821_v13 = vld [vmem:[#allocation15 + $0xf8] sm:$0xff]  }
 0x4c0   :  { %4874 = vrsqrt.f32 %v3162_v33  ;;  %v4822_v33 = vld [vmem:[#allocation15 + $0x38] sm:$0xff]  }
 0x4c1   :  { %4566 = vmatpush3.bf16.msra.mxu1 %v4807_v63 }
 0x4c7   :  { %v4869_v20 = vpop.eup %4868 }
 0x4c8   :  { %v4871_v26 = vpop.eup %4870  ;;  %v5492_v27 = vmul.f32 %v4869_v20, %v3179_v39 }
 0x4c9   :  { %v4873_v28 = vpop.eup %4872  ;;  %v5494_v29 = vmul.f32 %v4871_v26, %v3187_v37 }
 0x4ca   :  { %v4875_v30 = vpop.eup %4874  ;;  %v3224_v31 = vmul.f32 %v5492_v27, %v3071_v35  ;;  %v5497_v32 = vmul.f32 %v4873_v28, %v3183_v17  ;;  %v4804_v35 = vld [vmem:[#allocation15 + $0x58] sm:$0xff]  }
 0x4cb   :  { %v3226_v10 = vmul.f32 %v5494_v29, %v3073_v57  ;;  %v5500_v14 = vmul.f32 %v4875_v30, %v3191_v21  ;;  %4543 = vmatprep.subr.bf16.mxu0 %v4804_v35 }
 0x4cc   :  { %v3225_v49 = vmul.f32 %v5497_v32, %v3072_v59  ;;  %4544 = vmatpush3.bf16.msra.mxu0 %v4806_v62  ;;  %v4808_v59 = vld [vmem:[#allocation15 + $0x60] sm:$0xff]  }
 0x4cd   :  { %v3227_v55 = vmul.f32 %v5500_v14, %v3074_v60  ;;  %v4809_v60 = vld [vmem:[#allocation15 + $0xe0] sm:$0xff]   ;;  %4545 = vmatprep.subr.bf16.mxu0 %v4808_v59 }
 0x4ce   :  { %v3240_v56 = vcombine.low %v3224_v31, %v3225_v49  ;;  %4567 = vmatprep.subr.bf16.mxu1 %v4809_v60 }
 0x4cf   :  { %v3241_v54 = vcombine.low %v3226_v10, %v3227_v55  ;;  %4568 = vmatpush3.bf16.msra.mxu1 %v4811_v61 }
 0x4d0   :  { %v5505_v57 = vrot.slane %v3240_v56, %v5341_v45  ;;  %4546 = vmatpush3.bf16.msra.mxu0 %v4810_v3  ;;  %4569 = vmatprep.subr.bf16.mxu1 %v4813_v9 }
 0x4d1   :  { %v5508_v1 = vrot.slane %v3241_v54, %v5341_v45  ;;  %4547 = vmatprep.subr.bf16.mxu0 %v4812_v46 }
 0x4d3   :  { %v3272_v2 = vcombine.low %v5505_v57, %v5508_v1  ;;  %4570 = vmatpush3.bf16.msra.mxu1 %v4815_v4 }
 0x4d4   :  { %4548 = vmatpush3.bf16.msra.mxu0 %v4814_v12  ;;  %4571 = vmatprep.subr.bf16.mxu1 %v4817_v5 }
 0x4d5   :  { %4549 = vmatprep.subr.bf16.mxu0 %v4816_v44 }
 0x4d7   :  { %4572 = vmatpush3.bf16.msra.mxu1 %v4819_v7 }
 0x4d8   :  { %4550 = vmatpush3.bf16.msra.mxu0 %v4818_v6  ;;  %4573 = vmatprep.subr.bf16.mxu1 %v4821_v13 }
 0x4d9   :  { %4551 = vmatprep.subr.bf16.mxu0 %v4820_v8 }
 0x4db   :  { %4574 = vmatpush3.bf16.msra.mxu1 %v4823_v36 }
 0x4dc   :  { %4552 = vmatpush3.bf16.msra.mxu0 %v4822_v33  ;;  %4603 = vmatprep.subr.bf16.mxu1 %v4825_v16 }
 0x4dd   :  { %4581 = vmatprep.subr.bf16.mxu0 %v4824_v38 }
 0x526   :  { %v5512_v18 = vpop.f32.mrb[12].mxu0 }
 0x527   :  { %v3019_v39 = vmul.f32 %v5317_v43, %v5512_v18  ;;  %v5516_v37 = vpop.f32.mrb[12].mxu1  ;;  %v5518_v17 = vpop.f32.mrb[13].mxu0 }
 0x528   :  { %v3021_v19 = vmul.f32 %v5317_v43, %v5516_v37  ;;  %v3020_v11 = vmul.f32 %v5317_v43, %v5518_v17  ;;  %v5524_v20 = vpop.f32.mrb[13].mxu1  ;;  %v2928_v21 = vpop.f32.mrb[14].mxu0 }
 0x529   :  { %v3047_v23 = vrot.slane %v3019_v39, 4  ;;  %v3083_v25 = vmul.f32 %v3019_v39, %v5512_v18  ;;  %v3022_v26 = vmul.f32 %v5317_v43, %v5524_v20  ;;  %v3010_v28 = vpop.f32.mrb[14].mxu1  ;;  %v2929_v30 = vpop.f32.mrb[15].mxu0 }
 0x52a   :  { %v3059_v31 = vrot.slane %v3021_v19, 4  ;;  %v3085_v40 = vmul.f32 %v3021_v19, %v5516_v37  ;;  %v3053_v50 = vrot.slane %v3020_v11, 4  ;;  %v3084_v10 = vmul.f32 %v3020_v11, %v5518_v17  ;;  %v3011_v15 = vpop.f32.mrb[15].mxu1 }
 0x52b   :  { %v3048_v48 = vadd.f32 %v3047_v23, %v3019_v39  ;;  %v3111_v49 = vrot.slane %v3083_v25, 4  ;;  %v3065_v55 = vrot.slane %v3022_v26, 4  ;;  %v3086_v56 = vmul.f32 %v3022_v26, %v5524_v20 }
 0x52c   :  { %v3060_v35 = vadd.f32 %v3059_v31, %v3021_v19  ;;  %v3123_v58 = vrot.slane %v3085_v40, 4  ;;  %v3054_v54 = vadd.f32 %v3053_v50, %v3020_v11  ;;  %v3117_v62 = vrot.slane %v3084_v10, 4 }
 0x52d   :  { %v3049_v63 = vrot.slane %v3048_v48, 2  ;;  %v3112_v43 = vadd.f32 %v3111_v49, %v3083_v25  ;;  %v3066_v59 = vadd.f32 %v3065_v55, %v3022_v26  ;;  %v3129_v60 = vrot.slane %v3086_v56, 4 }
 0x52e   :  { %v3061_v3 = vrot.slane %v3060_v35, 2  ;;  %v3124_v61 = vadd.f32 %v3123_v58, %v3085_v40  ;;  %v3055_v46 = vrot.slane %v3054_v54, 2  ;;  %v3118_v9 = vadd.f32 %v3117_v62, %v3084_v10 }
 0x52f   :  { %v3050_v12 = vadd.f32 %v3049_v63, %v3048_v48  ;;  %v3113_v4 = vrot.slane %v3112_v43, 2  ;;  %v3067_v44 = vrot.slane %v3066_v59, 2  ;;  %v3130_v5 = vadd.f32 %v3129_v60, %v3086_v56 }
 0x530   :  { %v3062_v6 = vadd.f32 %v3061_v3, %v3060_v35  ;;  %v3125_v7 = vrot.slane %v3124_v61, 2  ;;  %v3056_v8 = vadd.f32 %v3055_v46, %v3054_v54  ;;  %v3119_v13 = vrot.slane %v3118_v9, 2 }
 0x531   :  { %v3051_v33 = vrot.slane %v3050_v12, 1  ;;  %v3114_v36 = vadd.f32 %v3113_v4, %v3112_v43  ;;  %v3068_v38 = vadd.f32 %v3067_v44, %v3066_v59  ;;  %v3131_v16 = vrot.slane %v3130_v5, 2 }
 0x532   :  { %v3063_v39 = vrot.slane %v3062_v6, 1  ;;  %v3126_v19 = vadd.f32 %v3125_v7, %v3124_v61  ;;  %v3057_v11 = vrot.slane %v3056_v8, 1  ;;  %v3120_v21 = vadd.f32 %v3119_v13, %v3118_v9 }
 0x533   :  { %v3052_v23 = vadd.f32 %v3051_v33, %v3050_v12  ;;  %v3115_v25 = vrot.slane %v3114_v36, 1  ;;  %v3069_v26 = vrot.slane %v3068_v38, 1  ;;  %v3132_v28 = vadd.f32 %v3131_v16, %v3130_v5 }
 0x534   :  { %v3064_v30 = vadd.f32 %v3063_v39, %v3062_v6  ;;  %v3127_v31 = vrot.slane %v3126_v19, 1  ;;  %v3058_v40 = vadd.f32 %v3057_v11, %v3056_v8  ;;  %v3121_v50 = vrot.slane %v3120_v21, 1 }
 0x535   :  { %v3075_v10 = vmul.f32 0.25, %v3052_v23  ;;  %v3116_v15 = vadd.f32 %v3115_v25, %v3114_v36  ;;  %v3070_v48 = vadd.f32 %v3069_v26, %v3068_v38  ;;  %v3133_v49 = vrot.slane %v3132_v28, 1 }
 0x536   :  { %v3077_v55 = vmul.f32 0.25, %v3064_v30  ;;  %v3128_v56 = vadd.f32 %v3127_v31, %v3126_v19  ;;  %v3076_v35 = vmul.f32 0.25, %v3058_v40  ;;  %v3122_v58 = vadd.f32 %v3121_v50, %v3120_v21 }
 0x537   :  { %v3139_v54 = vmul.f32 0.25, %v3116_v15  ;;  %v3147_v62 = vmul.f32 %v3075_v10, %v3075_v10  ;;  %v3078_v63 = vmul.f32 0.25, %v3070_v48  ;;  %v3134_v43 = vadd.f32 %v3133_v49, %v3132_v28 }
 0x538   :  { %v3141_v59 = vmul.f32 0.25, %v3128_v56  ;;  %v3149_v60 = vmul.f32 %v3077_v55, %v3077_v55  ;;  %v3140_v3 = vmul.f32 0.25, %v3122_v58  ;;  %v3148_v61 = vmul.f32 %v3076_v35, %v3076_v35 }
 0x539   :  { %v3155_v46 = vsub.f32 %v3139_v54, %v3147_v62  ;;  %v3142_v9 = vmul.f32 0.25, %v3134_v43  ;;  %v3150_v12 = vmul.f32 %v3078_v63, %v3078_v63  ;;  %v3194_v33 = vsub.s32 4, %v5313_v42 }
 0x53a   :  { %v3157_v4 = vsub.f32 %v3141_v59, %v3149_v60  ;;  %v3156_v44 = vsub.f32 %v3140_v3, %v3148_v61  ;;  %v3202_v36 = vsub.s32 6, %v5313_v42  ;;  %v3198_v38 = vsub.s32 5, %v5313_v42 }
 0x53b   :  { %v3163_v5 = vadd.f32 0.8, %v3155_v46  ;;  %v3158_v6 = vsub.f32 %v3142_v9, %v3150_v12  ;;  %v3206_v16 = vsub.s32 7, %v5313_v42  ;;  %v3195_v39 = vrot.slane %v5482_v34, %v3194_v33 }
 0x53c   :  { %v3165_v7 = vadd.f32 0.8, %v3157_v4  ;;  %v3164_v8 = vadd.f32 0.8, %v3156_v44  ;;  %v3203_v19 = vrot.slane %v5482_v34, %v3202_v36  ;;  %v3199_v11 = vrot.slane %v5482_v34, %v3198_v38 }
 0x53d   :  { %4876 = vrsqrt.f32 %v3163_v5  ;;  %v3166_v13 = vadd.f32 0.8, %v3158_v6  ;;  %v3207_v23 = vrot.slane %v5482_v34, %v3206_v16  ;;  %v3294_v34 = vrot.slane %v5492_v27, %v5330_v22 }
 0x53e   :  { %4878 = vrsqrt.f32 %v3165_v7  ;;  %v3302_v59 = vrot.slane %v5494_v29, %v5330_v22  ;;  %v3014_v29 = vld [vmem:[%s5610_s11] sm:$0xff] }
 0x53f   :  { %4880 = vrsqrt.f32 %v3164_v8  ;;  %v3323_v57 = vmul.f32 %v3294_v34, %v5459_v41  ;;  %v4835_v34 = vld [vmem:[#allocation15 + $0x190] sm:$0xff]  }
 0x540   :  { %4882 = vrsqrt.f32 %v3166_v13  ;;  %v3325_v1 = vmul.f32 %v3302_v59, %v5461_v47  ;;  %v4836_v59 = vld [vmem:[#allocation15 + $0x158] sm:$0xff]  }
 0x547   :  { %v4877_v21 = vpop.eup %4876 }
 0x548   :  { %v4879_v25 = vpop.eup %4878  ;;  %v3220_v26 = vmul.f32 %v4877_v21, %v3195_v39 }
 0x549   :  { %v4881_v28 = vpop.eup %4880  ;;  %v3222_v30 = vmul.f32 %v4879_v25, %v3203_v19  ;;  %v4826_v25 = vld [vmem:[#allocation15 + $0x100] sm:$0xff]  }
 0x54a   :  { %v4883_v31 = vpop.eup %4882  ;;  %v3228_v40 = vmul.f32 %v3220_v26, %v3075_v10  ;;  %v3221_v50 = vmul.f32 %v4881_v28, %v3199_v11  ;;  %v3298_v10 = vrot.slane %v5497_v32, %v5330_v22  ;;  %v3310_v60 = vrot.slane %v3220_v26, %v5330_v22  ;;  %v4827_v26 = vld [vmem:[#allocation15 + $0x180] sm:$0xff]  }
 0x54b   :  { %v3230_v15 = vmul.f32 %v3222_v30, %v3077_v55  ;;  %v3223_v48 = vmul.f32 %v4883_v31, %v3207_v23  ;;  %v3280_v55 = vrot.slane %v3272_v2, %v5341_v45  ;;  %v3318_v27 = vrot.slane %v3222_v30, %v5330_v22 }
 0x54c   :  { %v3229_v49 = vmul.f32 %v3221_v50, %v3076_v35  ;;  %v3306_v35 = vrot.slane %v5500_v14, %v5330_v22  ;;  %v3314_v3 = vrot.slane %v3221_v50, %v5330_v22  ;;  %v3324_v14 = vmul.f32 %v3298_v10, %v5467_v51  ;;  %v4837_v10 = vld [vmem:[#allocation15 + $0x1d8] sm:$0xff]  }
 0x54d   :  { %v3231_v42 = vmul.f32 %v3223_v48, %v3078_v63  ;;  %v3322_v32 = vrot.slane %v3223_v48, %v5330_v22  ;;  %v3327_v46 = vmul.f32 %v3310_v60, %v5512_v18  ;;  %v3329_v9 = vmul.f32 %v3318_v27, %v5516_v37  ;;  %v4841_v60 = vld [vmem:[#allocation15 + $0x1e0] sm:$0xff]  }
 0x54e   :  { %v3242_v56 = vcombine.low %v3228_v40, %v3229_v49  ;;  %v3328_v12 = vmul.f32 %v3314_v3, %v5518_v17  ;;  %v4828_v40 = vld [vmem:[#allocation15 + $0x148] sm:$0xff]   ;;  %v4842_v27 = vld [vmem:[#allocation15 + $0x120] sm:$0xff]  }
 0x54f   :  { %v3243_v58 = vcombine.low %v3230_v15, %v3231_v42  ;;  %v3330_v4 = vmul.f32 %v3322_v32, %v5524_v20  ;;  %v4829_v15 = vld [vmem:[#allocation15 + $0x1c8] sm:$0xff]   ;;  %v4843_v3 = vld [vmem:[#allocation15 + $0x1a0] sm:$0xff]  }
 0x550   :  { %v3264_v54 = vrot.slane %v3242_v56, %v5341_v45  ;;  %v4830_v42 = vld [vmem:[#allocation15 + $0x108] sm:$0xff]  }
 0x551   :  { %v3271_v62 = vrot.slane %v3243_v58, %v5341_v45  ;;  %v4831_v56 = vld [vmem:[#allocation15 + $0x188] sm:$0xff]  }
 0x552   :  { %v4845_v32 = vld [vmem:[#allocation15 + $0x1e8] sm:$0xff]  }
 0x553   :  { %v3273_v43 = vcombine.low %v3264_v54, %v3271_v62  ;;  %v4832_v54 = vld [vmem:[#allocation15 + $0x150] sm:$0xff]  }
 0x554   :  { %v4833_v62 = vld [vmem:[#allocation15 + $0x1d0] sm:$0xff]  }
 0x555   :  { %v3287_v63 = vrot.slane %v3273_v43, %v5341_v45  ;;  %v3326_v45 = vmul.f32 %v3306_v35, %v5469_v52  ;;  %v4834_v43 = vld [vmem:[#allocation15 + $0x110] sm:$0xff]   ;;  %v4839_v35 = vld [vmem:[#allocation15 + $0x198] sm:$0xff]  }
 0x557   :  { %v3288_v61 = vcombine.low %v3280_v55, %v3287_v63  ;;  %v4838_v55 = vld [vmem:[#allocation15 + $0x118] sm:$0xff]   ;;  %v4840_v63 = vld [vmem:[#allocation15 + $0x160] sm:$0xff]  }
 0x559   :  { %v3290_v2 = vsub.f32 %v3014_v29, %v3288_v61  ;;  %v4844_v29 = vld [vmem:[#allocation15 + $0x168] sm:$0xff]  }
 0x55a   :  { %v4846_v61 = vld [vmem:[#allocation15 + $0x128] sm:$0xff]  }
 0x55b   :  { %v3363_v44 = vrot.slane %v3290_v2, %v3206_v16  ;;  %v3339_v5 = vrot.slane %v3290_v2, %v5336_v24  ;;  %v3347_v41 = vrot.slane %v3290_v2, %v5400_v0  ;;  %v3335_v47 = vrot.slane %v3290_v2, %v5330_v22 }
 0x55c   :  { %v3343_v51 = vrot.slane %v3290_v2, %v5397_v53  ;;  %v3355_v6 = vrot.slane %v3290_v2, %v3198_v38  ;;  %v3351_v52 = vrot.slane %v3290_v2, %v3194_v33  ;;  %v3359_v7 = vrot.slane %v3290_v2, %v3202_v36  ;;  %v4851_v2 = vld [vmem:[#allocation15 + $0x1b0] sm:$0xff]  }
 0x55d   :  { %v3379_v8 = vadd.f32 %v3363_v44, %v3330_v4  ;;  %v3373_v18 = vadd.f32 %v3339_v5, %v3324_v14  ;;  %v3375_v13 = vadd.f32 %v3347_v41, %v3326_v45  ;;  %v3372_v37 = vadd.f32 %v3335_v47, %v3323_v57  ;;  %v4847_v57 = vld [vmem:[#allocation15 + $0x1a8] sm:$0xff]   ;;  %v4849_v14 = vld [vmem:[#allocation15 + $0x1f0] sm:$0xff]   ;;  %v4854_v44 = vld [vmem:[#allocation15 + $0x138] sm:$0xff]  }
 0x55e   :  { %v3374_v39 = vadd.f32 %v3343_v51, %v3325_v1  ;;  %v3377_v17 = vadd.f32 %v3355_v6, %v3328_v12  ;;  %v5574_v19 = vadd.f32 %v3351_v52, %v3327_v46  ;;  %v5576_v20 = vadd.f32 %v3359_v7, %v3329_v9  ;;  %v4848_v1 = vld [vmem:[#allocation15 + $0x170] sm:$0xff]   ;;  %v4852_v46 = vld [vmem:[#allocation15 + $0x178] sm:$0xff]  }
 0x55f   :  { %vm3381_vm11 = vcmp.ge.f32.partialorder %v3373_v18, 0.0  ;;  %v3389_v24 = vmul.f32 0.2, %v3373_v18  ;;  %vm3383_vm12 = vcmp.ge.f32.partialorder %v3375_v13, 0.0  ;;  %v3391_v0 = vmul.f32 0.2, %v3375_v13 }
 0x560   :  { %vm3380_vm13 = vcmp.ge.f32.partialorder %v3372_v37, 0.0  ;;  %v3388_v22 = vmul.f32 0.2, %v3372_v37  ;;  %vm3382_vm14 = vcmp.ge.f32.partialorder %v3374_v39, 0.0  ;;  %v3390_v53 = vmul.f32 0.2, %v3374_v39 }
 0x561   :  { %v3397_v33 = vsel %vm3381_vm11, %v3373_v18, %v3389_v24  ;;  %v3399_v36 = vsel %vm3383_vm12, %v3375_v13, %v3391_v0  ;;  %vm3385_vm15 = vcmp.ge.f32.partialorder %v3377_v17, 0.0  ;;  %v3393_v38 = vmul.f32 0.2, %v3377_v17  ;;  %v4850_v45 = vld [vmem:[#allocation15 + $0x130] sm:$0xff]   ;;  %v4853_v9 = vld [vmem:[#allocation15 + $0x1f8] sm:$0xff]  }
 0x562   :  { %v3421_v16 = vpack.c.bf16 %v3397_v33, %v3397_v33  ;;  %v3423_v11 = vpack.c.bf16 %v3399_v36, %v3399_v36  ;;  %v3396_v21 = vsel %vm3380_vm13, %v3372_v37, %v3388_v22  ;;  %v3398_v23 = vsel %vm3382_vm14, %v3374_v39, %v3390_v53  ;;  %v4855_v5 = vld [vmem:[#allocation15 + $0x1b8] sm:$0xff]  }
 0x563   :  { %v3420_v28 = vpack.c.bf16 %v3396_v21, %v3396_v21  ;;  %v3422_v30 = vpack.c.bf16 %v3398_v23, %v3398_v23  ;;  %v3401_v31 = vsel %vm3385_vm15, %v3377_v17, %v3393_v38  ;;  %vm3387_vm0 = vcmp.ge.f32.partialorder %v3379_v8, 0.0 }
 0x564   :  { %3979 = vmatprep.mubr.bf16.mxu0 %v3421_v16  ;;  %4019 = vmatprep.mubr.bf16.mxu1 %v3423_v11  ;;  %v3395_v50 = vmul.f32 0.2, %v3379_v8  ;;  %v3425_v48 = vpack.c.bf16 %v3401_v31, %v3401_v31  ;;  %v3392_v12 = vmul.f32 0.2, %v5574_v19  ;;  %v3394_v4 = vmul.f32 0.2, %v5576_v20 }
 0x565   :  { %3980 = vmatmul.mubr.bf16.vlgmr.msra.gmra.mrb[16].mxu0 %v3420_v28  ;;  %4020 = vmatmul.mubr.bf16.vlgmr.msra.gmra.mrb[16].mxu1 %v3422_v30  ;;  %vm3384_vm1 = vcmp.ge.f32.partialorder %v5574_v19, 0.0  ;;  %vm3386_vm2 = vcmp.ge.f32.partialorder %v5576_v20, 0.0 }
 0x566   :  { %4582 = vmatpush3.bf16.msra.mxu0 %v4826_v25  ;;  %4604 = vmatpush3.bf16.msra.mxu1 %v4827_v26  ;;  %v3403_v49 = vsel %vm3387_vm0, %v3379_v8, %v3395_v50  ;;  %v3400_v41 = vsel %vm3384_vm1, %v5574_v19, %v3392_v12  ;;  %v3402_v47 = vsel %vm3386_vm2, %v5576_v20, %v3394_v4  ;;  %v4469_v8 = vld [vmem:[%s5612_s13] ss:$0 sm:$0xff]  ;;  %s5116_s13 = smov [#allocation17]  }
 0x567   :  { %4059 = vmatprep.mubr.bf16.mxu0 %v3425_v48  ;;  %v3427_v58 = vpack.c.bf16 %v3403_v49, %v3403_v49  ;;  %4583 = vmatprep.subr.bf16.mxu0 %v4828_v40  ;;  %v3424_v51 = vpack.c.bf16 %v3400_v41, %v3400_v41  ;;  %v3426_v6 = vpack.c.bf16 %v3402_v47, %v3402_v47  ;;  %s4115_s27 = sshll.u32 %s5116_s13, 4  ;;  %s4116_s27 = int_to_ptr.vmem [resolvable:$true] %s4115_s27 }
 0x568   :  { %4605 = vmatprep.subr.bf16.mxu1 %v4829_v15  ;;  %s5062_s5 = scalar_lea.vmem %s4116_s27, 128  ;;  %p5067_p9 = scmp.lt.s32.totalorder %s4116_s27, %s4116_s27 }
 0x569   :  { %4099 = vmatprep.mubr.bf16.mxu1 %v3427_v58  ;;  %p5063_p8 = scmp.ne.s32.totalorder %s4116_s27, %s5062_s5  ;;  %p5068_p10 = scmp.lt.s32.totalorder %s5062_s5, %s5062_s5 }
 0x56a   :  { %4584 = vmatpush3.bf16.msra.mxu0 %v4830_v42  ;;  %4606 = vmatpush3.bf16.msra.mxu1 %v4831_v56 }
 0x56b   :  { %4585 = vmatprep.subr.bf16.mxu0 %v4832_v54  ;;  %4607 = vmatprep.subr.bf16.mxu1 %v4833_v62  ;;  %p5069_p11 = por %p5068_p10, %p5067_p9 }
 0x56d   :  { %p5070_p12 = pnand %p5069_p11, %p5063_p8 }
 0x56e   :  { %4586 = vmatpush3.bf16.msra.mxu0 %v4834_v43  ;;  %4608 = vmatpush3.bf16.msra.mxu1 %v4835_v34 }
 0x56f   :  { %4587 = vmatprep.subr.bf16.mxu0 %v4836_v59  ;;  %4609 = vmatprep.subr.bf16.mxu1 %v4837_v10 }
 0x572   :  { %4588 = vmatpush3.bf16.msra.mxu0 %v4838_v55  ;;  %4610 = vmatpush3.bf16.msra.mxu1 %v4839_v35 }
 0x573   :  { %4589 = vmatprep.subr.bf16.mxu0 %v4840_v63  ;;  %4611 = vmatprep.subr.bf16.mxu1 %v4841_v60 }
 0x576   :  { %4590 = vmatpush3.bf16.msra.mxu0 %v4842_v27  ;;  %4612 = vmatpush3.bf16.msra.mxu1 %v4843_v3 }
 0x577   :  { %4591 = vmatprep.subr.bf16.mxu0 %v4844_v29  ;;  %4613 = vmatprep.subr.bf16.mxu1 %v4845_v32 }
 0x57a   :  { %4592 = vmatpush3.bf16.msra.mxu0 %v4846_v61  ;;  %4614 = vmatpush3.bf16.msra.mxu1 %v4847_v57 }
 0x57b   :  { %4593 = vmatprep.subr.bf16.mxu0 %v4848_v1  ;;  %4615 = vmatprep.subr.bf16.mxu1 %v4849_v14 }
 0x57e   :  { %4594 = vmatpush3.bf16.msra.mxu0 %v4850_v45  ;;  %4616 = vmatpush3.bf16.msra.mxu1 %v4851_v2 }
 0x57f   :  { %4595 = vmatprep.subr.bf16.mxu0 %v4852_v46  ;;  %4617 = vmatprep.subr.bf16.mxu1 %v4853_v9 }
 0x582   :  { %4596 = vmatpush3.bf16.msra.mxu0 %v4854_v44  ;;  %4618 = vmatpush3.bf16.msra.mxu1 %v4855_v5 }
 0x585   :  { %4060 = vmatmul.mubr.bf16.vlgmr.msra.gmra.mrb[20].mxu0 %v3424_v51  ;;  %4100 = vmatmul.mubr.bf16.vlgmr.msra.gmra.mrb[20].mxu1 %v3426_v6 }
 0x638   :  { %v4553_v52 = vpop.f32.mrb[16].mxu0  ;;  %v4575_v7 = vpop.f32.mrb[16].mxu1 }
 0x639   :  { %v4554_v18 = vpop.f32.mrb[17].mxu0  ;;  %v4576_v13 = vpop.f32.mrb[17].mxu1 }
 0x63a   :  { %v4555_v37 = vadd.f32 %v4554_v18, %v4553_v52  ;;  %v4577_v39 = vadd.f32 %v4576_v13, %v4575_v7  ;;  %v4556_v17 = vpop.f32.mrb[18].mxu0  ;;  %v4578_v19 = vpop.f32.mrb[18].mxu1 }
 0x63b   :  { %v4557_v24 = vpop.f32.mrb[19].mxu0  ;;  %v4579_v20 = vpop.f32.mrb[19].mxu1 }
 0x63c   :  { %v3982_v0 = vadd.f32 %v4555_v37, %v4469_v8 }
 0x63e   :  { %v4022_v22 = vadd.f32 %v4577_v39, %v3982_v0 }
 0x658   :  { %v4597_v53 = vpop.f32.mrb[20].mxu0  ;;  %v4619_v33 = vpop.f32.mrb[20].mxu1 }
 0x659   :  { %v4598_v36 = vpop.f32.mrb[21].mxu0  ;;  %v4620_v38 = vpop.f32.mrb[21].mxu1 }
 0x65a   :  { %v4599_v16 = vadd.f32 %v4598_v36, %v4597_v53  ;;  %v4621_v11 = vadd.f32 %v4620_v38, %v4619_v33  ;;  %v4600_v21 = vpop.f32.mrb[22].mxu0  ;;  %v4622_v23 = vpop.f32.mrb[22].mxu1 }
 0x65b   :  { %v4601_v25 = vpop.f32.mrb[23].mxu0  ;;  %v4623_v26 = vpop.f32.mrb[23].mxu1 }
 0x65c   :  { %v4062_v28 = vadd.f32 %v4599_v16, %v4022_v22 }
 0x65e   :  { %v4102_v30 = vadd.f32 %v4621_v11, %v4062_v28 }
 0x660   :  { %4884 = vtanh.f32 %v4102_v30 }
 0x66a   :  { %v4885_v31 = vpop.eup %4884 }
 0x66b   :  { %4108 = vst [vmem:[#allocation17] sm:$0xff] %v4885_v31 }
 0x66c   :  { %5073 = shalt.err (!%p5070_p12)
}
 0x66d   :  { %s5074_s28 = scalar_lea.hbm %s5613_s14, 128 }
 0x66e   :  { %p5075_p13 = scmp.ne.s32.totalorder %s5613_s14, %s5074_s28  ;;  %p5078_p0 = scmp.lt.u32.totalorder %s5074_s28, %s5613_s14 }
 0x670   :  { %p5080_p1 = pnand %p5078_p0, %p5075_p13 }
 0x672   :  { %5083 = shalt.err (!%p5080_p1)
}
 0x673   :  { %4118 = dma.vmem_to_hbm [thread:$0]  %s4116_s27, 128, %s5613_s14, [#allocation5]  }
 0x674   :  { %5094 = dma.done.wait [#allocation5], 128  }
 0x675   :  { %5095 = vsyncadd [#allocation5], 4294967168 }
 0x676   :  { %4122 = vsyncpa [#allocation4], 1 }
 0x677   :  { %4123 = vsyncpa [#allocation7], 1 }
 0x678   :  { %4124 = vsyncpa [#allocation10], 1 }
 0x679   :  { %4125 = vsyncpa [#allocation13], 1 }
 0x67a   :  { %4126 = vsyncpa [#allocation16], 1 }
 0x67b   :  { %4127 = vsyncpa [#allocation5], 1 }

</bundles_post_ra>
